<compile_context>
chip_gen: v5e
topology: v5e:2x2
jax: 0.10.0
libtpu: 0.0.40
codegen_flags: <defaults>
</compile_context>

<pallas_src>
import functools
import math

import jax
import jax.numpy as jnp
from jax.experimental import pallas as pl
from jax.experimental.pallas import tpu as pltpu

EPS = 1e-5
VMEM_LIMIT = 48 * 1024 * 1024      # explicit budget; safe on v5e/v6e/v7x


def _round_up(v, m):
    return -(-v // m) * m


# ---------------------------------------------------------------------------
# Pallas kernels
# ---------------------------------------------------------------------------
def _conv_bn_stats_kernel(*refs, offsets, stride, wc, wo, m_out,
                          in_affine, in_valid_hw, shortcut, canvas_out):
    """Per image:
       - optional fused BN(scale/shift)+ReLU of the *input* canvas (previous
         layer's BN, applied once, re-zeroing the pad ring via an iota mask),
       - 3x3 conv as ONE MXU dot over an in-VMEM im2col tile (9 tap windows
         concatenated along the contraction dim),
       - fused per-channel sum / sum-of-squares of the output (next BN),
       - optional fused shortcut: 1x1 downsample conv (+ stats) OR the raw
         identity residual re-emitted in the output row layout,
       - output stored either in plain row layout or directly in the *next*
         conv's zero-padded canvas layout (head/tail zero rows)."""
    i = 0
    x_ref = refs[i]; i += 1                  # (1, S, Rp, Cin) bf16 phase-stacked canvas
    w_ref = refs[i]; i += 1                  # (9*Cin, Cout) bf16
    if in_affine:
        sc_ref, sh_ref = refs[i], refs[i + 1]; i += 2     # (1, Cin) f32
    if shortcut == "conv":
        wd_ref = refs[i]; i += 1             # (Cin, Cout_d) bf16
    y_ref, s_ref, q_ref = refs[i], refs[i + 1], refs[i + 2]; i += 3
    if shortcut is not None:
        r_ref = refs[i]; i += 1
    if shortcut == "conv":
        rs_ref, rq_ref = refs[i], refs[i + 1]; i += 2

    cout = y_ref.shape[2]
    xs = x_ref[0]                            # (S, Rp, Cin) bf16

    if in_affine:
        # previous layer's BN + ReLU (once, in f32), then re-zero the canvas
        # padding (interior mask built from iota -> no mask DMA), cast once.
        hi, wi = in_valid_hw
        rp = xs.shape[1]
        idx = jax.lax.broadcasted_iota(jnp.int32, (rp, 1), 0)
        row, col = idx // wc, idx % wc
        interior = (row >= 2) & (row < 2 + hi) & (col < wi)
        xf = xs[0].astype(jnp.float32)
        xf = jnp.where(interior,
                       jnp.maximum(xf * sc_ref[0] + sh_ref[0], 0.0), 0.0)
        xb = xf.astype(jnp.bfloat16)[None]   # (1, Rp, Cin)
    else:
        xb = xs                              # raw canvas, already bf16

    # im2col in VMEM: 9 contiguous tap windows (phase-decomposed for stride>1)
    # concatenated along the contraction dim -> a single MXU dot.
    cols = []
    for off in offsets:
        p, b = off % stride, off // stride
        cols.append(xb[p, b:b + m_out, :])
    patch = cols[0] if len(cols) == 1 else jnp.concatenate(cols, axis=-1)
    acc = jnp.dot(patch, w_ref[...], preferred_element_type=jnp.float32)

    # zero the junk (right-pad) output columns; mask built in-kernel.
    midx = jax.lax.broadcasted_iota(jnp.int32, (m_out, 1), 0)
    valid_col = (midx % wc) < wo
    acc = jnp.where(valid_col, acc, 0.0)

    if canvas_out is None:
        y_ref[0] = acc.astype(y_ref.dtype)
    else:
        head, total = canvas_out             # write in the NEXT conv's canvas layout
        tail = total - head - m_out
        y_ref[0, pl.ds(0, head), :] = jnp.zeros((head, cout), y_ref.dtype)
        y_ref[0, pl.ds(head, m_out), :] = acc.astype(y_ref.dtype)
        y_ref[0, pl.ds(head + m_out, tail), :] = jnp.zeros((tail, cout), y_ref.dtype)

    s_ref[0] = jnp.sum(acc, axis=0, keepdims=True)
    q_ref[0] = jnp.sum(acc * acc, axis=0, keepdims=True)

    off_c = 2 * wc                           # pixel (s*ro, s*co) relative to output m
    if shortcut == "conv":                   # fused 1x1 downsample conv + stats
        p, b = off_c % stride, off_c // stride
        dwin = xb[p, b:b + m_out, :]
        dacc = jnp.dot(dwin, wd_ref[...], preferred_element_type=jnp.float32)
        dacc = jnp.where(valid_col, dacc, 0.0)
        r_ref[0] = dacc.astype(r_ref.dtype)
        rs_ref[0] = jnp.sum(dacc, axis=0, keepdims=True)
        rq_ref[0] = jnp.sum(dacc * dacc, axis=0, keepdims=True)
    elif shortcut == "identity":             # raw x re-emitted in output row layout
        rwin = xb[0, off_c:off_c + m_out, :]
        r_ref[0] = jnp.where(valid_col, rwin, jnp.zeros_like(rwin))


def _bn_add_relu_kernel(*refs, residual_affine):
    """Fused epilogue: BN(conv2) + [BN(downsample) | raw shortcut] + ReLU."""
    if residual_affine:
        y_ref, sc_ref, sh_ref, r_ref, rsc_ref, rsh_ref, o_ref = refs
    else:
        y_ref, sc_ref, sh_ref, r_ref, o_ref = refs
    v = y_ref[0].astype(jnp.float32) * sc_ref[0] + sh_ref[0]
    r = r_ref[0].astype(jnp.float32)
    if residual_affine:
        r = r * rsc_ref[0] + rsh_ref[0]
    o_ref[0] = jnp.maximum(v + r, 0.0)


# ---------------------------------------------------------------------------
# Wrappers (layout glue + pallas_call plumbing)
# ---------------------------------------------------------------------------
def _build_canvas(x_nhwc, stride, wc, m_out):
    """Phase-stacked, flattened, zero-padded bf16 canvas: pixel (r, c) lives at
    flat index 2*wc + r*wc + c; phase p, row j holds flat[stride*j + p], so
    every 3x3 tap becomes a contiguous row-window of one phase."""
    n, h, w, c = x_nhwc.shape
    max_off = 3 * wc + 1
    rp = _round_up(max_off // stride + m_out, 8)
    total = stride * rp
    hc = -(-total // wc)
    xp = jnp.pad(x_nhwc, ((0, 0), (2, hc - h - 2), (0, wc - w), (0, 0)))
    flat = xp.reshape(n, hc * wc, c)[:, :total, :].astype(jnp.bfloat16)
    return flat.reshape(n, rp, stride, c).transpose(0, 2, 1, 3)   # (n, S, Rp, c)


def conv_bn_stats(xcanvas, w_flat, *, stride, wc, wo, m_out,
                  in_scale=None, in_shift=None, in_valid_hw=None,
                  wd=None, identity_residual=False, canvas_out=None):
    """Fused conv3x3 (+ optional fused input BN/ReLU) + per-image channel stats
    (+ optional fused 1x1-downsample / identity residual emission)."""
    n, s, rp, cin = xcanvas.shape
    k, cout = w_flat.shape
    assert k == 9 * cin
    in_affine = in_scale is not None
    assert not in_affine or stride == 1
    shortcut = "conv" if wd is not None else ("identity" if identity_residual else None)

    offsets = tuple((dy + 1) * wc + dx - 1 for dy in range(3) for dx in range(3))

    in_specs = [pl.BlockSpec((1, s, rp, cin), lambda i: (i, 0, 0, 0)),
                pl.BlockSpec((k, cout), lambda i: (0, 0))]
    args = [xcanvas, w_flat]
    if in_affine:
        in_specs += [pl.BlockSpec((1, cin), lambda i: (0, 0)),
                     pl.BlockSpec((1, cin), lambda i: (0, 0))]
        args += [in_scale.reshape(1, cin).astype(jnp.float32),
                 in_shift.reshape(1, cin).astype(jnp.float32)]
    if shortcut == "conv":
        cd = wd.shape[-1]
        in_specs += [pl.BlockSpec((cin, cd), lambda i: (0, 0))]
        args += [wd]

    y_rows = m_out if canvas_out is None else canvas_out[1]
    out_shapes = [jax.ShapeDtypeStruct((n, y_rows, cout), jnp.bfloat16),
                  jax.ShapeDtypeStruct((n, 1, cout), jnp.float32),
                  jax.ShapeDtypeStruct((n, 1, cout), jnp.float32)]
    out_specs = [pl.BlockSpec((1, y_rows, cout), lambda i: (i, 0, 0)),
                 pl.BlockSpec((1, 1, cout), lambda i: (i, 0, 0)),
                 pl.BlockSpec((1, 1, cout), lambda i: (i, 0, 0))]
    if shortcut is not None:
        cr = cin if shortcut == "identity" else wd.shape[-1]
        out_shapes += [jax.ShapeDtypeStruct((n, m_out, cr), jnp.bfloat16)]
        out_specs += [pl.BlockSpec((1, m_out, cr), lambda i: (i, 0, 0))]
    if shortcut == "conv":
        cd = wd.shape[-1]
        out_shapes += [jax.ShapeDtypeStruct((n, 1, cd), jnp.float32)] * 2
        out_specs += [pl.BlockSpec((1, 1, cd), lambda i: (i, 0, 0))] * 2

    kernel = functools.partial(
        _conv_bn_stats_kernel, offsets=offsets, stride=stride, wc=wc, wo=wo,
        m_out=m_out, in_affine=in_affine, in_valid_hw=in_valid_hw,
        shortcut=shortcut, canvas_out=canvas_out)
    return pl.pallas_call(
        kernel,
        out_shape=tuple(out_shapes),
        grid_spec=pltpu.PrefetchScalarGridSpec(
            num_scalar_prefetch=0,
            grid=(n,),
            in_specs=in_specs,
            out_specs=tuple(out_specs)),
        compiler_params=pltpu.CompilerParams(
            dimension_semantics=("parallel",),
            vmem_limit_bytes=VMEM_LIMIT),
    )(*args)


def bn_add_relu(y, scale, shift, residual, rscale=None, rshift=None):
    """out = relu(y*scale + shift + (residual*rscale + rshift | residual))."""
    n, m, c = y.shape
    residual_affine = rscale is not None
    in_specs = [pl.BlockSpec((1, m, c), lambda i: (i, 0, 0)),
                pl.BlockSpec((1, c), lambda i: (0, 0)),
                pl.BlockSpec((1, c), lambda i: (0, 0)),
                pl.BlockSpec((1, m, c), lambda i: (i, 0, 0))]
    args = [y, scale.reshape(1, c).astype(jnp.float32),
            shift.reshape(1, c).astype(jnp.float32), residual]
    if residual_affine:
        in_specs += [pl.BlockSpec((1, c), lambda i: (0, 0)),
                     pl.BlockSpec((1, c), lambda i: (0, 0))]
        args += [rscale.reshape(1, c).astype(jnp.float32),
                 rshift.reshape(1, c).astype(jnp.float32)]
    return pl.pallas_call(
        functools.partial(_bn_add_relu_kernel, residual_affine=residual_affine),
        out_shape=jax.ShapeDtypeStruct((n, m, c), jnp.float32),
        grid_spec=pltpu.PrefetchScalarGridSpec(
            num_scalar_prefetch=0,
            grid=(n,),
            in_specs=in_specs,
            out_specs=pl.BlockSpec((1, m, c), lambda i: (i, 0, 0))),
        compiler_params=pltpu.CompilerParams(
            dimension_semantics=("parallel",),
            vmem_limit_bytes=VMEM_LIMIT),
    )(*args)


def _bn_scale_shift(s, q, count, gamma, beta):
    mean = jnp.sum(s, axis=(0, 1)) / count
    # train-mode (biased) variance; clamp >= 0 against E[x^2]-E[x]^2 cancellation
    var = jnp.maximum(jnp.sum(q, axis=(0, 1)) / count - mean * mean, 0.0)
    scale = gamma * jax.lax.rsqrt(var + EPS)
    shift = beta - mean * scale
    return scale, shift


# ---------------------------------------------------------------------------
# BasicBlock forward (Pallas path)
# ---------------------------------------------------------------------------
def basicblock_forward(x_nchw, params, stride):
    n, cin, h, w = x_nchw.shape
    cout = params["w1"].shape[0]
    x = jnp.transpose(x_nchw, (0, 2, 3, 1)).astype(jnp.float32)       # NHWC
    ho = (h - 1) // stride + 1
    wo = (w - 1) // stride + 1
    identity = ((n, cout, ho, wo) == tuple(x_nchw.shape))             # module's shape test

    align = 8 * stride // math.gcd(8, stride)     # pitch multiple of 8 and of stride
    wc = _round_up(w + 2, align)                  # shared canvas pitch for the block
    m_out = ho * wc                               # rows of the pitch-wc output layout
    head = 2 * wc                                 # canvas head (pixel (0,0) offset)
    l2 = _round_up(3 * wc + 1 + m_out, 8)         # conv2's canvas row count

    # conv1 (+ fused shortcut) + BN1 stats; output written in conv2's canvas layout.
    x_canvas = _build_canvas(x, stride, wc, m_out)
    w1 = params["w1"].transpose(2, 3, 1, 0).reshape(9 * cin, cout).astype(jnp.bfloat16)
    if identity:
        y1, s1, q1, res = conv_bn_stats(
            x_canvas, w1, stride=stride, wc=wc, wo=wo, m_out=m_out,
            identity_residual=True, canvas_out=(head, l2))
    else:
        wd = params["wd"].transpose(2, 3, 1, 0).reshape(cin, cout).astype(jnp.bfloat16)
        y1, s1, q1, res, sd, qd = conv_bn_stats(
            x_canvas, w1, stride=stride, wc=wc, wo=wo, m_out=m_out,
            wd=wd, canvas_out=(head, l2))

    cnt = n * ho * wo
    scale1, shift1 = _bn_scale_shift(s1, q1, cnt, params["g1"], params["be1"])

    # conv2: stride-1 3x3; BN1 affine + ReLU fused on its input, consuming y1
    # directly in canvas layout (no HBM repack between the two convs).
    w2 = params["w2"].transpose(2, 3, 1, 0).reshape(9 * cout, cout).astype(jnp.bfloat16)
    y2, s2, q2 = conv_bn_stats(
        y1.reshape(n, 1, l2, cout), w2, stride=1, wc=wc, wo=wo, m_out=m_out,
        in_scale=scale1, in_shift=shift1, in_valid_hw=(ho, wo))
    scale2, shift2 = _bn_scale_shift(s2, q2, cnt, params["g2"], params["be2"])

    # fused epilogue: BN2 + (BN(downsample) | identity) + ReLU
    if identity:
        out = bn_add_relu(y2, scale2, shift2, res)
    else:
        scaled, shiftd = _bn_scale_shift(sd, qd, cnt, params["gd"], params["bed"])
        out = bn_add_relu(y2, scale2, shift2, res, scaled, shiftd)

    out = out.reshape(n, ho, wc, cout)[:, :, :wo, :]
    return jnp.transpose(out, (0, 3, 1, 2))                          # back to NCHW


# ---------------------------------------------------------------------------
# Pure-JAX reference (f32 HIGHEST precision; includes the conv biases, which
# cancel exactly under train-mode BatchNorm)
# ---------------------------------------------------------------------------
def reference_forward(x_nchw, params, stride):
    hp = jax.lax.Precision.HIGHEST
    x = jnp.transpose(x_nchw, (0, 2, 3, 1)).astype(jnp.float32)

    def conv(xx, wgt, b, s, pad):
        y = jax.lax.conv_general_dilated(
            xx, jnp.transpose(wgt, (2, 3, 1, 0)),
            window_strides=(s, s), padding=[(pad, pad), (pad, pad)],
            dimension_numbers=("NHWC", "HWIO", "NHWC"), precision=hp)
        return y + b

    def bn(y, g, be):
        m = y.mean(axis=(0, 1, 2))
        v = y.var(axis=(0, 1, 2))
        return (y - m) * jax.lax.rsqrt(v + EPS) * g + be

    hdn = jax.nn.relu(bn(conv(x, params["w1"], params["b1"], stride, 1),
                         params["g1"], params["be1"]))
    y = bn(conv(hdn, params["w2"], params["b2"], 1, 1),
           params["g2"], params["be2"])
    if (x_nchw.shape[0], y.shape[-1], y.shape[1], y.shape[2]) != tuple(x_nchw.shape):
        sc = bn(conv(x, params["wd"], params["bd"], stride, 0),
                params["gd"], params["bed"])
    else:
        sc = x
    return jnp.transpose(jax.nn.relu(y + sc), (0, 3, 1, 2))


# ---------------------------------------------------------------------------
def init_params(key, in_channels, out_channels):
    ks = jax.random.split(key, 12)
    nrm = lambda k, s: (0.1 * jax.random.normal(k, s)).astype(jnp.float32)
    return {
        "w1": nrm(ks[0], (out_channels, in_channels, 3, 3)),
        "b1": nrm(ks[1], (out_channels,)),
        "g1": 1.0 + nrm(ks[2], (out_channels,)),
        "be1": nrm(ks[3], (out_channels,)),
        "w2": nrm(ks[4], (out_channels, out_channels, 3, 3)),
        "b2": nrm(ks[5], (out_channels,)),
        "g2": 1.0 + nrm(ks[6], (out_channels,)),
        "be2": nrm(ks[7], (out_channels,)),
        "wd": nrm(ks[8], (out_channels, in_channels, 1, 1)),
        "bd": nrm(ks[9], (out_channels,)),
        "gd": 1.0 + nrm(ks[10], (out_channels,)),
        "bed": nrm(ks[11], (out_channels,)),
    }


if __name__ == "__main__":
    key = jax.random.PRNGKey(0)
    kx, kp1, kp2, kp3 = jax.random.split(key, 4)

    batch, cin, spatial = 2, 4, 16
    x = jax.random.normal(kx, (batch, cin, spatial, spatial), dtype=jnp.float32)

    def check(params, stride, exp_shape):
        out = jax.block_until_ready(basicblock_forward(x, params, stride))
        ref = jax.block_until_ready(reference_forward(x, params, stride))
        assert out.shape == exp_shape, (out.shape, exp_shape)
        max_err = float(jnp.max(jnp.abs(out - ref)))
        # Tolerance reflects bf16 MXU operands + bf16 activation streams vs the
        # f32-HIGHEST reference.
        assert jnp.allclose(out, ref, atol=1e-1, rtol=1e-1), max_err
        assert float(jnp.mean(jnp.abs(out - ref))) < 5e-2, max_err

    # 1) identity shortcut (stride 1, cin == cout)
    check(init_params(kp1, cin, cin), 1, (batch, cin, spatial, spatial))
    # 2) downsample shortcut via channel change (1x1 conv + BN fused into conv1)
    check(init_params(kp2, cin, 8), 1, (batch, 8, spatial, spatial))
    # 3) downsample shortcut via stride 2 (exercises the phase-decomposed strided path)
    check(init_params(kp3, cin, 8), 2, (batch, 8, spatial // 2, spatial // 2))

    print("KERNEL_OK")
</pallas_src>

<mosaic_0001>
module attributes {stable_mosaic.version = 11 : i64} {
  func.func @_conv_bn_stats_kernel(%arg0: i32, %arg1: memref<1x1x464x4xbf16, #tpu.memory_space<vmem>>, %arg2: memref<36x4xbf16, #tpu.memory_space<vmem>>, %arg3: memref<1x464x4xbf16, #tpu.memory_space<vmem>>, %arg4: memref<1x1x4xf32, #tpu.memory_space<vmem>>, %arg5: memref<1x1x4xf32, #tpu.memory_space<vmem>>, %arg6: memref<1x384x4xbf16, #tpu.memory_space<vmem>>) attributes {dimension_semantics = [#tpu.dimension_semantics<parallel>], iteration_bounds = array<i64: 2>, scalar_prefetch = 0 : i64, scratch_operands = 0 : i64, tpu.core_type = #tpu.core_type<tc>, window_params = [{transform_indices = @transform_0, window_bounds = array<i64: 1, 1, 464, 4>}, {pipeline_mode = #tpu.pipeline_mode<synchronous>, transform_indices = @transform_1, window_bounds = array<i64: 36, 4>}, {transform_indices = @transform_2, window_bounds = array<i64: 1, 464, 4>}, {transform_indices = @transform_3, window_bounds = array<i64: 1, 1, 4>}, {transform_indices = @transform_4, window_bounds = array<i64: 1, 1, 4>}, {transform_indices = @transform_5, window_bounds = array<i64: 1, 384, 4>}]} {
    %c0 = arith.constant 0 : index
    %c0_0 = arith.constant 0 : index
    %c0_1 = arith.constant 0 : index
    %c0_2 = arith.constant 0 : index
    %0 = vector.load %arg1[%c0, %c0_0, %c0_1, %c0_2] : memref<1x1x464x4xbf16, #tpu.memory_space<vmem>>, vector<1x1x464x4xbf16>
    %1 = vector.shape_cast %0 : vector<1x1x464x4xbf16> to vector<1x464x4xbf16>
    %2 = vector.extract_strided_slice %1 {offsets = [0, 23, 0], sizes = [1, 384, 4], strides = [1, 1, 1]} : vector<1x464x4xbf16> to vector<1x384x4xbf16>
    %3 = vector.shape_cast %2 : vector<1x384x4xbf16> to vector<384x4xbf16>
    %4 = vector.extract_strided_slice %1 {offsets = [0, 24, 0], sizes = [1, 384, 4], strides = [1, 1, 1]} : vector<1x464x4xbf16> to vector<1x384x4xbf16>
    %5 = vector.shape_cast %4 : vector<1x384x4xbf16> to vector<384x4xbf16>
    %6 = vector.extract_strided_slice %1 {offsets = [0, 25, 0], sizes = [1, 384, 4], strides = [1, 1, 1]} : vector<1x464x4xbf16> to vector<1x384x4xbf16>
    %7 = vector.shape_cast %6 : vector<1x384x4xbf16> to vector<384x4xbf16>
    %8 = vector.extract_strided_slice %1 {offsets = [0, 47, 0], sizes = [1, 384, 4], strides = [1, 1, 1]} : vector<1x464x4xbf16> to vector<1x384x4xbf16>
    %9 = vector.shape_cast %8 : vector<1x384x4xbf16> to vector<384x4xbf16>
    %10 = vector.extract_strided_slice %1 {offsets = [0, 48, 0], sizes = [1, 384, 4], strides = [1, 1, 1]} : vector<1x464x4xbf16> to vector<1x384x4xbf16>
    %11 = vector.shape_cast %10 : vector<1x384x4xbf16> to vector<384x4xbf16>
    %12 = vector.extract_strided_slice %1 {offsets = [0, 49, 0], sizes = [1, 384, 4], strides = [1, 1, 1]} : vector<1x464x4xbf16> to vector<1x384x4xbf16>
    %13 = vector.shape_cast %12 : vector<1x384x4xbf16> to vector<384x4xbf16>
    %14 = vector.extract_strided_slice %1 {offsets = [0, 71, 0], sizes = [1, 384, 4], strides = [1, 1, 1]} : vector<1x464x4xbf16> to vector<1x384x4xbf16>
    %15 = vector.shape_cast %14 : vector<1x384x4xbf16> to vector<384x4xbf16>
    %16 = vector.extract_strided_slice %1 {offsets = [0, 72, 0], sizes = [1, 384, 4], strides = [1, 1, 1]} : vector<1x464x4xbf16> to vector<1x384x4xbf16>
    %17 = vector.shape_cast %16 : vector<1x384x4xbf16> to vector<384x4xbf16>
    %18 = vector.extract_strided_slice %1 {offsets = [0, 73, 0], sizes = [1, 384, 4], strides = [1, 1, 1]} : vector<1x464x4xbf16> to vector<1x384x4xbf16>
    %19 = vector.shape_cast %18 : vector<1x384x4xbf16> to vector<384x4xbf16>
    %20 = tpu.concatenate %3, %5, %7, %9, %11, %13, %15, %17, %19 in 1 : vector<384x4xbf16>, vector<384x4xbf16>, vector<384x4xbf16>, vector<384x4xbf16>, vector<384x4xbf16>, vector<384x4xbf16>, vector<384x4xbf16>, vector<384x4xbf16>, vector<384x4xbf16> -> vector<384x36xbf16>
    %c0_3 = arith.constant 0 : index
    %c0_4 = arith.constant 0 : index
    %21 = vector.load %arg2[%c0_3, %c0_4] : memref<36x4xbf16, #tpu.memory_space<vmem>>, vector<36x4xbf16>
    %cst = arith.constant dense<0.000000e+00> : vector<384x4xf32>
    %22 = tpu.matmul %20, %21, %cst {dimension_numbers = #tpu.dot_dimension_numbers<[1], [0], [0], [1], [0, 0, 1, 1], [], []>} : vector<384x36xbf16>, vector<36x4xbf16>, vector<384x4xf32> -> vector<384x4xf32>
    %23 = tpu.iota {dimensions = array<i32: 0>} : vector<384x1xi32>
    %c24_i32 = arith.constant 24 : i32
    %c0_i32 = arith.constant 0 : i32
    %24 = arith.cmpi eq, %c24_i32, %c0_i32 : i32
    %c1_i32 = arith.constant 1 : i32
    %25 = arith.select %24, %c1_i32, %c24_i32 : i32
    %26 = vector.broadcast %25 : i32 to vector<384x1xi32>
    %27 = arith.remsi %23, %26 : vector<384x1xi32>
    %c0_i32_5 = arith.constant 0 : i32
    %28 = vector.broadcast %c0_i32_5 : i32 to vector<384x1xi32>
    %29 = arith.cmpi ne, %27, %28 : vector<384x1xi32>
    %c0_i32_6 = arith.constant 0 : i32
    %30 = vector.broadcast %c0_i32_6 : i32 to vector<384x1xi32>
    %31 = arith.cmpi slt, %27, %30 : vector<384x1xi32>
    %c0_i32_7 = arith.constant 0 : i32
    %32 = arith.cmpi slt, %25, %c0_i32_7 : i32
    %33 = vector.broadcast %32 : i1 to vector<384x1xi1>
    %34 = vector.broadcast %33 : vector<384x1xi1> to vector<384x1xi1>
    %35 = arith.xori %31, %34 : vector<384x1xi1>
    %36 = arith.andi %35, %29 : vector<384x1xi1>
    %37 = vector.broadcast %25 : i32 to vector<384x1xi32>
    %38 = arith.addi %27, %37 : vector<384x1xi32>
    %39 = arith.select %36, %38, %27 : vector<384x1xi1>, vector<384x1xi32>
    %c16_i32 = arith.constant 16 : i32
    %40 = vector.broadcast %c16_i32 : i32 to vector<384x1xi32>
    %41 = arith.cmpi slt, %39, %40 : vector<384x1xi32>
    %cst_8 = arith.constant 0.000000e+00 : f32
    %42 = vector.shape_cast %41 : vector<384x1xi1> to vector<384x1xi1>
    %43 = vector.broadcast %42 : vector<384x1xi1> to vector<384x4xi1>
    %44 = vector.broadcast %cst_8 : f32 to vector<384x4xf32>
    %45 = arith.select %43, %22, %44 : vector<384x4xi1>, vector<384x4xf32>
    %cst_9 = arith.constant 0.000000e+00 : bf16
    %46 = vector.broadcast %cst_9 : bf16 to vector<48x4xbf16>
    %c0_10 = arith.constant 0 : index
    %c0_11 = arith.constant 0 : index
    %c0_12 = arith.constant 0 : index
    %47 = vector.load %arg3[%c0_10, %c0_11, %c0_12] : memref<1x464x4xbf16, #tpu.memory_space<vmem>>, vector<1x48x4xbf16>
    %48 = vector.shape_cast %47 : vector<1x48x4xbf16> to vector<48x4xbf16>
    %49 = vector.shape_cast %46 : vector<48x4xbf16> to vector<1x48x4xbf16>
    tpu.vector_store %arg3[%c0_10, %c0_11, %c0_12], %49 {strides = array<i32>} : memref<1x464x4xbf16, #tpu.memory_space<vmem>>, vector<1x48x4xbf16>,
    %50 = arith.truncf %45 : vector<384x4xf32> to vector<384x4xbf16>
    %c0_13 = arith.constant 0 : index
    %c48 = arith.constant 48 : index
    %c0_14 = arith.constant 0 : index
    %51 = vector.load %arg3[%c0_13, %c48, %c0_14] : memref<1x464x4xbf16, #tpu.memory_space<vmem>>, vector<1x384x4xbf16>
    %52 = vector.shape_cast %51 : vector<1x384x4xbf16> to vector<384x4xbf16>
    %53 = vector.shape_cast %50 : vector<384x4xbf16> to vector<1x384x4xbf16>
    tpu.vector_store %arg3[%c0_13, %c48, %c0_14], %53 {strides = array<i32>} : memref<1x464x4xbf16, #tpu.memory_space<vmem>>, vector<1x384x4xbf16>,
    %cst_15 = arith.constant 0.000000e+00 : bf16
    %54 = vector.broadcast %cst_15 : bf16 to vector<32x4xbf16>
    %c0_16 = arith.constant 0 : index
    %c432 = arith.constant 432 : index
    %c0_17 = arith.constant 0 : index
    %55 = vector.load %arg3[%c0_16, %c432, %c0_17] : memref<1x464x4xbf16, #tpu.memory_space<vmem>>, vector<1x32x4xbf16>
    %56 = vector.shape_cast %55 : vector<1x32x4xbf16> to vector<32x4xbf16>
    %57 = vector.shape_cast %54 : vector<32x4xbf16> to vector<1x32x4xbf16>
    tpu.vector_store %arg3[%c0_16, %c432, %c0_17], %57 {strides = array<i32>} : memref<1x464x4xbf16, #tpu.memory_space<vmem>>, vector<1x32x4xbf16>,
    %cst_18 = arith.constant dense<0.000000e+00> : vector<4xf32>
    %58 = vector.multi_reduction <add>, %45, %cst_18 [0] : vector<384x4xf32> to vector<4xf32>
    %59 = vector.shape_cast %58 : vector<4xf32> to vector<1x4xf32>
    %c0_19 = arith.constant 0 : index
    %c0_20 = arith.constant 0 : index
    %c0_21 = arith.constant 0 : index
    %60 = vector.load %arg4[%c0_19, %c0_20, %c0_21] : memref<1x1x4xf32, #tpu.memory_space<vmem>>, vector<1x1x4xf32>
    %61 = vector.shape_cast %60 : vector<1x1x4xf32> to vector<1x4xf32>
    %62 = vector.shape_cast %59 : vector<1x4xf32> to vector<1x1x4xf32>
    tpu.vector_store %arg4[%c0_19, %c0_20, %c0_21], %62 {strides = array<i32>} : memref<1x1x4xf32, #tpu.memory_space<vmem>>, vector<1x1x4xf32>,
    %63 = arith.mulf %45, %45 : vector<384x4xf32>
    %cst_22 = arith.constant dense<0.000000e+00> : vector<4xf32>
    %64 = vector.multi_reduction <add>, %63, %cst_22 [0] : vector<384x4xf32> to vector<4xf32>
    %65 = vector.shape_cast %64 : vector<4xf32> to vector<1x4xf32>
    %c0_23 = arith.constant 0 : index
    %c0_24 = arith.constant 0 : index
    %c0_25 = arith.constant 0 : index
    %66 = vector.load %arg5[%c0_23, %c0_24, %c0_25] : memref<1x1x4xf32, #tpu.memory_space<vmem>>, vector<1x1x4xf32>
    %67 = vector.shape_cast %66 : vector<1x1x4xf32> to vector<1x4xf32>
    %68 = vector.shape_cast %65 : vector<1x4xf32> to vector<1x1x4xf32>
    tpu.vector_store %arg5[%c0_23, %c0_24, %c0_25], %68 {strides = array<i32>} : memref<1x1x4xf32, #tpu.memory_space<vmem>>, vector<1x1x4xf32>,
    %69 = vector.extract_strided_slice %1 {offsets = [0, 48, 0], sizes = [1, 384, 4], strides = [1, 1, 1]} : vector<1x464x4xbf16> to vector<1x384x4xbf16>
    %70 = vector.shape_cast %69 : vector<1x384x4xbf16> to vector<384x4xbf16>
    %cst_26 = arith.constant 0.000000e+00 : bf16
    %71 = vector.broadcast %cst_26 : bf16 to vector<384x4xbf16>
    %72 = vector.shape_cast %41 : vector<384x1xi1> to vector<384x1xi1>
    %73 = vector.broadcast %72 : vector<384x1xi1> to vector<384x4xi1>
    %74 = arith.select %73, %70, %71 : vector<384x4xi1>, vector<384x4xbf16>
    %c0_27 = arith.constant 0 : index
    %c0_28 = arith.constant 0 : index
    %c0_29 = arith.constant 0 : index
    %75 = vector.load %arg6[%c0_27, %c0_28, %c0_29] : memref<1x384x4xbf16, #tpu.memory_space<vmem>>, vector<1x384x4xbf16>
    %76 = vector.shape_cast %75 : vector<1x384x4xbf16> to vector<384x4xbf16>
    %77 = vector.shape_cast %74 : vector<384x4xbf16> to vector<1x384x4xbf16>
    tpu.vector_store %arg6[%c0_27, %c0_28, %c0_29], %77 {strides = array<i32>} : memref<1x384x4xbf16, #tpu.memory_space<vmem>>, vector<1x384x4xbf16>,
    return
  }
  func.func @transform_0(%arg0: i32) -> (i32, i32, i32, i32) {
    %c0_i32 = arith.constant 0 : i32
    %c0_i32_0 = arith.constant 0 : i32
    %c0_i32_1 = arith.constant 0 : i32
    %c0_i32_2 = arith.constant 0 : i32
    return %arg0, %c0_i32, %c0_i32_0, %c0_i32_1 : i32, i32, i32, i32
  }
  func.func @transform_1(%arg0: i32) -> (i32, i32) {
    %c0_i32 = arith.constant 0 : i32
    %c0_i32_0 = arith.constant 0 : i32
    %c0_i32_1 = arith.constant 0 : i32
    return %c0_i32, %c0_i32_0 : i32, i32
  }
  func.func @transform_2(%arg0: i32) -> (i32, i32, i32) {
    %c0_i32 = arith.constant 0 : i32
    %c0_i32_0 = arith.constant 0 : i32
    %c0_i32_1 = arith.constant 0 : i32
    return %arg0, %c0_i32, %c0_i32_0 : i32, i32, i32
  }
  func.func @transform_3(%arg0: i32) -> (i32, i32, i32) {
    %c0_i32 = arith.constant 0 : i32
    %c0_i32_0 = arith.constant 0 : i32
    %c0_i32_1 = arith.constant 0 : i32
    return %arg0, %c0_i32, %c0_i32_0 : i32, i32, i32
  }
  func.func @transform_4(%arg0: i32) -> (i32, i32, i32) {
    %c0_i32 = arith.constant 0 : i32
    %c0_i32_0 = arith.constant 0 : i32
    %c0_i32_1 = arith.constant 0 : i32
    return %arg0, %c0_i32, %c0_i32_0 : i32, i32, i32
  }
  func.func @transform_5(%arg0: i32) -> (i32, i32, i32) {
    %c0_i32 = arith.constant 0 : i32
    %c0_i32_0 = arith.constant 0 : i32
    %c0_i32_1 = arith.constant 0 : i32
    return %arg0, %c0_i32, %c0_i32_0 : i32, i32, i32
  }
}

</mosaic_0001>

<bundles_post_ra>
// kernel: tpu_custom_call.1
= control target key start
LH: loop header
LB: loop body
LE: loop exit
PB: predicated region body
PF: predicated region fallthrough
CT: control target
= control target key end

     0   :  { %11 = vsyncpa [#allocation3], 0  ;;  %s8941_s0 = inlined_call_operand.vmem [shape: bf16[2,1,464,4], index: 0, kind: input, shape index: {}]   ;;  %s8942_s1 = inlined_call_operand.vmem [shape: bf16[36,4], index: 1, kind: input, shape index: {}]   ;;  %s8943_s2 = inlined_call_operand.vmem [shape: bf16[2,464,4], index: 2, kind: output, shape index: {0}]   ;;  %s8944_s3 = inlined_call_operand.hbm [shape: f32[2,1,4], index: 3, kind: output, shape index: {1}]   ;;  %s8945_s4 = inlined_call_operand.hbm [shape: f32[2,1,4], index: 4, kind: output, shape index: {2}]   ;;  %s8946_s5 = inlined_call_operand.vmem [shape: bf16[2,384,4], index: 5, kind: output, shape index: {3}]  }
   0x1   :  { %13 = vsyncpa [#allocation3 + $0x1], 0 }
   0x2   :  { %14 = vsyncpa [#allocation5], 0 }
   0x3   :  { %16 = vsyncpa [#allocation5 + $0x1], 0  ;;  %s5161_s18 = smov 0   ;;  %s5163_s19 = smov 0  }
   0x4   :  { %s5165_s20 = smov 0   ;;  %s5167_s21 = smov 0  }
   0x5 LB: > { %s5182_s22 = sadd.s32 4294967295, %s5120_s21   ;;  %s4843_s23 = sadd.s32 4294967294, %s5120_s21   ;;  %s5120_s21 = sphi %s5167_s21, %s9519_s21   ;;  %s5116_s20 = sphi %s5165_s20, %s9518_s20   ;;  %s5112_s19 = sphi %s5163_s19, %s9517_s19   ;;  %s5108_s18 = sphi %s5161_s18, %s9516_s18  }
   0x6   : > { %s5186_s24 = sadd.s32 1, %s5120_s21   ;;  %s102_s25 = sadd.s32 1, %s5116_s20 }
   0x7   : > { %s99_s26 = ssub.s32 %s5120_s21, %s5186_s24  ;;  %p112_p0 = scmp.ne.s32.totalorder %s5116_s20, %s5112_s19 }
   0x8   : > { %p100_p1 = scmp.eq.s32.totalorder %s99_s26, 0  ;;  %p113_p2 = scmp.eq.s32.totalorder %s5182_s22, 1 }
   0x9   : > { %p118_p3 = scmp.ne.s32.totalorder %s5112_s19, %s5108_s18  ;;  %p119_p4 = scmp.eq.s32.totalorder %s4843_s23, 1 }
   0xa   : > { %s5197_s27 = scalar_select %p100_p1, %s5116_s20, %s102_s25  }
   0xb   : > { %p5199_p5 = por %p113_p2, %p112_p0  ;;  %p5203_p6 = por %p119_p4, %p118_p3 }
   0xc   : > { %p4846_p7 = scmp.ge.s32.totalorder %s5120_s21, 1  ;;  %p200_p8 = scmp.lt.s32.totalorder %s5120_s21, 3 }
   0xe   : > { %p201_p9 = pnand %p4846_p7, %p200_p8 }
  0x10   : > { %204 = sbr.rel (%p201_p9) target bundleno = 1006 (0x3ee), region = 28 }
  0x15   : > { %p241_p10 = scmp.lt.s32.totalorder %s5182_s22, 1  ;;  %vm460_vm0 = vsmask.f32 3328  ;;  %s5122_s10 = smov 4   ;;  %vm729_vm1 = vcmask 1042432   ;;  %vm9069_vm2 = vcmask 31744  }
  0x16   : > { %s5123_s11 = smov 8   ;;  %s5124_s12 = smov 12   ;;  %vm1504_vm3 = vcmask 64512   ;;  %vm9068_vm4 = vcmask 97280   ;;  %vm9072_vm5 = vcmask 130048   ;;  %vm2154_vm6 = vcmask 1041408  }
  0x17   : > { %s5211_s30 = scalar_select %p241_p10, %s5182_s22, 1  ;;  %vm1657_vm7 = vcmask 162816   ;;  %vm1708_vm8 = vcmask 195584   ;;  %vm1810_vm9 = vcmask 261120   ;;  %vm1759_vm10 = vcmask 228352  }
  0x18   : > { %s5125_s13 = smov 16   ;;  %s5126_s14 = smov 20   ;;  %vm1866_vm11 = vsmask.f32 4352  ;;  %vm2081_vm12 = vcmask 293888  }
  0x19   : > { %s4922_s6 = smul.u32 232, %s5211_s30  ;;  %s5127_s15 = smov 24  }
  0x1a   : > { %s5128_s16 = smov 28   ;;  %s5129_s17 = smov 32  }
  0x1b   : > { %s5219_s9 = scalar_lea.vmem %s8941_s0, %s4922_s6  ;;  %s6983_s25 = scalar_lea.vmem %s8943_s2, %s4922_s6 }
  0x1c   : > { %v5222_v0 = vld [vmem:[%s5219_s9 + $0xc] sm:$0xff]   ;;  %v5225_v1 = vld [vmem:[%s5219_s9 + $0x24] sm:$0xf]  ;;  %v5228_v2 = vld [vmem:[%s5219_s9 + $0x28] sm:$0xf]  ;;  %s4703_s7 = scalar_lea.hbm %s8945_s4, %s5182_s22 }
  0x1d   : > { %v5231_v3 = vld [vmem:[%s5219_s9 + $0x2c] sm:$0xf]  ;;  %v5234_v4 = vld [vmem:[%s5219_s9 + $0x30] sm:$0xf]  ;;  %v8966_v5 = vunpack.c.l.b16 %v5225_v1  ;;  %v8963_v6 = vunpack.c.l.b16 %v5228_v2  ;;  %v462_v8 = vshrl.u32 %v5222_v0, 16  ;;  %v465_v9 = vshll.u32 %v5222_v0, 16 }
  0x1e   : > { %v4903_v7 = vld [vmem:[%s5219_s9 + $0x10] sm:$0xff]   ;;  %v8962_v10 = vunpack.c.l.b16 %v5231_v3  ;;  %v8961_v11 = vunpack.c.l.b16 %v5234_v4  ;;  %v5244_v12 = vld [vmem:[%s5219_s9 + $0x18] sm:$0xf]  ;;  %v5247_v13 = vld [vmem:[%s5219_s9 + $0x1c] sm:$0xf] }
  0x1f   : > { %v5253_v14 = vpack.c.b16 %v8963_v6, %v8966_v5  ;;  %v4893_v15 = vunpack.c.h.b16 %v4903_v7  ;;  %v5256_v16 = vld [vmem:[%s5219_s9 + $0x20] sm:$0xf]  ;;  %v8969_v17 = vunpack.c.l.b16 %v5244_v12  ;;  %v8968_v18 = vunpack.c.l.b16 %v5247_v13  ;;  %v5261_v19 = vld [vmem:[%s5219_s9 + $0x34] sm:$0xf]  ;;  %v5286_v32 = vld [vmem:[%s5219_s9 + $0x38] sm:$0xf] }
  0x20   : > { %v464_v20 = vrot.slane %v462_v8, 4  ;;  %v467_v21 = vrot.slane %v465_v9, 5  ;;  %v5267_v22 = vpack.c.b16 %v8961_v11, %v8962_v10  ;;  %v8967_v23 = vunpack.c.l.b16 %v5256_v16  ;;  %v5289_v33 = vld [vmem:[%s5219_s9 + $0x3c] sm:$0xf]  ;;  %v5294_v38 = vld [vmem:[%s5219_s9 + $0x40] sm:$0xf] }
  0x21   : > { %v488_v24 = vshrl.u32 %v5253_v14, 16  ;;  %v491_v25 = vshll.u32 %v5253_v14, 16  ;;  %v5274_v26 = vpack.c.b16 %v8969_v17, %v4893_v15  ;;  %v8958_v27 = vunpack.c.l.b16 %v5261_v19  ;;  %v5300_v43 = vld [vmem:[%s5219_s9 + $0x44] sm:$0xf]  ;;  %v5306_v48 = vld [vmem:[%s5219_s9 + $0x48] sm:$0xf] }
  0x22   : > { %v468_v28 = vor.u32 %v467_v21, %v464_v20  ;;  %v497_v29 = vshrl.u32 %v5267_v22, 16  ;;  %v500_v30 = vshll.u32 %v5267_v22, 16  ;;  %v5283_v31 = vpack.c.b16 %v8967_v23, %v8968_v18  ;;  %v5309_v49 = vld [vmem:[%s5219_s9 + $0x4c] sm:$0xf]  ;;  %v5320_v57 = vld [vmem:[%s5219_s9 + $0x50] sm:$0xf] }
  0x23   : > { %v490_v34 = vrot.slane %v488_v24, 4  ;;  %v493_v35 = vrot.slane %v491_v25, 5  ;;  %v470_v36 = vshrl.u32 %v5274_v26, 16  ;;  %v473_v37 = vshll.u32 %v5274_v26, 16  ;;  %9075 = vst [vmem:[#allocation8_spill] sm:$0xff] %v5320_v57 }
  0x24   : > { %676 = vrot.lane.b32.xlu0 %v468_v28, %s5122_s10  ;;  %v499_v39 = vrot.slane %v497_v29, 4  ;;  %v502_v40 = vrot.slane %v500_v30, 5  ;;  %v479_v41 = vshrl.u32 %v5283_v31, 16  ;;  %v482_v42 = vshll.u32 %v5283_v31, 16  ;;  %v5341_v15 = vld [vmem:[%s5219_s9 + $0x54] sm:$0xf] }
  0x25   : > { %v5302_v44 = vor.u32 %v493_v35, %v490_v34  ;;  %v472_v45 = vrot.slane %v470_v36, 4  ;;  %v475_v46 = vrot.slane %v473_v37, 5  ;;  %v8957_v47 = vunpack.c.l.b16 %v5286_v32  ;;  %9077 = vst [vmem:[#allocation10_spill] sm:$0xff] %v5341_v15  ;;  %v5467_v23 = vld [vmem:[%s5219_s9 + $0x88] sm:$0xf] }
  0x26   : > { %v503_v50 = vor.u32 %v502_v40, %v499_v39  ;;  %v481_v51 = vrot.slane %v479_v41, 4  ;;  %v484_v52 = vrot.slane %v482_v42, 5  ;;  %v8956_v53 = vunpack.c.l.b16 %v5289_v33  ;;  %v5370_v41 = vld [vmem:[%s5219_s9 + $0x5c] sm:$0xf]  ;;  %9095 = vst [vmem:[#allocation28_spill] sm:$0xff] %v5467_v23 }
  0x27   : > { %v476_v54 = vor.u32 %v475_v46, %v472_v45  ;;  %v5316_v55 = vpack.c.b16 %v8957_v47, %v8958_v27  ;;  %v8953_v56 = vunpack.c.l.b16 %v5294_v38  ;;  %v8952_v58 = vunpack.c.l.b16 %v5300_v43  ;;  %9079 = vst [vmem:[#allocation12_spill] sm:$0xff] %v5370_v41  ;;  %v5451_v47 = vld [vmem:[%s5219_s9 + $0x80] sm:$0xf] }
  0x28   : > { %v5325_v59 = vsel %vm460_vm0, %v5302_v44, %v503_v50  ;;  %v485_v60 = vor.u32 %v484_v52, %v481_v51  ;;  %v8951_v61 = vunpack.c.l.b16 %v5306_v48  ;;  %v8948_v62 = vunpack.c.l.b16 %v5309_v49  ;;  %v5374_v52 = vld [vmem:[%s5219_s9 + $0x60] sm:$0xf]  ;;  %9092 = vst [vmem:[#allocation25_spill] sm:$0xff] %v5451_v47 }
  0x29   : > { %9076 = vst [vmem:[#allocation9_spill] sm:$0xff] %v5325_v59  ;;  %684 = vrot.lane.b32.xlu2 %v5325_v59, %s5122_s10  ;;  %v477_v63 = vsel %vm460_vm0, %v468_v28, %v476_v54  ;;  %v506_v7 = vshrl.u32 %v5316_v55, 16  ;;  %v509_v8 = vshll.u32 %v5316_v55, 16  ;;  %v5338_v9 = vpack.c.b16 %v8953_v56, %v8956_v53  ;;  %v5354_v28 = vld [vmem:[%s5219_s9 + $0x58] sm:$0xf] }
  0x2a   : > { %v486_v20 = vsel %vm460_vm0, %v476_v54, %v485_v60  ;;  %v495_v21 = vsel %vm460_vm0, %v485_v60, %v5302_v44  ;;  %v8947_v24 = vunpack.c.l.b16 %v5320_v57  ;;  %v5351_v25 = vpack.c.b16 %v8951_v61, %v8952_v58  ;;  %9078 = vst [vmem:[#allocation11_spill] sm:$0xff] %v5354_v28  ;;  %v5423_v58 = vld [vmem:[%s5219_s9 + $0x78] sm:$0xf] }
  0x2b   : > { %680 = vrot.lane.b32.xlu1 %v486_v20, %s5122_s10  ;;  %v508_v29 = vrot.slane %v506_v7, 4  ;;  %v511_v30 = vrot.slane %v509_v8, 5  ;;  %v515_v34 = vshrl.u32 %v5338_v9, 16  ;;  %v518_v35 = vshll.u32 %v5338_v9, 16  ;;  %9080 = vst [vmem:[#allocation13_spill] sm:$0xff] %v5374_v52 }
  0x2c   : > { %678 = vrot.lane.b32.xlu0 %v477_v63, %s5122_s10  ;;  %v5364_v36 = vpack.c.b16 %v8947_v24, %v8948_v62  ;;  %v524_v37 = vshrl.u32 %v5351_v25, 16  ;;  %v527_v39 = vshll.u32 %v5351_v25, 16  ;;  %v8950_v40 = vunpack.c.l.b16 %v5341_v15  ;;  %v5379_v8 = vld [vmem:[%s5219_s9 + $0x64] sm:$0xf]  ;;  %9089 = vst [vmem:[#allocation22_spill] sm:$0xff] %v5423_v58 }
  0x2d   : > { %v512_v42 = vor.u32 %v511_v30, %v508_v29  ;;  %v517_v45 = vrot.slane %v515_v34, 4  ;;  %v520_v46 = vrot.slane %v518_v35, 5  ;;  %v8949_v51 = vunpack.c.l.b16 %v5354_v28  ;;  %9081 = vst [vmem:[#allocation14_spill] sm:$0xff] %v5379_v8  ;;  %v5391_v34 = vld [vmem:[%s5219_s9 + $0x68] sm:$0xf] }
  0x2e   : > { %v526_v54 = vrot.slane %v524_v37, 4  ;;  %v529_v60 = vrot.slane %v527_v39, 5  ;;  %v533_v63 = vshrl.u32 %v5364_v36, 16  ;;  %v536_v7 = vshll.u32 %v5364_v36, 16  ;;  %9083 = vst [vmem:[#allocation16_spill] sm:$0xff] %v5391_v34 }
  0x2f   : > { %v5382_v20 = vsel %vm460_vm0, %v503_v50, %v512_v42  ;;  %v521_v29 = vor.u32 %v520_v46, %v517_v45  ;;  %v5388_v30 = vpack.c.b16 %v8949_v51, %v8950_v40  ;;  %v8955_v35 = vunpack.c.l.b16 %v5370_v41  ;;  %v5396_v50 = vld [vmem:[%s5219_s9 + $0x6c] sm:$0xf]  ;;  %v5399_v45 = vld [vmem:[%s5219_s9 + $0x70] sm:$0xf] }
  0x30   : > { %9082 = vst [vmem:[#allocation15_spill] sm:$0xff] %v5382_v20  ;;  %v530_v37 = vor.u32 %v529_v60, %v526_v54  ;;  %v535_v39 = vrot.slane %v533_v63, 4  ;;  %v538_v24 = vrot.slane %v536_v7, 5  ;;  %v8954_v62 = vunpack.c.l.b16 %v5374_v52 }
  0x31   : > { %9084 = vst [vmem:[#allocation17_spill] sm:$0xff] %v5396_v50  ;;  %686 = vrot.lane.b32.xlu2 %v5382_v20, %s5122_s10  ;;  %v5404_v46 = vsel %vm460_vm0, %v512_v42, %v521_v29  ;;  %v542_v51 = vshrl.u32 %v5388_v30, 16  ;;  %v545_v40 = vshll.u32 %v5388_v30, 16  ;;  %v8960_v54 = vunpack.c.l.b16 %v5379_v8  ;;  %v5420_v42 = vld [vmem:[%s5219_s9 + $0x74] sm:$0xf] }
  0x32   : > { %9085 = vst [vmem:[#allocation18_spill] sm:$0xff] %v5399_v45  ;;  %v539_v60 = vor.u32 %v538_v24, %v535_v39  ;;  %v5410_v63 = vsel %vm460_vm0, %v521_v29, %v530_v37  ;;  %v8959_v7 = vunpack.c.l.b16 %v5391_v34  ;;  %v5417_v61 = vpack.c.b16 %v8954_v62, %v8955_v35 }
  0x33   : > { %9086 = vst [vmem:[#allocation19_spill] sm:$0xff] %v5404_v46  ;;  %682 = vrot.lane.b32.xlu1 %v495_v21, %s5122_s10  ;;  %v544_v24 = vrot.slane %v542_v51, 4  ;;  %v547_v39 = vrot.slane %v545_v40, 5  ;;  %v8964_v29 = vunpack.c.l.b16 %v5396_v50  ;;  %v8965_v56 = vunpack.c.l.b16 %v5399_v45  ;;  %v5442_v51 = vld [vmem:[%s5219_s9 + $0x7c] sm:$0xf] }
  0x34   : > { %9087 = vst [vmem:[#allocation20_spill] sm:$0xff] %v5410_v63  ;;  %688 = vrot.lane.b32.xlu0 %v5404_v46, %s5122_s10  ;;  %v5431_v62 = vsel %vm460_vm0, %v530_v37, %v539_v60  ;;  %v5437_v35 = vpack.c.b16 %v8959_v7, %v8960_v54  ;;  %v551_v21 = vshrl.u32 %v5417_v61, 16  ;;  %v554_v40 = vshll.u32 %v5417_v61, 16  ;;  %v5471_v7 = vld [vmem:[%s5219_s9 + $0x8c] sm:$0xf] }
  0x35   : > { %9088 = vst [vmem:[#allocation21_spill] sm:$0xff] %v5420_v42  ;;  %v548_v53 = vor.u32 %v547_v39, %v544_v24  ;;  %v5448_v37 = vpack.c.b16 %v8965_v56, %v8964_v29  ;;  %v5458_v24 = vld [vmem:[%s5219_s9 + $0x84] sm:$0xf]  ;;  %v8974_v5 = vunpack.c.l.b16 %v5442_v51  ;;  %v8973_v17 = vunpack.c.l.b16 %v5451_v47  ;;  %v5521_v46 = vld [vmem:[%s5219_s9 + $0x9c] sm:$0xf] }
  0x36   : > { %9090 = vst [vmem:[#allocation23_spill] sm:$0xff] %v5431_v62  ;;  %v553_v54 = vrot.slane %v551_v21, 4  ;;  %v556_v11 = vrot.slane %v554_v40, 5  ;;  %v560_v10 = vshrl.u32 %v5437_v35, 16  ;;  %v563_v6 = vshll.u32 %v5437_v35, 16 }
  0x37   : > { %9091 = vst [vmem:[#allocation24_spill] sm:$0xff] %v5442_v51  ;;  %v5461_v39 = vsel %vm460_vm0, %v539_v60, %v548_v53  ;;  %v569_v29 = vshrl.u32 %v5448_v37, 16  ;;  %v572_v56 = vshll.u32 %v5448_v37, 16  ;;  %v9097_v50 = vunpack.c.l.b16 %v5420_v42 }
  0x38   : > { %9093 = vst [vmem:[#allocation26_spill] sm:$0xff] %v5458_v24  ;;  %v557_v21 = vor.u32 %v556_v11, %v553_v54  ;;  %v562_v40 = vrot.slane %v560_v10, 4  ;;  %v565_v18 = vrot.slane %v563_v6, 5  ;;  %v9098_v34 = vunpack.c.l.b16 %v5423_v58 }
  0x39   : > { %9094 = vst [vmem:[#allocation27_spill] sm:$0xff] %v5461_v39  ;;  %692 = vrot.lane.b32.xlu2 %v5431_v62, %s5122_s10  ;;  %v571_v60 = vrot.slane %v569_v29, 4  ;;  %v574_v27 = vrot.slane %v572_v56, 5  ;;  %v8982_v11 = vunpack.c.l.b16 %v5458_v24  ;;  %v5486_v10 = vpack.c.b16 %v8973_v17, %v8974_v5  ;;  %v5490_v56 = vld [vmem:[%s5219_s9 + $0x90] sm:$0xf] }
  0x3a   : > { %9096 = vst [vmem:[#allocation29_spill] sm:$0xff] %v5471_v7  ;;  %v5479_v8 = vpack.c.b16 %v9098_v34, %v9097_v50  ;;  %v566_v6 = vor.u32 %v565_v18, %v562_v40  ;;  %v8981_v54 = vunpack.c.l.b16 %v5467_v23  ;;  %v5495_v34 = vsel %vm460_vm0, %v548_v53, %v557_v21  ;;  %v5511_v62 = vld [vmem:[%s5219_s9 + $0x94] sm:$0xf] }
  0x3b   : > { %9099 = vst [vmem:[#allocation30_spill] sm:$0xff] %v5490_v56  ;;  %690 = vrot.lane.b32.xlu1 %v5410_v63, %s5122_s10  ;;  %v575_v40 = vor.u32 %v574_v27, %v571_v60  ;;  %v587_v17 = vshrl.u32 %v5486_v10, 16  ;;  %v590_v5 = vshll.u32 %v5486_v10, 16  ;;  %v5514_v63 = vld [vmem:[%s5219_s9 + $0x98] sm:$0xf]  ;;  %v8988_v52 = vunpack.c.l.b16 %v5490_v56 }
  0x3c   : > { %9100 = vst [vmem:[#allocation31_spill] sm:$0xff] %v5495_v34  ;;  %v578_v50 = vshrl.u32 %v5479_v8, 16  ;;  %v581_v18 = vshll.u32 %v5479_v8, 16  ;;  %694 = vrot.lane.b32.xlu0 %v5461_v39, %s5122_s10  ;;  %v5508_v53 = vpack.c.b16 %v8981_v54, %v8982_v11  ;;  %v5517_v29 = vsel %vm460_vm0, %v557_v21, %v566_v6  ;;  %v5572_v56 = vld [vmem:[%s5219_s9 + $0xb4] sm:$0xf] }
  0x3d   : > { %9101 = vst [vmem:[#allocation32_spill] sm:$0xff] %v5511_v62  ;;  %v589_v42 = vrot.slane %v587_v17, 4  ;;  %v592_v45 = vrot.slane %v590_v5, 5  ;;  %v8990_v24 = vunpack.c.l.b16 %v5511_v62  ;;  %v8989_v21 = vunpack.c.l.b16 %v5514_v63  ;;  %v5534_v17 = vld [vmem:[%s5219_s9 + $0xa0] sm:$0xf] }
  0x3e   : > { %9102 = vst [vmem:[#allocation33_spill] sm:$0xff] %v5514_v63  ;;  %v580_v27 = vrot.slane %v578_v50, 4  ;;  %v583_v60 = vrot.slane %v581_v18, 5  ;;  %v596_v54 = vshrl.u32 %v5508_v53, 16  ;;  %v599_v11 = vshll.u32 %v5508_v53, 16 }
  0x3f   : > { %9103 = vst [vmem:[#allocation34_spill] sm:$0xff] %v5517_v29  ;;  %v9105_v50 = vunpack.c.l.b16 %v5471_v7  ;;  %v5537_v5 = vld [vmem:[%s5219_s9 + $0xa4] sm:$0xf]  ;;  %v593_v47 = vor.u32 %v592_v45, %v589_v42  ;;  %v5554_v42 = vld [vmem:[%s5219_s9 + $0xa8] sm:$0xf]  ;;  %v9114_v7 = vunpack.c.l.b16 %v5521_v46 }
  0x40   : > { %9104 = vst [vmem:[#allocation35_spill] sm:$0xff] %v5521_v46  ;;  %v584_v23 = vor.u32 %v583_v60, %v580_v27  ;;  %v598_v51 = vrot.slane %v596_v54, 4  ;;  %v601_v58 = vrot.slane %v599_v11, 5  ;;  %v5543_v60 = vsel %vm460_vm0, %v566_v6, %v575_v40  ;;  %v5557_v11 = vld [vmem:[%s5219_s9 + $0xac] sm:$0xf] }
  0x41   : > { %v5531_v18 = vpack.c.b16 %v8988_v52, %v9105_v50  ;;  %9106 = vst [vmem:[#allocation36_spill] sm:$0xff] %v5534_v17  ;;  %698 = vrot.lane.b32.xlu2 %v5517_v29, %s5122_s10  ;;  %v5549_v50 = vpack.c.b16 %v8989_v21, %v8990_v24  ;;  %v5561_v27 = vld [vmem:[%s5219_s9 + $0xb0] sm:$0xf]  ;;  %v9115_v6 = vunpack.c.l.b16 %v5534_v17 }
  0x42   : > { %9107 = vst [vmem:[#allocation37_spill] sm:$0xff] %v5537_v5  ;;  %v5567_v21 = vsel %vm460_vm0, %v584_v23, %v593_v47  ;;  %v602_v24 = vor.u32 %v601_v58, %v598_v51  ;;  %v9007_v58 = vunpack.c.l.b16 %v5557_v11  ;;  %v5585_v51 = vld [vmem:[%s5219_s9 + $0xb8] sm:$0xf]  ;;  %v9006_v20 = vunpack.c.l.b16 %v5561_v27 }
  0x43   : > { %9108 = vst [vmem:[#allocation38_spill] sm:$0xff] %v5543_v60  ;;  %v605_v52 = vshrl.u32 %v5531_v18, 16  ;;  %v608_v45 = vshll.u32 %v5531_v18, 16  ;;  %696 = vrot.lane.b32.xlu1 %v5495_v34, %s5122_s10  ;;  %v614_v63 = vshrl.u32 %v5549_v50, 16  ;;  %v617_v62 = vshll.u32 %v5549_v50, 16 }
  0x44   : > { %9109 = vst [vmem:[#allocation39_spill] sm:$0xff] %v5554_v42  ;;  %700 = vrot.lane.b32.xlu0 %v5543_v60, %s5122_s10  ;;  %v5580_v29 = vpack.c.b16 %v9115_v6, %v9114_v7  ;;  %v9005_v34 = vunpack.c.l.b16 %v5554_v42  ;;  %v9117_v60 = vunpack.c.l.b16 %v5537_v5  ;;  %v5608_v5 = vld [vmem:[%s5219_s9 + $0xbc] sm:$0xf] }
  0x45   : > { %9110 = vst [vmem:[#allocation40_spill] sm:$0xff] %v5557_v11  ;;  %v607_v54 = vrot.slane %v605_v52, 4  ;;  %v610_v39 = vrot.slane %v608_v45, 5  ;;  %v616_v41 = vrot.slane %v614_v63, 4  ;;  %v619_v28 = vrot.slane %v617_v62, 5 }
  0x46   : > { %9111 = vst [vmem:[#allocation41_spill] sm:$0xff] %v5561_v27  ;;  %v623_v52 = vshrl.u32 %v5580_v29, 16  ;;  %v626_v46 = vshll.u32 %v5580_v29, 16  ;;  %v5594_v7 = vpack.c.b16 %v9005_v34, %v9117_v60  ;;  %v5598_v45 = vsel %vm460_vm0, %v575_v40, %v584_v23  ;;  %v5629_v27 = vld [vmem:[%s5219_s9 + $0xc4] sm:$0xf] }
  0x47   : > { %9112 = vst [vmem:[#allocation42_spill] sm:$0xff] %v5567_v21  ;;  %v5604_v62 = vpack.c.b16 %v9006_v20, %v9007_v58  ;;  %v9015_v63 = vunpack.c.l.b16 %v5585_v51  ;;  %v5615_v23 = vsel %vm460_vm0, %v593_v47, %v602_v24  ;;  %v9120_v58 = vunpack.c.l.b16 %v5572_v56 }
  0x48   : > { %9113 = vst [vmem:[#allocation43_spill] sm:$0xff] %v5572_v56  ;;  %v625_v42 = vrot.slane %v623_v52, 4  ;;  %v628_v60 = vrot.slane %v626_v46, 5  ;;  %v632_v34 = vshrl.u32 %v5594_v7, 16  ;;  %v635_v6 = vshll.u32 %v5594_v7, 16 }
  0x49   : > { %9116 = vst [vmem:[#allocation44_spill] sm:$0xff] %v5585_v51  ;;  %704 = vrot.lane.b32.xlu2 %v5567_v21, %s5122_s10  ;;  %v641_v40 = vshrl.u32 %v5604_v62, 16  ;;  %v644_v20 = vshll.u32 %v5604_v62, 16  ;;  %v5623_v52 = vpack.c.b16 %v9015_v63, %v9120_v58  ;;  %v5626_v46 = vld [vmem:[%s5219_s9 + $0xc0] sm:$0xf]  ;;  %v611_v11 = vor.u32 %v610_v39, %v607_v54 }
  0x4a   : > { %9118 = vst [vmem:[#allocation45_spill] sm:$0xff] %v5598_v45  ;;  %v620_v17 = vor.u32 %v619_v28, %v616_v41  ;;  %v305_v21 = vld [vmem:[%s5219_s9 + $0xc8] sm:$0xf]  ;;  %v9020_v47 = vunpack.c.l.b16 %v5608_v5  ;;  %v629_v15 = vor.u32 %v628_v60, %v625_v42  ;;  %v634_v57 = vrot.slane %v632_v34, 4 }
  0x4b   : > { %9119 = vst [vmem:[#allocation46_spill] sm:$0xff] %v5608_v5  ;;  %702 = vrot.lane.b32.xlu1 %v5598_v45, %s5122_s10  ;;  %v637_v51 = vrot.slane %v635_v6, 5  ;;  %v643_v58 = vrot.slane %v641_v40, 4  ;;  %v9019_v63 = vunpack.c.l.b16 %v5626_v46  ;;  %v9021_v56 = vunpack.c.l.b16 %v5629_v27 }
  0x4c   : > { %9121 = vst [vmem:[#allocation47_spill] sm:$0xff] %v5626_v46  ;;  %706 = vrot.lane.b32.xlu0 %v5615_v23, %s5122_s10  ;;  %v646_v59 = vrot.slane %v644_v20, 5  ;;  %v650_v28 = vshrl.u32 %v5623_v52, 16  ;;  %v653_v41 = vshll.u32 %v5623_v52, 16  ;;  %v5641_v39 = vunpack.c.l.b16 %v305_v21 }
  0x4d   : > { %9122 = vst [vmem:[#allocation48_spill] sm:$0xff] %v5629_v27  ;;  %v5644_v54 = vsel %vm460_vm0, %v611_v11, %v620_v17  ;;  %v5650_v34 = vpack.c.b16 %v9019_v63, %v9020_v47  ;;  %v5658_v20 = vsel %vm460_vm0, %v602_v24, %v611_v11  ;;  %v5661_v21 = vsel %vm460_vm0, %v620_v17, %v629_v15 }
  0x4e   : > { %9123 = vst [vmem:[#allocation49_spill] sm:$0xff] %v5641_v39  ;;  %v5655_v42 = vpack.c.b16 %v5641_v39, %v9021_v56  ;;  %v638_v6 = vor.u32 %v637_v51, %v634_v57  ;;  %v647_v60 = vor.u32 %v646_v59, %v643_v58  ;;  %v652_v40 = vrot.slane %v650_v28, 4 }
  0x4f   : > { %9124 = vst [vmem:[#allocation50_spill] sm:$0xff] %v5644_v54  ;;  %v655_v45 = vrot.slane %v653_v41, 5  ;;  %v659_v63 = vshrl.u32 %v5650_v34, 16  ;;  %v662_v47 = vshll.u32 %v5650_v34, 16 }
  0x50   : > { %9125 = vst [vmem:[#allocation51_spill] sm:$0xff] %v5661_v21  ;;  %v668_v56 = vshrl.u32 %v5655_v42, 16  ;;  %v671_v39 = vshll.u32 %v5655_v42, 16  ;;  %v5674_v24 = vsel %vm460_vm0, %v638_v6, %v647_v60  ;;  %v5677_v58 = vsel %vm460_vm0, %v629_v15, %v638_v6 }
  0x51   : > { %710 = vrot.lane.b32.xlu2 %v5644_v54, %s5122_s10  ;;  %9126 = vst [vmem:[#allocation52_spill] sm:$0xff] %v5674_v24  ;;  %v656_v57 = vor.u32 %v655_v45, %v652_v40  ;;  %v661_v59 = vrot.slane %v659_v63, 4  ;;  %v664_v17 = vrot.slane %v662_v47, 5  ;;  %v730_v45 = vrot.slane %v5222_v0, 5 }
  0x52   : > { %v670_v11 = vrot.slane %v668_v56, 4  ;;  %v673_v51 = vrot.slane %v671_v39, 5  ;;  %9127 = vst [vmem:[#allocation53_spill] sm:$0xff] %v5677_v58  ;;  %v731_v63 = vrot.slane %v5274_v26, 5  ;;  %v733_v47 = vrot.slane %v5283_v31, 5 }
  0x53   : > { %708 = vrot.lane.b32.xlu1 %v5658_v20, %s5122_s10  ;;  %v5682_v28 = vsel %vm460_vm0, %v647_v60, %v656_v57  ;;  %v665_v41 = vor.u32 %v664_v17, %v661_v59  ;;  %v5710_v0 = vrot.slane %v5253_v14, 5  ;;  %v737_v60 = vrot.slane %v5267_v22, 5 }
  0x54   : > { %712 = vrot.lane.b32.xlu0 %v5661_v21, %s5122_s10  ;;  %9128 = vst [vmem:[#allocation54_spill] sm:$0xff] %v5682_v28  ;;  %v5684_v27 = vor.u32 %v673_v51, %v670_v11  ;;  %v732_v39 = vsel %vm729_vm1, %v730_v45, %v731_v63  ;;  %v734_v6 = vsel %vm729_vm1, %v731_v63, %v733_v47  ;;  %v739_v40 = vrot.slane %v5316_v55, 5 }
  0x55   : > { %v5695_v15 = vsel %vm460_vm0, %v656_v57, %v665_v41  ;;  %v5718_v57 = vsel %vm729_vm1, %v5710_v0, %v737_v60  ;;  %v736_v59 = vsel %vm729_vm1, %v733_v47, %v5710_v0  ;;  %v741_v11 = vrot.slane %v5338_v9, 5 }
  0x56   : > { %9129 = vst [vmem:[#allocation55_spill] sm:$0xff] %v5684_v27  ;;  %v5692_v56 = vsel %vm460_vm0, %v665_v41, %v5684_v27  ;;  %v5725_v17 = vsel %vm729_vm1, %v737_v60, %v739_v40  ;;  %v743_v51 = vrot.slane %v5351_v25, 5  ;;  %v745_v41 = vrot.slane %v5364_v36, 5 }
  0x57   : > { %9130 = vst [vmem:[#allocation56_spill] sm:$0xff] %v5692_v56  ;;  %v5737_v63 = vsel %vm729_vm1, %v739_v40, %v741_v11  ;;  %v751_v60 = vrot.slane %v5437_v35, 5  ;;  %v761_v21 = vrot.slane %v5531_v18, 5 }
  0x58   : > { %9131 = vst [vmem:[#allocation57_spill] sm:$0xff] %v5695_v15  ;;  %v5742_v47 = vsel %vm729_vm1, %v743_v51, %v745_v41 }
  0x59   : > { %716 = vrot.lane.b32.xlu2 %v5674_v24, %s5122_s10  ;;  %9133 = vst [vmem:[#allocation59_spill] sm:$0xff] %v5742_v47  ;;  %v755_v24 = vrot.slane %v5479_v8, 5 }
  0x5b   : > { %714 = vrot.lane.b32.xlu1 %v5677_v58, %s5122_s10 }
  0x5c   : > { %718 = vrot.lane.b32.xlu0 %v5682_v28, %s5122_s10 }
  0x61   : > { %722 = vrot.lane.b32.xlu2 %v5692_v56, %s5122_s10  ;;  %v759_v56 = vrot.slane %v5508_v53, 5 }
  0x63   : > { %720 = vrot.lane.b32.xlu1 %v5695_v15, %s5122_s10  ;;  %v765_v15 = vrot.slane %v5580_v29, 5 }
  0x64   : > { %724 = vrot.lane.b32.xlu0 %v5684_v27, %s5122_s10 }
  0x69   : > { %781 = vrot.lane.b32.xlu2 %v732_v39, %s5123_s11  ;;  %v747_v39 = vrot.slane %v5388_v30, 5 }
  0x6b   : > { %779 = vrot.lane.b32.xlu1 %v730_v45, %s5123_s11  ;;  %v5734_v45 = vsel %vm729_vm1, %v741_v11, %v743_v51  ;;  %v753_v51 = vrot.slane %v5448_v37, 5 }
  0x6c   : > { %783 = vrot.lane.b32.xlu0 %v734_v6, %s5123_s11  ;;  %9132 = vst [vmem:[#allocation58_spill] sm:$0xff] %v5734_v45  ;;  %v749_v6 = vrot.slane %v5417_v61, 5 }
  0x6e   : > { %v5752_v40 = vsel %vm729_vm1, %v747_v39, %v749_v6  ;;  %v5760_v11 = vsel %vm729_vm1, %v749_v6, %v751_v60  ;;  %v5775_v6 = vsel %vm729_vm1, %v751_v60, %v753_v51  ;;  %v763_v60 = vrot.slane %v5549_v50, 5 }
  0x6f   : > { %9135 = vst [vmem:[#allocation61_spill] sm:$0xff] %v5775_v6 }
  0x71   : > { %787 = vrot.lane.b32.xlu2 %v5718_v57, %s5123_s11 }
  0x73   : > { %785 = vrot.lane.b32.xlu1 %v736_v59, %s5123_s11  ;;  %v5755_v59 = vsel %vm729_vm1, %v745_v41, %v747_v39  ;;  %v757_v41 = vrot.slane %v5486_v10, 5  ;;  %v5772_v39 = vsel %vm729_vm1, %v753_v51, %v755_v24  ;;  %v5792_v51 = vsel %vm729_vm1, %v759_v56, %v761_v21 }
  0x74   : > { %789 = vrot.lane.b32.xlu0 %v5725_v17, %s5123_s11  ;;  %9134 = vst [vmem:[#allocation60_spill] sm:$0xff] %v5772_v39 }
  0x75   : > { %v5780_v27 = vsel %vm729_vm1, %v755_v24, %v757_v41  ;;  %v5795_v24 = vsel %vm729_vm1, %v757_v41, %v759_v56  ;;  %v769_v56 = vrot.slane %v5604_v62, 5 }
  0x76   : > { %9136 = vst [vmem:[#allocation62_spill] sm:$0xff] %v5780_v27 }
  0x79   : > { %793 = vrot.lane.b32.xlu2 %v5734_v45, %s5123_s11 }
  0x7b   : > { %791 = vrot.lane.b32.xlu1 %v5737_v63, %s5123_s11 }
  0x7c   : > { %795 = vrot.lane.b32.xlu0 %v5742_v47, %s5123_s11  ;;  %v767_v47 = vrot.slane %v5594_v7, 5 }
  0x7e   : > { %v5814_v28 = vsel %vm729_vm1, %v765_v15, %v767_v47  ;;  %v5822_v5 = vsel %vm729_vm1, %v767_v47, %v769_v56  ;;  %v5838_v47 = vrot.slane %v5655_v42, 5 }
  0x7f   : > { %9140 = vst [vmem:[#allocation66_spill] sm:$0xff] %v5814_v28 }
  0x80   : > { %9142 = vst [vmem:[#allocation68_spill] sm:$0xff] %v5822_v5 }
  0x81   : > { %799 = vrot.lane.b32.xlu2 %v5752_v40, %s5123_s11  ;;  %9145 = vst [vmem:[#allocation71_spill] sm:$0xff] %v5838_v47 }
  0x83   : > { %797 = vrot.lane.b32.xlu1 %v5755_v59, %s5123_s11  ;;  %v5766_v58 = vpop.permute.xlu2 %684 }
  0x84   : > { %801 = vrot.lane.b32.xlu0 %v5760_v11, %s5123_s11 }
  0x89   : > { %805 = vrot.lane.b32.xlu2 %v5772_v39, %s5123_s11  ;;  %v5800_v39 = vsel %vm729_vm1, %v761_v21, %v763_v60  ;;  %v5817_v21 = vsel %vm729_vm1, %v763_v60, %v765_v15 }
  0x8a   : > { %9137 = vst [vmem:[#allocation63_spill] sm:$0xff] %v5800_v39 }
  0x8b   : > { %803 = vrot.lane.b32.xlu1 %v5775_v6, %s5123_s11  ;;  %v5786_v46 = vpop.permute.xlu2 %686  ;;  %9141 = vst [vmem:[#allocation67_spill] sm:$0xff] %v5817_v21  ;;  %v771_v6 = vrot.slane %v5623_v52, 5 }
  0x8c   : > { %807 = vrot.lane.b32.xlu0 %v5780_v27, %s5123_s11 }
  0x8d   : > { %v5846_v45 = vsel %vm729_vm1, %v769_v56, %v771_v6 }
  0x91   : > { %811 = vrot.lane.b32.xlu2 %v5792_v51, %s5123_s11 }
  0x93   : > { %809 = vrot.lane.b32.xlu1 %v5795_v24, %s5123_s11  ;;  %v5806_v27 = vpop.permute.xlu2 %692 }
  0x94   : > { %9138 = vst [vmem:[#allocation64_spill] sm:$0xff] %v5806_v27  ;;  %813 = vrot.lane.b32.xlu0 %v5800_v39, %s5123_s11  ;;  %v306_v27 = vld [vmem:[%s5219_s9 + $0xcc] sm:$0xf]  ;;  %v773_v39 = vrot.slane %v5650_v34, 5 }
  0x95   : > { %v5833_v15 = vunpack.c.l.b16 %v306_v27 }
  0x96   : > { %v5811_v41 = vpop.permute.xlu0 %676  ;;  %v5854_v27 = vsel %vm729_vm1, %v773_v39, %v5838_v47 }
  0x97   : > { %9139 = vst [vmem:[#allocation65_spill] sm:$0xff] %v5811_v41  ;;  %v5843_v41 = vsel %vm729_vm1, %v771_v6, %v773_v39 }
  0x98   : > { %9144 = vst [vmem:[#allocation70_spill] sm:$0xff] %v5833_v15 }
  0x99   : > { %817 = vrot.lane.b32.xlu2 %v5814_v28, %s5123_s11  ;;  %9146 = vst [vmem:[#allocation72_spill] sm:$0xff] %v5843_v41 }
  0x9a   : > { %9147 = vst [vmem:[#allocation73_spill] sm:$0xff] %v5854_v27 }
  0x9b   : > { %815 = vrot.lane.b32.xlu1 %v5817_v21, %s5123_s11  ;;  %v5829_v54 = vpop.permute.xlu2 %698  ;;  %v728_v21 = vpack.c.b16 %v5833_v15, %v5833_v15 }
  0x9c   : > { %9143 = vst [vmem:[#allocation69_spill] sm:$0xff] %v5829_v54  ;;  %819 = vrot.lane.b32.xlu0 %v5822_v5, %s5123_s11 }
  0x9d   : > { %v5835_v60 = vpop.permute.xlu1 %680  ;;  %v777_v6 = vrot.slane %v728_v21, 5 }
  0x9e   : > { %v5840_v28 = vpop.permute.xlu0 %678 }
  0xa1   : > { %823 = vrot.lane.b32.xlu2 %v5843_v41, %s5123_s11  ;;  %v778_v41 = vsel %vm729_vm1, %v5838_v47, %v777_v6  ;;  %v9163_v47 = vunpack.c.l.b16 %v5247_v13 }
  0xa3   : > { %821 = vrot.lane.b32.xlu1 %v5846_v45, %s5123_s11  ;;  %v5858_v5 = vpop.permute.xlu2 %704 }
  0xa4   : > { %825 = vrot.lane.b32.xlu0 %v5854_v27, %s5123_s11 }
  0xa5   : > { %v5862_v56 = vpop.permute.xlu1 %682 }
  0xa6   : > { %v5864_v54 = vpop.permute.xlu0 %688 }
  0xa9   : > { %835 = vrot.lane.b32.xlu2 %v5274_v26, %s5124_s12 }
  0xab   : > { %827 = vrot.lane.b32.xlu1 %v778_v41, %s5123_s11  ;;  %v5871_v39 = vpop.permute.xlu2 %710  ;;  %s4923_s11 = smul.u32 192, %s5211_s30 }
  0xac   : > { %837 = vrot.lane.b32.xlu0 %v5283_v31, %s5124_s12 }
  0xad   : > { %v5875_v27 = vpop.permute.xlu1 %690  ;;  %s7015_s26 = scalar_lea.vmem %s8946_s5, %s4923_s11 }
  0xae   : > { %v5877_v21 = vpop.permute.xlu0 %694 }
  0xaf   : > { %9148 = vst [vmem:[#allocation74_spill] sm:$0xff] %v5877_v21 }
  0xb1   : > { %841 = vrot.lane.b32.xlu2 %v5267_v22, %s5124_s12 }
  0xb3   : > { %839 = vrot.lane.b32.xlu1 %v5253_v14, %s5124_s12  ;;  %v5883_v6 = vpop.permute.xlu2 %716 }
  0xb4   : > { %9149 = vst [vmem:[#allocation75_spill] sm:$0xff] %v5883_v6  ;;  %843 = vrot.lane.b32.xlu0 %v5316_v55, %s5124_s12 }
  0xb5   : > { %v5887_v26 = vpop.permute.xlu1 %696 }
  0xb6   : > { %9150 = vst [vmem:[#allocation76_spill] sm:$0xff] %v5887_v26  ;;  %v5889_v41 = vpop.permute.xlu0 %700 }
  0xb7   : > { %9151 = vst [vmem:[#allocation77_spill] sm:$0xff] %v5889_v41 }
  0xb9   : > { %847 = vrot.lane.b32.xlu2 %v5351_v25, %s5124_s12 }
  0xbb   : > { %845 = vrot.lane.b32.xlu1 %v5338_v9, %s5124_s12  ;;  %v5895_v31 = vpop.permute.xlu2 %722 }
  0xbc   : > { %9152 = vst [vmem:[#allocation78_spill] sm:$0xff] %v5895_v31  ;;  %849 = vrot.lane.b32.xlu0 %v5364_v36, %s5124_s12 }
  0xbd   : > { %v5899_v14 = vpop.permute.xlu1 %702 }
  0xbe   : > { %9153 = vst [vmem:[#allocation79_spill] sm:$0xff] %v5899_v14  ;;  %v5901_v22 = vpop.permute.xlu0 %706 }
  0xbf   : > { %9154 = vst [vmem:[#allocation80_spill] sm:$0xff] %v5901_v22 }
  0xc1   : > { %853 = vrot.lane.b32.xlu2 %v5417_v61, %s5124_s12 }
  0xc3   : > { %851 = vrot.lane.b32.xlu1 %v5388_v30, %s5124_s12  ;;  %v5907_v55 = vpop.permute.xlu2 %781 }
  0xc4   : > { %855 = vrot.lane.b32.xlu0 %v5437_v35, %s5124_s12 }
  0xc5   : > { %v5911_v9 = vpop.permute.xlu1 %708 }
  0xc6   : > { %9155 = vst [vmem:[#allocation81_spill] sm:$0xff] %v5911_v9  ;;  %v5913_v25 = vpop.permute.xlu0 %712 }
  0xc7   : > { %9156 = vst [vmem:[#allocation82_spill] sm:$0xff] %v5913_v25 }
  0xc9   : > { %859 = vrot.lane.b32.xlu2 %v5479_v8, %s5124_s12 }
  0xcb   : > { %857 = vrot.lane.b32.xlu1 %v5448_v37, %s5124_s12  ;;  %v5919_v61 = vpop.permute.xlu2 %787 }
  0xcc   : > { %861 = vrot.lane.b32.xlu0 %v5486_v10, %s5124_s12 }
  0xcd   : > { %v5923_v36 = vpop.permute.xlu1 %714 }
  0xce   : > { %9157 = vst [vmem:[#allocation83_spill] sm:$0xff] %v5923_v36  ;;  %v5925_v30 = vpop.permute.xlu0 %718 }
  0xcf   : > { %9158 = vst [vmem:[#allocation84_spill] sm:$0xff] %v5925_v30 }
  0xd1   : > { %865 = vrot.lane.b32.xlu2 %v5531_v18, %s5124_s12 }
  0xd3   : > { %863 = vrot.lane.b32.xlu1 %v5508_v53, %s5124_s12  ;;  %v5931_v8 = vpop.permute.xlu2 %793  ;;  %v308_v53 = vld [vmem:[%s5219_s9 + $0xd4] sm:$0xf] }
  0xd4   : > { %867 = vrot.lane.b32.xlu0 %v5549_v50, %s5124_s12  ;;  %v9162_v50 = vunpack.c.l.b16 %v5244_v12  ;;  %v5970_v25 = vunpack.c.l.b16 %v308_v53  ;;  %v5973_v12 = vld [vmem:[%s5219_s9 + $0xd0] sm:$0xf] }
  0xd5   : > { %v5935_v35 = vpop.permute.xlu1 %720  ;;  %9169 = vst [vmem:[#allocation89_spill] sm:$0xff] %v5973_v12 }
  0xd6   : > { %9159 = vst [vmem:[#allocation85_spill] sm:$0xff] %v5935_v35  ;;  %v5937_v37 = vpop.permute.xlu0 %724  ;;  %v5954_v35 = vpack.c.b16 %v9163_v47, %v9162_v50 }
  0xd7   : > { %9160 = vst [vmem:[#allocation86_spill] sm:$0xff] %v5937_v37  ;;  %v9164_v37 = vunpack.c.l.b16 %v5256_v16 }
  0xd8   : > { %9168 = vst [vmem:[#allocation88_spill] sm:$0xff] %v5970_v25  ;;  %v888_v13 = vshrl.u32 %v5954_v35, 16  ;;  %v891_v16 = vshll.u32 %v5954_v35, 16 }
  0xd9   : > { %871 = vrot.lane.b32.xlu2 %v5594_v7, %s5124_s12  ;;  %v9165_v7 = vunpack.c.l.b16 %v5225_v1 }
  0xda   : > { %v893_v9 = vrot.slane %v891_v16, 5 }
  0xdb   : > { %869 = vrot.lane.b32.xlu1 %v5580_v29, %s5124_s12  ;;  %v5943_v10 = vpop.permute.xlu2 %799  ;;  %v5960_v30 = vpack.c.b16 %v9165_v7, %v9164_v37  ;;  %v9170_v37 = vunpack.c.l.b16 %v5234_v4  ;;  %v9050_v7 = vunpack.c.l.b16 %v5973_v12 }
  0xdc   : > { %9161 = vst [vmem:[#allocation87_spill] sm:$0xff] %v5943_v10  ;;  %873 = vrot.lane.b32.xlu0 %v5604_v62, %s5124_s12  ;;  %v9166_v10 = vunpack.c.l.b16 %v5228_v2  ;;  %v9167_v62 = vunpack.c.l.b16 %v5231_v3 }
  0xdd   : > { %v5948_v18 = vpop.permute.xlu1 %779  ;;  %v896_v1 = vshrl.u32 %v5960_v30, 16  ;;  %v899_v47 = vshll.u32 %v5960_v30, 16 }
  0xde   : > { %v5962_v29 = vpop.permute.xlu0 %783  ;;  %v5968_v36 = vpack.c.b16 %v9167_v62, %v9166_v10  ;;  %v9171_v10 = vunpack.c.l.b16 %v5261_v19  ;;  %v890_v62 = vrot.slane %v888_v13, 4  ;;  %v9175_v13 = vunpack.c.l.b16 %v5289_v33 }
  0xdf   : > { %v898_v4 = vrot.slane %v896_v1, 4  ;;  %v901_v22 = vrot.slane %v899_v47, 5  ;;  %v9176_v1 = vunpack.c.l.b16 %v5294_v38  ;;  %v9177_v47 = vunpack.c.l.b16 %v5300_v43 }
  0xe0   : > { %v905_v2 = vshrl.u32 %v5968_v36, 16  ;;  %v908_v3 = vshll.u32 %v5968_v36, 16  ;;  %v5987_v53 = vpack.c.b16 %v9171_v10, %v9170_v37  ;;  %v9178_v38 = vunpack.c.l.b16 %v5306_v48 }
  0xe1   : > { %877 = vrot.lane.b32.xlu2 %v5650_v34, %s5124_s12  ;;  %v834_v34 = vpack.c.b16 %v5970_v25, %v5970_v25  ;;  %v6007_v25 = vpack.c.b16 %v9050_v7, %v5833_v15  ;;  %v902_v31 = vor.u32 %v901_v22, %v898_v4  ;;  %v9179_v43 = vunpack.c.l.b16 %v5309_v49 }
  0xe2   : > { %v907_v37 = vrot.slane %v905_v2, 4  ;;  %v910_v10 = vrot.slane %v908_v3, 5  ;;  %v6019_v2 = vpack.c.b16 %v9177_v47, %v9176_v1  ;;  %v894_v3 = vor.u32 %v893_v9, %v890_v62 }
  0xe3   : > { %875 = vrot.lane.b32.xlu1 %v5623_v52, %s5124_s12  ;;  %v5991_v50 = vpop.permute.xlu2 %805  ;;  %v914_v52 = vshrl.u32 %v5987_v53, 16  ;;  %9173 = vst [vmem:[#allocation91_spill] sm:$0xff] %v6007_v25 }
  0xe4   : > { %9172 = vst [vmem:[#allocation90_spill] sm:$0xff] %v5991_v50  ;;  %879 = vrot.lane.b32.xlu0 %v5655_v42, %s5124_s12  ;;  %v917_v50 = vshll.u32 %v5987_v53, 16  ;;  %v9174_v42 = vunpack.c.l.b16 %v5286_v32  ;;  %v911_v41 = vor.u32 %v910_v10, %v907_v37  ;;  %v932_v33 = vshrl.u32 %v6019_v2, 16 }
  0xe5   : > { %v5998_v19 = vpop.permute.xlu1 %785  ;;  %v916_v12 = vrot.slane %v914_v52, 4  ;;  %v903_v1 = vsel %vm460_vm0, %v894_v3, %v902_v31 }
  0xe6   : > { %v6002_v14 = vpop.permute.xlu0 %789  ;;  %v6013_v16 = vpack.c.b16 %v9175_v13, %v9174_v42  ;;  %v919_v7 = vrot.slane %v917_v50, 5  ;;  %v935_v42 = vshll.u32 %v6019_v2, 16  ;;  %v6030_v13 = vpack.c.b16 %v9179_v43, %v9178_v38 }
  0xe7   : > { %v912_v50 = vsel %vm460_vm0, %v902_v31, %v911_v41  ;;  %v934_v10 = vrot.slane %v932_v33, 4 }
  0xe8   : > { %v923_v15 = vshrl.u32 %v6013_v16, 16  ;;  %v926_v32 = vshll.u32 %v6013_v16, 16  ;;  %v941_v62 = vshrl.u32 %v6030_v13, 16  ;;  %v944_v48 = vshll.u32 %v6030_v13, 16 }
  0xe9   : > { %883 = vrot.lane.b32.xlu2 %v834_v34, %s5124_s12  ;;  %v920_v34 = vor.u32 %v919_v7, %v916_v12  ;;  %v937_v52 = vrot.slane %v935_v42, 5  ;;  %v1155_v42 = vrot.slane %v5954_v35, 5 }
  0xea   : > { %v925_v4 = vrot.slane %v923_v15, 4  ;;  %v928_v37 = vrot.slane %v926_v32, 5  ;;  %v943_v38 = vrot.slane %v941_v62, 4  ;;  %v946_v43 = vrot.slane %v944_v48, 5 }
  0xeb   : > { %881 = vrot.lane.b32.xlu1 %v6007_v25, %s5124_s12  ;;  %v6034_v22 = vpop.permute.xlu2 %811  ;;  %v921_v47 = vsel %vm460_vm0, %v911_v41, %v920_v34  ;;  %v938_v12 = vor.u32 %v937_v52, %v934_v10 }
  0xec   : > { %9180 = vst [vmem:[#allocation92_spill] sm:$0xff] %v6034_v22  ;;  %1102 = vrot.lane.b32.xlu0 %v894_v3, %s5125_s13  ;;  %v929_v25 = vor.u32 %v928_v37, %v925_v4  ;;  %v947_v32 = vor.u32 %v946_v43, %v943_v38  ;;  %v1158_v38 = vrot.slane %v5968_v36, 5 }
  0xed   : > { %v6037_v9 = vpop.permute.xlu1 %791 }
  0xee   : > { %v6042_v49 = vpop.permute.xlu0 %795  ;;  %v939_v31 = vsel %vm460_vm0, %v929_v25, %v938_v12  ;;  %v930_v3 = vsel %vm460_vm0, %v920_v34, %v929_v25  ;;  %v948_v41 = vsel %vm460_vm0, %v938_v12, %v947_v32  ;;  %v9193_v12 = vld [vmem:[#allocation8_spill] sm:$0xff] }
  0xef   : > { %9181 = vst [vmem:[#allocation93_spill] sm:$0xff] %v6042_v49 }
  0xf1   : > { %1106 = vrot.lane.b32.xlu2 %v912_v50, %s5125_s13  ;;  %v1156_v50 = vrot.slane %v5960_v30, 5 }
  0xf3   : > { %1104 = vrot.lane.b32.xlu1 %v903_v1, %s5125_s13  ;;  %v6048_v7 = vpop.permute.xlu2 %817  ;;  %v1157_v25 = vsel %vm729_vm1, %v1155_v42, %v1156_v50  ;;  %v9190_v1 = vld [vmem:[#allocation9_spill] sm:$0xff] }
  0xf4   : > { %9182 = vst [vmem:[#allocation94_spill] sm:$0xff] %v6048_v7  ;;  %1108 = vrot.lane.b32.xlu0 %v921_v47, %s5125_s13 }
  0xf5   : > { %v6051_v15 = vpop.permute.xlu1 %797 }
  0xf6   : > { %9183 = vst [vmem:[#allocation95_spill] sm:$0xff] %v6051_v15  ;;  %v6053_v33 = vpop.permute.xlu0 %801 }
  0xf7   : > { %9184 = vst [vmem:[#allocation96_spill] sm:$0xff] %v6053_v33  ;;  %v9216_v33 = vld [vmem:[#allocation24_spill] sm:$0xff] }
  0xf8   : > { %v9217_v15 = vunpack.c.l.b16 %v9216_v33 }
  0xf9   : > { %1112 = vrot.lane.b32.xlu2 %v939_v31, %s5125_s13  ;;  %v9194_v31 = vunpack.c.l.b16 %v9193_v12 }
  0xfb   : > { %1110 = vrot.lane.b32.xlu1 %v930_v3, %s5125_s13  ;;  %v6062_v62 = vpop.permute.xlu2 %823  ;;  %v9195_v3 = vld [vmem:[#allocation10_spill] sm:$0xff] }
  0xfc   : > { %9185 = vst [vmem:[#allocation97_spill] sm:$0xff] %v6062_v62  ;;  %1114 = vrot.lane.b32.xlu0 %v948_v41, %s5125_s13  ;;  %v9196_v41 = vunpack.c.l.b16 %v9195_v3  ;;  %v9054_v3 = vrot.slane %v6019_v2, 5 }
  0xfd   : > { %v6065_v48 = vpop.permute.xlu1 %803 }
  0xfe   : > { %9186 = vst [vmem:[#allocation98_spill] sm:$0xff] %v6065_v48  ;;  %v6067_v4 = vpop.permute.xlu0 %807 }
  0xff   : > { %9187 = vst [vmem:[#allocation99_spill] sm:$0xff] %v6067_v4 }
 0x101   : > { %1206 = vrot.lane.b32.xlu2 %v1157_v25, %s5126_s14 }
 0x103   : > { %1204 = vrot.lane.b32.xlu1 %v1155_v42, %s5126_s14  ;;  %v6072_v34 = vpop.permute.xlu2 %835  ;;  %v6100_v42 = vpack.c.b16 %v9196_v41, %v9194_v31  ;;  %v9200_v31 = vld [vmem:[#allocation15_spill] sm:$0xff] }
 0x104   : > { %1260 = vrot.lane.b32.xlu0 %v5960_v30, %s5127_s15 }
 0x105   : > { %v6076_v37 = vpop.permute.xlu1 %809  ;;  %9197 = vst [vmem:[#allocation8_spill] sm:$0xff] %v6100_v42 }
 0x106   : > { %9188 = vst [vmem:[#allocation100_spill] sm:$0xff] %v6076_v37  ;;  %v6078_v10 = vpop.permute.xlu0 %813  ;;  %v9206_v37 = vld [vmem:[#allocation12_spill] sm:$0xff] }
 0x107   : > { %9189 = vst [vmem:[#allocation101_spill] sm:$0xff] %v6078_v10 }
 0x109   : > { %1339 = vrot.lane.b32.xlu2 %v5302_v44, %s5128_s16  ;;  %v1159_v44 = vsel %vm729_vm1, %v1156_v50, %v1158_v38 }
 0x10b   : > { %1262 = vrot.lane.b32.xlu1 %v5968_v36, %s5127_s15  ;;  %v6084_v52 = vpop.permute.xlu2 %841 }
 0x10c   : > { %1341 = vrot.lane.b32.xlu0 %v9190_v1, %s5128_s16  ;;  %v950_v1 = vshrl.u32 %v6100_v42, 16 }
 0x10d   : > { %v6088_v47 = vpop.permute.xlu1 %815 }
 0x10e   : > { %9191 = vst [vmem:[#allocation9_spill] sm:$0xff] %v6088_v47  ;;  %v6091_v43 = vpop.permute.xlu0 %819  ;;  %v952_v12 = vrot.slane %v950_v1, 4 }
 0x10f   : > { %9192 = vst [vmem:[#allocation102_spill] sm:$0xff] %v6091_v43  ;;  %v953_v43 = vshll.u32 %v6100_v42, 16 }
 0x111   : > { %1402 = vrot.lane.b32.xlu2 %v5718_v57, %s5129_s17  ;;  %v955_v47 = vrot.slane %v953_v43, 5  ;;  %v1168_v43 = vrot.slane %v6100_v42, 5 }
 0x113   : > { %1400 = vrot.lane.b32.xlu1 %v5710_v0, %s5129_s17  ;;  %v6104_v25 = vpop.permute.xlu2 %847  ;;  %v1166_v0 = vrot.slane %v6030_v13, 5  ;;  %v956_v41 = vor.u32 %v955_v47, %v952_v12 }
 0x114   : > { %1208 = vrot.lane.b32.xlu0 %v1159_v44, %s5126_s14 }
 0x115   : > { %v6109_v57 = vpop.permute.xlu1 %821 }
 0x116   : > { %9198 = vst [vmem:[#allocation10_spill] sm:$0xff] %v6109_v57  ;;  %v6111_v50 = vpop.permute.xlu0 %825 }
 0x117   : > { %9199 = vst [vmem:[#allocation103_spill] sm:$0xff] %v6111_v50  ;;  %v957_v50 = vsel %vm460_vm0, %v947_v32, %v956_v41 }
 0x119   : > { %1343 = vrot.lane.b32.xlu2 %v9200_v31, %s5128_s16  ;;  %v1167_v31 = vsel %vm729_vm1, %v9054_v3, %v1166_v0  ;;  %v9207_v3 = vunpack.c.l.b16 %v9206_v37 }
 0x11b   : > { %1264 = vrot.lane.b32.xlu1 %v5987_v53, %s5127_s15  ;;  %v6119_v44 = vpop.permute.xlu2 %853 }
 0x11c   : > { %9201 = vst [vmem:[#allocation15_spill] sm:$0xff] %v6119_v44  ;;  %1404 = vrot.lane.b32.xlu0 %v5725_v17, %s5129_s17  ;;  %v1169_v44 = vsel %vm729_vm1, %v1166_v0, %v1168_v43 }
 0x11d   : > { %v6123_v57 = vpop.permute.xlu1 %827 }
 0x11e   : > { %9202 = vst [vmem:[#allocation104_spill] sm:$0xff] %v6123_v57  ;;  %v6126_v1 = vpop.permute.xlu0 %837  ;;  %v9204_v57 = vld [vmem:[#allocation11_spill] sm:$0xff] }
 0x11f   : > { %v9205_v10 = vunpack.c.l.b16 %v9204_v57  ;;  %v9210_v57 = vld [vmem:[#allocation31_spill] sm:$0xff] }
 0x121   : > { %1216 = vrot.lane.b32.xlu2 %v1167_v31, %s5126_s14  ;;  %v6146_v4 = vpack.c.b16 %v9207_v3, %v9205_v10  ;;  %v9055_v31 = vrot.slane %v5987_v53, 5 }
 0x123   : > { %1116 = vrot.lane.b32.xlu1 %v957_v50, %s5125_s13  ;;  %v6135_v17 = vpop.permute.xlu2 %859  ;;  %v9209_v50 = vld [vmem:[#allocation27_spill] sm:$0xff]  ;;  %v959_v37 = vshrl.u32 %v6146_v4, 16  ;;  %v962_v10 = vshll.u32 %v6146_v4, 16 }
 0x124   : > { %9203 = vst [vmem:[#allocation105_spill] sm:$0xff] %v6135_v17  ;;  %1218 = vrot.lane.b32.xlu0 %v1169_v44, %s5126_s14 }
 0x125   : > { %v6138_v47 = vpop.permute.xlu1 %839  ;;  %v964_v17 = vrot.slane %v962_v10, 5 }
 0x126   : > { %v6140_v12 = vpop.permute.xlu0 %843 }
 0x129   : > { %1274 = vrot.lane.b32.xlu2 %v6146_v4, %s5127_s15 }
 0x12b   : > { %1272 = vrot.lane.b32.xlu1 %v6100_v42, %s5127_s15  ;;  %v6152_v32 = vpop.permute.xlu2 %865 }
 0x12c   : > { %9208 = vst [vmem:[#allocation11_spill] sm:$0xff] %v6152_v32  ;;  %1351 = vrot.lane.b32.xlu0 %v9209_v50, %s5128_s16  ;;  %v961_v32 = vrot.slane %v959_v37, 4  ;;  %v9222_v37 = vld [vmem:[#allocation18_spill] sm:$0xff] }
 0x12d   : > { %v6156_v0 = vpop.permute.xlu1 %845  ;;  %v9223_v10 = vunpack.c.l.b16 %v9222_v37 }
 0x12e   : > { %v6158_v44 = vpop.permute.xlu0 %849 }
 0x131   : > { %1412 = vrot.lane.b32.xlu2 %v5755_v59, %s5129_s17  ;;  %v9214_v59 = vld [vmem:[#allocation22_spill] sm:$0xff] }
 0x132   : > { %v9215_v48 = vunpack.c.l.b16 %v9214_v59  ;;  %v9059_v59 = vrot.slane %v6146_v4, 5 }
 0x133   : > { %1353 = vrot.lane.b32.xlu1 %v9210_v57, %s5128_s16  ;;  %v6166_v3 = vpop.permute.xlu2 %871  ;;  %v9218_v57 = vld [vmem:[#allocation25_spill] sm:$0xff] }
 0x134   : > { %9211 = vst [vmem:[#allocation12_spill] sm:$0xff] %v6166_v3  ;;  %1414 = vrot.lane.b32.xlu0 %v5752_v40, %s5129_s17  ;;  %v6179_v7 = vpack.c.b16 %v9217_v15, %v9215_v48  ;;  %v9219_v49 = vunpack.c.l.b16 %v9218_v57  ;;  %v9220_v3 = vld [vmem:[#allocation26_spill] sm:$0xff]  ;;  %v1161_v40 = vsel %vm729_vm1, %v1158_v38, %v9055_v31  ;;  %v6198_v15 = vor.u32 %v964_v17, %v961_v32 }
 0x135   : > { %v6171_v50 = vpop.permute.xlu1 %851  ;;  %v9221_v22 = vunpack.c.l.b16 %v9220_v3 }
 0x136   : > { %9212 = vst [vmem:[#allocation27_spill] sm:$0xff] %v6171_v50  ;;  %v6173_v62 = vpop.permute.xlu0 %855  ;;  %v9224_v50 = vld [vmem:[#allocation21_spill] sm:$0xff]  ;;  %v995_v33 = vshrl.u32 %v6179_v7, 16 }
 0x137   : > { %9213 = vst [vmem:[#allocation31_spill] sm:$0xff] %v6173_v62  ;;  %v6185_v26 = vpack.c.b16 %v9221_v22, %v9219_v49  ;;  %v9225_v62 = vunpack.c.l.b16 %v9224_v50  ;;  %v998_v22 = vshll.u32 %v6179_v7, 16  ;;  %v966_v50 = vsel %vm460_vm0, %v956_v41, %v6198_v15 }
 0x138   : > { %v997_v37 = vrot.slane %v995_v33, 4 }
 0x139   : > { %v6194_v6 = vpack.c.b16 %v9225_v62, %v9223_v10  ;;  %1266 = vrot.lane.b32.xlu2 %v6013_v16, %s5127_s15  ;;  %v1004_v49 = vshrl.u32 %v6185_v26, 16  ;;  %v1007_v48 = vshll.u32 %v6185_v26, 16  ;;  %v9227_v62 = vld [vmem:[#allocation19_spill] sm:$0xff] }
 0x13b   : > { %1210 = vrot.lane.b32.xlu1 %v1161_v40, %s5126_s14  ;;  %v6205_v38 = vpop.permute.xlu2 %877  ;;  %v986_v3 = vshrl.u32 %v6194_v6, 16  ;;  %v989_v17 = vshll.u32 %v6194_v6, 16  ;;  %v1000_v40 = vrot.slane %v998_v22, 5  ;;  %v1006_v10 = vrot.slane %v1004_v49, 4 }
 0x13c   : > { %9226 = vst [vmem:[#allocation22_spill] sm:$0xff] %v6205_v38  ;;  %1345 = vrot.lane.b32.xlu0 %v9227_v62, %s5128_s16  ;;  %v1009_v31 = vrot.slane %v1007_v48, 5  ;;  %v1171_v62 = vsel %vm729_vm1, %v1168_v43, %v9059_v59 }
 0x13d   : > { %v6211_v32 = vpop.permute.xlu1 %857  ;;  %v988_v38 = vrot.slane %v986_v3, 4  ;;  %v991_v42 = vrot.slane %v989_v17, 5  ;;  %v9232_v3 = vld [vmem:[#allocation14_spill] sm:$0xff] }
 0x13e   : > { %9228 = vst [vmem:[#allocation24_spill] sm:$0xff] %v6211_v32  ;;  %v6216_v57 = vpop.permute.xlu0 %861  ;;  %v1001_v32 = vor.u32 %v1000_v40, %v997_v37  ;;  %v6222_v21 = vor.u32 %v1009_v31, %v1006_v10  ;;  %v9230_v31 = vld [vmem:[#allocation13_spill] sm:$0xff]  ;;  %v9233_v17 = vunpack.c.l.b16 %v9232_v3 }
 0x13f   : > { %v6229_v33 = vor.u32 %v991_v42, %v988_v38  ;;  %v1178_v42 = vrot.slane %v6179_v7, 5  ;;  %v9058_v38 = vrot.slane %v6185_v26, 5 }
 0x140   : > { %v1011_v48 = vsel %vm460_vm0, %v1001_v32, %v6222_v21 }
 0x141   : > { %1118 = vrot.lane.b32.xlu2 %v966_v50, %s5125_s13  ;;  %v1002_v43 = vsel %vm460_vm0, %v6229_v33, %v1001_v32  ;;  %v9057_v32 = vrot.slane %v6194_v6, 5 }
 0x143   : > { %1406 = vrot.lane.b32.xlu1 %v5737_v63, %s5129_s17  ;;  %v6226_v41 = vpop.permute.xlu2 %883  ;;  %v9231_v63 = vunpack.c.l.b16 %v9230_v31 }
 0x144   : > { %1220 = vrot.lane.b32.xlu0 %v1171_v62, %s5126_s14  ;;  %v1181_v62 = vsel %vm729_vm1, %v1178_v42, %v9058_v38 }
 0x145   : > { %v6231_v22 = vpop.permute.xlu1 %863  ;;  %v6244_v50 = vpack.c.b16 %v9233_v17, %v9231_v63 }
 0x146   : > { %v6233_v49 = vpop.permute.xlu0 %867 }
 0x147   : > { %9229 = vst [vmem:[#allocation25_spill] sm:$0xff] %v6233_v49 }
 0x149   : > { %1128 = vrot.lane.b32.xlu2 %v1011_v48, %s5125_s13  ;;  %v1179_v48 = vsel %vm729_vm1, %v9057_v32, %v1178_v42  ;;  %v9237_v42 = vld [vmem:[#allocation34_spill] sm:$0xff]  ;;  %v9240_v32 = vld [vmem:[#allocation28_spill] sm:$0xff] }
 0x14b   : > { %1126 = vrot.lane.b32.xlu1 %v1002_v43, %s5125_s13  ;;  %v6249_v37 = vpop.permute.xlu2 %1106  ;;  %v1464_v43 = vsel %vm9069_vm2, %v5987_v53, %v5786_v46 }
 0x14c   : > { %1276 = vrot.lane.b32.xlu0 %v6244_v50, %s5127_s15  ;;  %v1516_v31 = vsel %vm1504_vm3, %v1464_v43, %v6002_v14  ;;  %v9241_v14 = vunpack.c.l.b16 %v9240_v32  ;;  %v9242_v43 = vld [vmem:[#allocation29_spill] sm:$0xff] }
 0x14d   : > { %v6254_v40 = vpop.permute.xlu1 %869  ;;  %v1567_v63 = vsel %vm9068_vm4, %v1516_v31, %v6156_v0  ;;  %v9243_v38 = vunpack.c.l.b16 %v9242_v43  ;;  %v1865_v32 = vld [vmem:[%s8942_s1 + $0x10] sm:$0x3] }
 0x14e   : > { %9234 = vst [vmem:[#allocation26_spill] sm:$0xff] %v6254_v40  ;;  %v6256_v10 = vpop.permute.xlu0 %873 }
 0x14f   : > { %9235 = vst [vmem:[#allocation18_spill] sm:$0xff] %v6256_v10  ;;  %v6286_v59 = vpack.c.b16 %v9243_v38, %v9241_v14  ;;  %v2075_v38 = vunpack.c.l.b16 %v1865_v32  ;;  %v1460_v14 = vsel %vm9069_vm2, %v5960_v30, %v5862_v56  ;;  %v968_v32 = vshrl.u32 %v6244_v50, 16 }
 0x151   : > { %1230 = vrot.lane.b32.xlu2 %v1181_v62, %s5126_s14 }
 0x153   : > { %1228 = vrot.lane.b32.xlu1 %v1179_v48, %s5126_s14  ;;  %v1113_v3 = vpop.permute.xlu2 %1112 }
 0x154   : > { %v6274_v17 = vsel %vm9072_vm5, %v1567_v63, %v1113_v3  ;;  %1355 = vrot.lane.b32.xlu0 %v9237_v42, %s5128_s16  ;;  %v2078_v63 = vpack.c.b16 %v2075_v38, %v2075_v38  ;;  %v9060_v3 = vrot.slane %v6013_v16, 5  ;;  %v971_v38 = vshll.u32 %v6244_v50, 16 }
 0x155   : > { %9236 = vst [vmem:[#allocation21_spill] sm:$0xff] %v6274_v17  ;;  %v6278_v46 = vpop.permute.xlu1 %875 }
 0x156   : > { %9238 = vst [vmem:[#allocation19_spill] sm:$0xff] %v6278_v46  ;;  %v6280_v62 = vpop.permute.xlu0 %879  ;;  %v2156_v42 = vsel %vm2154_vm6, %v2078_v63, 0 }
 0x157   : > { %9239 = vst [vmem:[#allocation13_spill] sm:$0xff] %v6280_v62  ;;  %2163 = vmatpush.bf16.msra.mxu0 %v2156_v42  ;;  %4913 = vmatpush.bf16.msra.mxu1 %v2156_v42 }
 0x158   : > { %4914 = vmatpush.bf16.msra.mxu2 %v2156_v42  ;;  %4915 = vmatpush.bf16.msra.mxu3 %v2156_v42  ;;  %v1013_v42 = vshrl.u32 %v6286_v59, 16 }
 0x159   : > { %1286 = vrot.lane.b32.xlu2 %v6286_v59, %s5127_s15 }
 0x15b   : > { %1284 = vrot.lane.b32.xlu1 %v6185_v26, %s5127_s15  ;;  %v6292_v0 = vpop.permute.xlu2 %1206 }
 0x15c   : > { %1416 = vrot.lane.b32.xlu0 %v5760_v11, %s5129_s17 }
 0x15d   : > { %v6296_v48 = vpop.permute.xlu1 %881 }
 0x15e   : > { %9244 = vst [vmem:[#allocation14_spill] sm:$0xff] %v6296_v48  ;;  %v6301_v31 = vpop.permute.xlu0 %1102  ;;  %v973_v48 = vrot.slane %v971_v38, 5 }
 0x161   : > { %1365 = vrot.lane.b32.xlu2 %v5658_v20, %s5128_s16  ;;  %v1512_v20 = vsel %vm1504_vm3, %v1460_v14, %v5998_v19  ;;  %v970_v14 = vrot.slane %v968_v32, 4 }
 0x162   : > { %v1563_v56 = vsel %vm9068_vm4, %v1512_v20, %v6084_v52  ;;  %v4884_v52 = vld [vmem:[%s8942_s1] sm:$0xff]  ;;  %v1462_v20 = vsel %vm9069_vm2, %v5968_v36, %v5766_v58  ;;  %v1015_v36 = vrot.slane %v1013_v42, 4  ;;  %v9061_v42 = vrot.slane %v6244_v50, 5 }
 0x163   : > { %1363 = vrot.lane.b32.xlu1 %v5615_v23, %s5128_s16  ;;  %v6308_v11 = vpop.permute.xlu2 %1339  ;;  %v4885_v23 = vld [vmem:[%s8942_s1 + $0x8] sm:$0xff]  ;;  %v1514_v32 = vsel %vm1504_vm3, %v1462_v20, %v5919_v61  ;;  %v9247_v61 = vld [vmem:[#allocation58_spill] sm:$0xff] }
 0x164   : > { %1424 = vrot.lane.b32.xlu0 %v5795_v24, %s5129_s17  ;;  %v9245_v24 = vrot.slane %v5987_v53, 5  ;;  %2164 = vmatpush.bf16.msra.mxu0 %v4885_v23  ;;  %v1016_v53 = vshll.u32 %v6286_v59, 16  ;;  %v1565_v38 = vsel %vm9068_vm4, %v1514_v32, %v6140_v12  ;;  %v4977_v32 = vld [vmem:[%s5219_s9 + $0x10] sm:$0xff]  }
 0x165   : > { %v1105_v43 = vpop.permute.xlu1 %1104  ;;  %4916 = vmatpush.bf16.msra.mxu1 %v4885_v23  ;;  %4917 = vmatpush.bf16.msra.mxu2 %v4885_v23 }
 0x166   : > { %v1109_v30 = vpop.permute.xlu0 %1108  ;;  %v1163_v19 = vsel %vm729_vm1, %v9245_v24, %v9060_v3  ;;  %4918 = vmatpush.bf16.msra.mxu3 %v4885_v23  ;;  %v1018_v24 = vrot.slane %v1016_v53, 5 }
 0x167   : > { %v6330_v63 = vsel %vm9072_vm5, %v1563_v56, %v1109_v30  ;;  %v6349_v30 = vor.u32 %v973_v48, %v970_v14 }
 0x168   : > { %2165 = vmatpush.bf16.msra.mxu0 %v4884_v52  ;;  %v6361_v48 = vor.u32 %v1018_v24, %v1015_v36 }
 0x169   : > { %1212 = vrot.lane.b32.xlu2 %v1163_v19, %s5126_s14  ;;  %4919 = vmatpush.bf16.msra.mxu1 %v4884_v52  ;;  %v975_v12 = vsel %vm460_vm0, %v6198_v15, %v6349_v30  ;;  %v9248_v19 = vld [vmem:[#allocation20_spill] sm:$0xff]  ;;  %v1456_v15 = vsel %vm9069_vm2, %v4977_v32, %v5840_v28 }
 0x16a   : > { %4920 = vmatpush.bf16.msra.mxu2 %v4884_v52  ;;  %4921 = vmatpush.bf16.msra.mxu3 %v4884_v52  ;;  %v1020_v20 = vsel %vm460_vm0, %v6222_v21, %v6361_v48  ;;  %v9250_v21 = vld [vmem:[#allocation16_spill] sm:$0xff] }
 0x16b   : > { %1426 = vrot.lane.b32.xlu1 %v5792_v51, %s5129_s17  ;;  %v1403_v56 = vpop.permute.xlu2 %1402 }
 0x16c   : > { %1268 = vrot.lane.b32.xlu0 %v6019_v2, %s5127_s15 }
 0x16d   : > { %v1111_v23 = vpop.permute.xlu1 %1110 }
 0x16e   : > { %v6352_v58 = vsel %vm9072_vm5, %v1565_v38, %v1111_v23  ;;  %v6354_v51 = vpop.permute.xlu0 %1114  ;;  %v1508_v38 = vsel %vm1504_vm3, %v1456_v15, %v5907_v55  ;;  %v9249_v23 = vrot.slane %v6146_v4, 5 }
 0x16f   : > { %9246 = vst [vmem:[#allocation34_spill] sm:$0xff] %v6352_v58  ;;  %v1559_v24 = vsel %vm9068_vm4, %v1508_v38, %v6126_v1  ;;  %v9261_v1 = vld [vmem:[#allocation40_spill] sm:$0xff]  ;;  %v1458_v58 = vsel %vm9069_vm2, %v5954_v35, %v5835_v60  ;;  %v9276_v60 = vld [vmem:[#allocation61_spill] sm:$0xff] }
 0x170   : > { %v1173_v36 = vsel %vm729_vm1, %v9249_v23, %v9061_v42  ;;  %v1610_v55 = vsel %vm9072_vm5, %v1559_v24, %v1105_v43  ;;  %v9255_v24 = vld [vmem:[#allocation36_spill] sm:$0xff]  ;;  %v9262_v62 = vunpack.c.l.b16 %v9261_v1  ;;  %v9270_v1 = vld [vmem:[#allocation38_spill] sm:$0xff] }
 0x171   : > { %1408 = vrot.lane.b32.xlu2 %v9247_v61, %s5129_s17  ;;  %v4902_v61 = vld [vmem:[%s5219_s9 + $0x8] sm:$0xff]  }
 0x173   : > { %1347 = vrot.lane.b32.xlu1 %v9248_v19, %s5128_s16  ;;  %v6365_v14 = vpop.permute.xlu2 %1343  ;;  %v9252_v19 = vld [vmem:[#allocation17_spill] sm:$0xff] }
 0x174   : > { %1120 = vrot.lane.b32.xlu0 %v975_v12, %s5125_s13  ;;  %v9251_v12 = vunpack.c.l.b16 %v9250_v21  ;;  %v9253_v3 = vunpack.c.l.b16 %v9252_v19  ;;  %v9256_v21 = vunpack.c.l.b16 %v9255_v24  ;;  %v9265_v24 = vrot.slane %v6185_v26, 5 }
 0x175   : > { %v1205_v52 = vpop.permute.xlu1 %1204 }
 0x176   : > { %v1261_v53 = vpop.permute.xlu0 %1260  ;;  %v6390_v28 = vpack.c.b16 %v9253_v3, %v9251_v12  ;;  %v1661_v3 = vsel %vm1657_vm7, %v1610_v55, %v6292_v0  ;;  %v9257_v12 = vld [vmem:[#allocation37_spill] sm:$0xff]  ;;  %v9259_v0 = vld [vmem:[#allocation39_spill] sm:$0xff] }
 0x177   : > { %v9258_v19 = vunpack.c.l.b16 %v9257_v12  ;;  %v9260_v55 = vunpack.c.l.b16 %v9259_v0  ;;  %v9271_v0 = vld [vmem:[#allocation41_spill] sm:$0xff] }
 0x179   : > { %1130 = vrot.lane.b32.xlu2 %v1020_v20, %s5125_s13  ;;  %v9254_v20 = vld [vmem:[#allocation65_spill] sm:$0xff]  ;;  %v6410_v42 = vpack.c.b16 %v9258_v19, %v9256_v21 }
 0x17a   : > { %v1453_v15 = vsel %vm9069_vm2, %v4902_v61, %v9254_v20 }
 0x17b   : > { %1222 = vrot.lane.b32.xlu1 %v1173_v36, %s5126_s14  ;;  %v6394_v32 = vpop.permute.xlu2 %1216  ;;  %v1506_v43 = vsel %vm1504_vm3, %v1453_v15, %v5948_v18  ;;  %v6419_v18 = vpack.c.b16 %v9262_v62, %v9260_v55  ;;  %v1043_v19 = vshll.u32 %v6410_v42, 16  ;;  %v9272_v55 = vunpack.c.l.b16 %v9271_v0 }
 0x17c   : > { %1278 = vrot.lane.b32.xlu0 %v6390_v28, %s5127_s15  ;;  %v1557_v61 = vsel %vm9068_vm4, %v1506_v43, %v6072_v34  ;;  %v9266_v34 = vld [vmem:[#allocation30_spill] sm:$0xff] }
 0x17d   : > { %v1263_v38 = vpop.permute.xlu1 %1262  ;;  %9263 = vst [vmem:[#allocation28_spill] sm:$0xff] %v6419_v18  ;;  %v1608_v15 = vsel %vm9072_vm5, %v1557_v61, %v6301_v31  ;;  %v9267_v43 = vunpack.c.l.b16 %v9266_v34  ;;  %v1040_v31 = vshrl.u32 %v6410_v42, 16  ;;  %v1049_v61 = vshrl.u32 %v6419_v18, 16 }
 0x17e   : > { %v1712_v23 = vsel %vm1708_vm8, %v1661_v3, %v1263_v38  ;;  %v1342_v36 = vpop.permute.xlu0 %1341  ;;  %v9264_v3 = vrot.slane %v6286_v59, 5  ;;  %v1659_v62 = vsel %vm1657_vm7, %v1608_v15, %v1205_v52 }
 0x17f   : > { %v1763_v20 = vsel %vm1759_vm10, %v1712_v23, %v1342_v36  ;;  %v9268_v23 = vld [vmem:[#allocation32_spill] sm:$0xff] }
 0x180   : > { %v1814_v38 = vsel %vm1810_vm9, %v1763_v20, %v1403_v56  ;;  %v1183_v21 = vsel %vm729_vm1, %v9265_v24, %v9264_v3  ;;  %v9269_v36 = vunpack.c.l.b16 %v9268_v23  ;;  %v1710_v56 = vsel %vm1708_vm8, %v1659_v62, %v1261_v53  ;;  %v9273_v3 = vld [vmem:[#allocation43_spill] sm:$0xff] }
 0x181   : > { %1357 = vrot.lane.b32.xlu2 %v9270_v1, %s5128_s16  ;;  %v1052_v20 = vshll.u32 %v6419_v18, 16  ;;  %v9274_v24 = vunpack.c.l.b16 %v9273_v3  ;;  %v1874_v52 = vshrl.u32 %v1814_v38, 16  ;;  %v1877_v15 = vshll.u32 %v1814_v38, 16 }
 0x182   : > { %v6433_v12 = vpack.c.b16 %v9269_v36, %v9267_v43  ;;  %v1761_v23 = vsel %vm1759_vm10, %v1710_v56, %v6308_v11  ;;  %v1042_v36 = vrot.slane %v1040_v31, 4  ;;  %v1045_v38 = vrot.slane %v1043_v19, 5  ;;  %v9275_v56 = vld [vmem:[#allocation50_spill] sm:$0xff] }
 0x183   : > { %v6447_v34 = vpack.c.b16 %v9274_v24, %v9272_v55  ;;  %1232 = vrot.lane.b32.xlu1 %v1183_v21, %s5126_s14  ;;  %v6450_v43 = vpop.permute.xlu2 %1274  ;;  %v1051_v3 = vrot.slane %v1049_v61, 4  ;;  %v1054_v21 = vrot.slane %v1052_v20, 5  ;;  %v1876_v24 = vrot.slane %v1874_v52, 3 }
 0x184   : > { %1288 = vrot.lane.b32.xlu0 %v6433_v12, %s5127_s15  ;;  %v1879_v40 = vrot.slane %v1877_v15, 4  ;;  %v1510_v19 = vsel %vm1504_vm3, %v1458_v58, %v5962_v29  ;;  %v6466_v61 = vor.u32 %v1045_v38, %v1042_v36 }
 0x185   : > { %v1401_v53 = vpop.permute.xlu1 %1400  ;;  %v1058_v62 = vshrl.u32 %v6447_v34, 16  ;;  %v1061_v1 = vshll.u32 %v6447_v34, 16  ;;  %v1055_v20 = vor.u32 %v1054_v21, %v1051_v3  ;;  %v1561_v52 = vsel %vm9068_vm4, %v1510_v19, %v6138_v47 }
 0x186   : > { %v1812_v0 = vsel %vm1810_vm9, %v1761_v23, %v1401_v53  ;;  %v1209_v55 = vpop.permute.xlu0 %1208  ;;  %v9277_v53 = vld [vmem:[#allocation63_spill] sm:$0xff]  ;;  %v9062_v21 = vrot.slane %v6410_v42, 5  ;;  %v9065_v19 = vrot.slane %v6447_v34, 5 }
 0x187   : > { %v1867_v46 = vshrl.u32 %v1812_v0, 16  ;;  %v1870_v17 = vshll.u32 %v1812_v0, 16  ;;  %v1060_v10 = vrot.slane %v1058_v62, 4  ;;  %v1063_v49 = vrot.slane %v1061_v1, 5 }
 0x188   : > { %v9278_v0 = vrot.slane %v6019_v2, 5 }
 0x189   : > { %v1869_v11 = vrot.slane %v1867_v46, 3  ;;  %v1872_v31 = vrot.slane %v1870_v17, 4  ;;  %1367 = vrot.lane.b32.xlu2 %v9275_v56, %s5128_s16  ;;  %v1880_v17 = vor.u32 %v1879_v40, %v1876_v24  ;;  %v1612_v46 = vsel %vm9072_vm5, %v1561_v52, %v6249_v37 }
 0x18a   : > { %v1663_v29 = vsel %vm1657_vm7, %v1612_v46, %v1209_v55  ;;  %v6478_v36 = vor.u32 %v1063_v49, %v1060_v10  ;;  %v1056_v40 = vsel %vm460_vm0, %v6466_v61, %v1055_v20  ;;  %v9279_v55 = vrot.slane %v6013_v16, 5 }
 0x18b   : > { %v1873_v15 = vor.u32 %v1872_v31, %v1869_v11  ;;  %1418 = vrot.lane.b32.xlu1 %v9276_v60, %s5129_s17  ;;  %v1413_v35 = vpop.permute.xlu2 %1412  ;;  %v1190_v24 = vrot.slane %v6419_v18, 5 }
 0x18c   : > { %1428 = vrot.lane.b32.xlu0 %v9277_v53, %s5129_s17  ;;  %v1165_v49 = vsel %vm729_vm1, %v9279_v55, %v9278_v0  ;;  %v1065_v3 = vsel %vm460_vm0, %v1055_v20, %v6478_v36 }
 0x18d   : > { %v1265_v58 = vpop.permute.xlu1 %1264  ;;  %v1881_v23 = vsel %vm1866_vm11, %v1873_v15, %v1880_v17  ;;  %v1191_v20 = vsel %vm729_vm1, %v9062_v21, %v1190_v24  ;;  %v1466_v15 = vsel %vm9069_vm2, %v6013_v16, %v5864_v54  ;;  %v1193_v46 = vsel %vm729_vm1, %v1190_v24, %v9065_v19  ;;  %v9320_v21 = vld [vmem:[#allocation92_spill] sm:$0xff]  ;;  %v9322_v19 = vld [vmem:[#allocation94_spill] sm:$0xff] }
 0x18e   : > { %v1714_v47 = vsel %vm1708_vm8, %v1663_v29, %v1265_v58  ;;  %4858 = vmatmul.msk.bf16.vlgmr.msra.gmra.mxu0 %vm2081_vm12, %v1881_v23  ;;  %v1405_v62 = vpop.permute.xlu0 %1404  ;;  %v1518_v53 = vsel %vm1504_vm3, %v1466_v15, %v6037_v9  ;;  %v977_v24 = vshrl.u32 %v6390_v28, 16 }
 0x18f   : > { %v1765_v37 = vsel %vm1759_vm10, %v1714_v47, %v6365_v14  ;;  %v1569_v29 = vsel %vm9068_vm4, %v1518_v53, %v6104_v25  ;;  %v1468_v25 = vsel %vm9069_vm2, %v6019_v2, %v5875_v27  ;;  %v9280_v27 = vld [vmem:[#allocation44_spill] sm:$0xff] }
 0x190   : > { %v1816_v1 = vsel %vm1810_vm9, %v1765_v37, %v1405_v62  ;;  %v1620_v54 = vsel %vm9072_vm5, %v1569_v29, %v6354_v51  ;;  %v1520_v51 = vsel %vm1504_vm3, %v1468_v25, %v5931_v8  ;;  %v9281_v2 = vunpack.c.l.b16 %v9280_v27  ;;  %v9285_v29 = vld [vmem:[#allocation54_spill] sm:$0xff] }
 0x191   : > { %v1882_v10 = vshrl.u32 %v1816_v1, 16  ;;  %v1885_v38 = vshll.u32 %v1816_v1, 16  ;;  %1138 = vrot.lane.b32.xlu2 %v1056_v40, %s5125_s13  ;;  %v1671_v16 = vsel %vm1657_vm7, %v1620_v54, %v6394_v32  ;;  %v1571_v32 = vsel %vm9068_vm4, %v1520_v51, %v6158_v44  ;;  %v9282_v1 = vld [vmem:[#allocation46_spill] sm:$0xff] }
 0x192   : > { %v9283_v0 = vunpack.c.l.b16 %v9282_v1  ;;  %v979_v54 = vrot.slane %v977_v24, 4  ;;  %v1025_v25 = vshll.u32 %v6433_v12, 16 }
 0x193   : > { %1214 = vrot.lane.b32.xlu1 %v1165_v49, %s5126_s14  ;;  %v6498_v14 = vpop.permute.xlu2 %1266  ;;  %v1884_v11 = vrot.slane %v1882_v10, 3  ;;  %v1887_v31 = vrot.slane %v1885_v38, 4  ;;  %v9284_v49 = vld [vmem:[#allocation23_spill] sm:$0xff] }
 0x194   : > { %1140 = vrot.lane.b32.xlu0 %v1065_v3, %s5125_s13  ;;  %v6547_v55 = vpack.c.b16 %v9283_v0, %v9281_v2  ;;  %v1027_v0 = vrot.slane %v1025_v25, 5  ;;  %v9293_v25 = vld [vmem:[#allocation48_spill] sm:$0xff] }
 0x195   : > { %v1117_v56 = vpop.permute.xlu1 %1116  ;;  %v6508_v60 = vor.u32 %v1887_v31, %v1884_v11  ;;  %v980_v11 = vshll.u32 %v6390_v28, 16 }
 0x196   : > { %v1219_v52 = vpop.permute.xlu0 %1218  ;;  %v1622_v37 = vsel %vm9072_vm5, %v1571_v32, %v1117_v56 }
 0x197   : > { %v1889_v9 = vsel %vm1866_vm11, %v1880_v17, %v6508_v60  ;;  %v1673_v8 = vsel %vm1657_vm7, %v1622_v37, %v1219_v52 }
 0x198   : > { %v1724_v3 = vsel %vm1708_vm8, %v1673_v8, %v6450_v43 }
 0x199   : > { %1240 = vrot.lane.b32.xlu2 %v1191_v20, %s5126_s14 }
 0x19b   : > { %1270 = vrot.lane.b32.xlu1 %v6030_v13, %s5127_s15  ;;  %v6520_v58 = vpop.permute.xlu2 %1118 }
 0x19c   : > { %1242 = vrot.lane.b32.xlu0 %v1193_v46, %s5126_s14 }
 0x19d   : > { %v1273_v23 = vpop.permute.xlu1 %1272 }
 0x19e   : > { %v1722_v47 = vsel %vm1708_vm8, %v1671_v16, %v1273_v23  ;;  %4859 = vmatmul.msk.bf16.gmra.mxu0 %vm2081_vm12, %v1889_v9  ;;  %v1352_v62 = vpop.permute.xlu0 %1351  ;;  %v982_v16 = vrot.slane %v980_v11, 5  ;;  %v1022_v9 = vshrl.u32 %v6433_v12, 16 }
 0x19f   : > { %v1773_v40 = vsel %vm1759_vm10, %v1722_v47, %v1352_v62  ;;  %v9286_v47 = vld [vmem:[#allocation59_spill] sm:$0xff] }
 0x1a0   : > { %v1824_v17 = vsel %vm1810_vm9, %v1773_v40, %v1413_v35  ;;  %v9287_v40 = vld [vmem:[#allocation57_spill] sm:$0xff]  ;;  %v1024_v1 = vrot.slane %v1022_v9, 4 }
 0x1a1   : > { %1296 = vrot.lane.b32.xlu2 %v6447_v34, %s5127_s15  ;;  %v1914_v44 = vshrl.u32 %v1824_v17, 16  ;;  %v1917_v38 = vshll.u32 %v1824_v17, 16  ;;  %v6576_v17 = vor.u32 %v982_v16, %v979_v54 }
 0x1a3   : > { %1349 = vrot.lane.b32.xlu1 %v9284_v49, %s5128_s16  ;;  %v6552_v10 = vpop.permute.xlu2 %1128  ;;  %v1916_v20 = vrot.slane %v1914_v44, 3  ;;  %v1919_v15 = vrot.slane %v1917_v38, 4  ;;  %v9289_v49 = vld [vmem:[#allocation72_spill] sm:$0xff]  ;;  %v984_v44 = vsel %vm460_vm0, %v6349_v30, %v6576_v17  ;;  %v6589_v38 = vor.u32 %v1027_v0, %v1024_v1 }
 0x1a4   : > { %1298 = vrot.lane.b32.xlu0 %v6547_v55, %s5127_s15 }
 0x1a5   : > { %v1354_v35 = vpop.permute.xlu1 %1353  ;;  %v6574_v32 = vor.u32 %v1919_v15, %v1916_v20 }
 0x1a6   : > { %v1775_v31 = vsel %vm1759_vm10, %v1724_v3, %v1354_v35  ;;  %v1415_v56 = vpop.permute.xlu0 %1414 }
 0x1a7   : > { %v1826_v52 = vsel %vm1810_vm9, %v1775_v31, %v1415_v56  ;;  %9288 = vst [vmem:[#allocation29_spill] sm:$0xff] %v6574_v32 }
 0x1a8   : > { %v1922_v46 = vshrl.u32 %v1826_v52, 16  ;;  %v1925_v53 = vshll.u32 %v1826_v52, 16 }
 0x1a9   : > { %1375 = vrot.lane.b32.xlu2 %v9285_v29, %s5128_s16 }
 0x1aa   : > { %v1924_v23 = vrot.slane %v1922_v46, 3  ;;  %v1927_v43 = vrot.slane %v1925_v53, 4 }
 0x1ab   : > { %1410 = vrot.lane.b32.xlu1 %v9286_v47, %s5129_s17  ;;  %v6568_v62 = vpop.permute.xlu2 %1230  ;;  %v9294_v47 = vunpack.c.l.b16 %v9293_v25 }
 0x1ac   : > { %v6570_v51 = vor.u32 %v1927_v43, %v1924_v23  ;;  %1377 = vrot.lane.b32.xlu0 %v9287_v40, %s5128_s16  ;;  %v9291_v43 = vld [vmem:[#allocation47_spill] sm:$0xff] }
 0x1ad   : > { %v1211_v37 = vpop.permute.xlu1 %1210  ;;  %v9292_v9 = vunpack.c.l.b16 %v9291_v43 }
 0x1ae   : > { %v1346_v27 = vpop.permute.xlu0 %1345  ;;  %v1929_v2 = vsel %vm1866_vm11, %v6574_v32, %v6570_v51  ;;  %v1665_v8 = vsel %vm1657_vm7, %v6330_v63, %v1211_v37  ;;  %v9064_v63 = vrot.slane %v6390_v28, 5  ;;  %v9295_v37 = vrot.slane %v6286_v59, 5  ;;  %v9323_v32 = vld [vmem:[#allocation95_spill] sm:$0xff] }
 0x1af   : > { %4864 = vmatmul.msk.bf16.vlgmr.msra.gmra.mxu1 %vm2081_vm12, %v1929_v2  ;;  %v1716_v3 = vsel %vm1708_vm8, %v1665_v8, %v6498_v14  ;;  %v9290_v14 = vrot.slane %v6244_v50, 5  ;;  %v6630_v40 = vpack.c.b16 %v9294_v47, %v9292_v9  ;;  %v9296_v2 = vld [vmem:[#allocation64_spill] sm:$0xff]  ;;  %v9299_v8 = vld [vmem:[#allocation35_spill] sm:$0xff]  ;;  %v9309_v9 = vld [vmem:[#allocation78_spill] sm:$0xff] }
 0x1b0   : > { %v1767_v24 = vsel %vm1759_vm10, %v1716_v3, %v1346_v27  ;;  %v1470_v1 = vsel %vm9069_vm2, %v6030_v13, %v9296_v2  ;;  %v9301_v3 = vld [vmem:[#allocation45_spill] sm:$0xff]  ;;  %v1488_v13 = vsel %vm9069_vm2, %v6433_v12, %v5871_v39  ;;  %v9310_v47 = vld [vmem:[#allocation79_spill] sm:$0xff]  ;;  %v1070_v2 = vshll.u32 %v6547_v55, 16 }
 0x1b1   : > { %1438 = vrot.lane.b32.xlu2 %v9289_v49, %s5129_s17  ;;  %v1175_v20 = vsel %vm729_vm1, %v9290_v14, %v9064_v63  ;;  %v9300_v49 = vunpack.c.l.b16 %v9299_v8  ;;  %v9305_v14 = vld [vmem:[#allocation8_spill] sm:$0xff]  ;;  %v1500_v25 = vsel %vm9069_vm2, %v6630_v40, %v9309_v9  ;;  %v9317_v9 = vld [vmem:[#allocation86_spill] sm:$0xff]  ;;  %v9321_v63 = vld [vmem:[#allocation93_spill] sm:$0xff] }
 0x1b3   : > { %1436 = vrot.lane.b32.xlu1 %v5846_v45, %s5129_s17  ;;  %v6593_v35 = vpop.permute.xlu2 %1286  ;;  %v1029_v45 = vsel %vm460_vm0, %v6361_v48, %v6589_v38  ;;  %v9063_v48 = vrot.slane %v6433_v12, 5 }
 0x1b4   : > { %1122 = vrot.lane.b32.xlu0 %v984_v44, %s5125_s13 }
 0x1b5   : > { %v1407_v11 = vpop.permute.xlu1 %1406  ;;  %v1185_v27 = vsel %vm729_vm1, %v9295_v37, %v9063_v48  ;;  %v1480_v37 = vsel %vm9069_vm2, %v6194_v6, %v9310_v47  ;;  %v9318_v47 = vld [vmem:[#allocation87_spill] sm:$0xff] }
 0x1b6   : > { %v1818_v31 = vsel %vm1810_vm9, %v1767_v24, %v1407_v11  ;;  %v6601_v30 = vpop.permute.xlu0 %1220  ;;  %v9302_v24 = vld [vmem:[#allocation69_spill] sm:$0xff] }
 0x1b7   : > { %v1890_v56 = vshrl.u32 %v1818_v31, 16  ;;  %v1893_v52 = vshll.u32 %v1818_v31, 16  ;;  %v1476_v11 = vsel %vm9069_vm2, %v6244_v50, %v9302_v24  ;;  %v1482_v31 = vsel %vm9069_vm2, %v6179_v7, %v5858_v5  ;;  %v9307_v50 = vld [vmem:[#allocation76_spill] sm:$0xff]  ;;  %v9308_v5 = vld [vmem:[#allocation77_spill] sm:$0xff]  ;;  %v9314_v24 = vld [vmem:[#allocation83_spill] sm:$0xff] }
 0x1b8   : > { %v1478_v43 = vsel %vm9069_vm2, %v6390_v28, %v9308_v5  ;;  %v9316_v5 = vld [vmem:[#allocation85_spill] sm:$0xff] }
 0x1b9   : > { %v1892_v15 = vrot.slane %v1890_v56, 3  ;;  %v1895_v46 = vrot.slane %v1893_v52, 4  ;;  %1132 = vrot.lane.b32.xlu2 %v1029_v45, %s5125_s13  ;;  %v9303_v45 = vld [vmem:[#allocation49_spill] sm:$0xff]  ;;  %v9304_v52 = vld [vmem:[#allocation74_spill] sm:$0xff] }
 0x1ba   : > { %v435_v56 = vpack.c.b16 %v9303_v45, %v9303_v45 }
 0x1bb   : > { %v6612_v53 = vor.u32 %v1895_v46, %v1892_v15  ;;  %1224 = vrot.lane.b32.xlu1 %v1175_v20, %s5126_s14  ;;  %v6615_v29 = vpop.permute.xlu2 %1365  ;;  %v1472_v20 = vsel %vm9069_vm2, %v9305_v14, %v9304_v52  ;;  %v9306_v15 = vld [vmem:[#allocation75_spill] sm:$0xff]  ;;  %v1492_v52 = vsel %vm9069_vm2, %v6410_v42, %v9314_v24 }
 0x1bc   : > { %1280 = vrot.lane.b32.xlu0 %v6194_v6, %s5127_s15  ;;  %v1494_v46 = vsel %vm9069_vm2, %v6419_v18, %v9306_v15  ;;  %v9315_v15 = vld [vmem:[#allocation84_spill] sm:$0xff]  ;;  %v1072_v18 = vrot.slane %v1070_v2, 5  ;;  %v9332_v2 = vld [vmem:[#allocation27_spill] sm:$0xff] }
 0x1bd   : > { %v6620_v54 = vpop.permute.xlu1 %1126  ;;  %v1897_v16 = vsel %vm1866_vm11, %v6508_v60, %v6612_v53  ;;  %v9297_v60 = vld [vmem:[#allocation33_spill] sm:$0xff] }
 0x1be   : > { %4860 = vmatmul.msk.bf16.gmra.mxu0 %vm2081_vm12, %v1897_v16  ;;  %v1277_v23 = vpop.permute.xlu0 %1276  ;;  %v9298_v0 = vunpack.c.l.b16 %v9297_v60  ;;  %v1474_v16 = vsel %vm9069_vm2, %v6146_v4, %v9307_v50  ;;  %v1067_v4 = vshrl.u32 %v6547_v55, 16  ;;  %v9311_v60 = vld [vmem:[#allocation80_spill] sm:$0xff]  ;;  %v1496_v50 = vsel %vm9069_vm2, %v6447_v34, %v9315_v15 }
 0x1bf   : > { %v1522_v15 = vsel %vm1504_vm3, %v1470_v1, %v9321_v63  ;;  %v9327_v63 = vld [vmem:[#allocation99_spill] sm:$0xff] }
 0x1c0   : > { %v6644_v44 = vpack.c.b16 %v9300_v49, %v9298_v0  ;;  %v9312_v0 = vld [vmem:[#allocation81_spill] sm:$0xff]  ;;  %v9313_v49 = vld [vmem:[#allocation82_spill] sm:$0xff]  ;;  %v1534_v1 = vsel %vm1504_vm3, %v1482_v31, %v9327_v63  ;;  %v9335_v63 = vld [vmem:[#allocation103_spill] sm:$0xff] }
 0x1c1   : > { %1359 = vrot.lane.b32.xlu2 %v9301_v3, %s5128_s16  ;;  %v1486_v8 = vsel %vm9069_vm2, %v6286_v59, %v9312_v0  ;;  %v1503_v59 = vsel %vm9069_vm2, %v435_v56, %v9317_v9  ;;  %v1524_v56 = vsel %vm1504_vm3, %v1472_v20, %v9323_v32  ;;  %v9324_v9 = vld [vmem:[#allocation96_spill] sm:$0xff]  ;;  %v9329_v32 = vld [vmem:[#allocation51_spill] sm:$0xff]  ;;  %v9330_v20 = vld [vmem:[#allocation101_spill] sm:$0xff] }
 0x1c2   : > { %v1490_v3 = vsel %vm9069_vm2, %v6644_v44, %v9313_v49  ;;  %v9319_v49 = vld [vmem:[#allocation90_spill] sm:$0xff]  ;;  %v6712_v48 = vsel %vm1504_vm3, %v1486_v8, %v9320_v21  ;;  %v9326_v21 = vld [vmem:[#allocation97_spill] sm:$0xff] }
 0x1c3   : > { %1234 = vrot.lane.b32.xlu1 %v1185_v27, %s5126_s14  ;;  %v6672_v39 = vpop.permute.xlu2 %1212  ;;  %v1484_v27 = vsel %vm9069_vm2, %v6185_v26, %v9311_v60  ;;  %v1498_v26 = vsel %vm9069_vm2, %v6547_v55, %v9316_v5  ;;  %v1526_v60 = vsel %vm1504_vm3, %v1474_v16, %v9318_v47  ;;  %v1532_v24 = vsel %vm1504_vm3, %v1480_v37, %v9319_v49  ;;  %v9325_v37 = vld [vmem:[#allocation98_spill] sm:$0xff] }
 0x1c4   : > { %1290 = vrot.lane.b32.xlu0 %v6644_v44, %s5127_s15  ;;  %v6718_v5 = vsel %vm1504_vm3, %v1492_v52, %v9322_v19  ;;  %v1528_v16 = vsel %vm1504_vm3, %v1476_v11, %v9324_v9  ;;  %v1069_v47 = vrot.slane %v1067_v4, 4  ;;  %v1530_v49 = vsel %vm1504_vm3, %v1478_v43, %v9325_v37  ;;  %v9328_v19 = vld [vmem:[#allocation100_spill] sm:$0xff]  ;;  %v9331_v4 = vld [vmem:[#allocation9_spill] sm:$0xff]  ;;  %v9333_v37 = vld [vmem:[#allocation102_spill] sm:$0xff] }
 0x1c5   : > { %v6696_v14 = vpop.permute.xlu1 %1228  ;;  %v6728_v8 = vsel %vm1504_vm3, %v1498_v26, %v9326_v21  ;;  %v1536_v52 = vsel %vm1504_vm3, %v1484_v27, %v9328_v19  ;;  %v6738_v11 = vsel %vm1504_vm3, %v1488_v13, %v9330_v20  ;;  %v1542_v43 = vsel %vm1504_vm3, %v1490_v3, %v9331_v4  ;;  %v9334_v27 = vld [vmem:[#allocation10_spill] sm:$0xff]  ;;  %v9336_v3 = vld [vmem:[#allocation60_spill] sm:$0xff] }
 0x1c6   : > { %v1356_v0 = vpop.permute.xlu0 %1355  ;;  %v1573_v26 = vsel %vm9068_vm4, %v1522_v15, %v9332_v2  ;;  %v1194_v9 = vrot.slane %v6547_v55, 5  ;;  %v6747_v31 = vsel %vm1504_vm3, %v1494_v46, %v9333_v37  ;;  %v1548_v21 = vsel %vm1504_vm3, %v1496_v50, %v9334_v27  ;;  %v9338_v46 = vld [vmem:[#allocation15_spill] sm:$0xff] }
 0x1c7   : > { %v6753_v19 = vsel %vm1504_vm3, %v1500_v25, %v9335_v63  ;;  %v1624_v13 = vsel %vm9072_vm5, %v1573_v26, %v6520_v58  ;;  %v6765_v4 = vsel %vm9068_vm4, %v1524_v56, %v9338_v46  ;;  %v9339_v25 = vld [vmem:[#allocation67_spill] sm:$0xff]  ;;  %v6771_v2 = vor.u32 %v1072_v18, %v1069_v47  ;;  %v9340_v58 = vld [vmem:[#allocation105_spill] sm:$0xff] }
 0x1c8   : > { %v1675_v50 = vsel %vm1657_vm7, %v1624_v13, %v6601_v30  ;;  %v1581_v26 = vsel %vm9068_vm4, %v1530_v49, %v9340_v58  ;;  %v9341_v37 = vld [vmem:[#allocation11_spill] sm:$0xff]  ;;  %v1031_v56 = vshrl.u32 %v6644_v44, 16  ;;  %v9342_v18 = vrot.slane %v6447_v34, 5 }
 0x1c9   : > { %1369 = vrot.lane.b32.xlu2 %v9329_v32, %s5128_s16  ;;  %v9337_v32 = vld [vmem:[#allocation104_spill] sm:$0xff]  ;;  %v6777_v27 = vsel %vm9068_vm4, %v1536_v52, %v9341_v37  ;;  %v1034_v49 = vshll.u32 %v6644_v44, 16  ;;  %v2287_v13 = vlaneseq  ;;  %v1074_v58 = vsel %vm460_vm0, %v6478_v36, %v6771_v2 }
 0x1ca   : > { %v1554_v20 = vsel %vm1504_vm3, %v1503_v59, %v9337_v32  ;;  %v1726_v59 = vsel %vm1708_vm8, %v1675_v50, %v1277_v23  ;;  %v1195_v47 = vsel %vm729_vm1, %v9342_v18, %v1194_v9  ;;  %v9343_v32 = vld [vmem:[#allocation12_spill] sm:$0xff]  ;;  %v9344_v23 = vld [vmem:[#allocation31_spill] sm:$0xff]  ;;  %v9346_v18 = vld [vmem:[#allocation22_spill] sm:$0xff] }
 0x1cb   : > { %1420 = vrot.lane.b32.xlu1 %v9336_v3, %s5129_s17  ;;  %v6759_v15 = vpop.permute.xlu2 %1408  ;;  %v1777_v3 = vsel %vm1759_vm10, %v1726_v59, %v1356_v0  ;;  %v6790_v52 = vsel %vm9068_vm4, %v1542_v43, %v9343_v32  ;;  %v6794_v46 = vsel %vm9068_vm4, %v1526_v60, %v9344_v23  ;;  %v1583_v0 = vsel %vm9068_vm4, %v1532_v24, %v6216_v57  ;;  %v9345_v59 = vld [vmem:[#allocation24_spill] sm:$0xff] }
 0x1cc   : > { %1430 = vrot.lane.b32.xlu0 %v9339_v25, %s5129_s17  ;;  %v6802_v37 = vshrl.u32 %v2287_v13, 7  ;;  %v6806_v43 = vsel %vm9068_vm4, %v1528_v16, %v9345_v59  ;;  %v6810_v60 = vsel %vm9068_vm4, %v1548_v21, %v9346_v18  ;;  %v1634_v57 = vsel %vm9072_vm5, %v1583_v0, %v6552_v10 }
 0x1cd   : > { %v1285_v63 = vpop.permute.xlu1 %1284  ;;  %v1033_v24 = vrot.slane %v1031_v56, 4  ;;  %v1036_v32 = vrot.slane %v1034_v49, 5  ;;  %v6818_v13 = vsel %vm9068_vm4, %v1534_v1, %v6231_v22  ;;  %v6822_v16 = vsel %vm9068_vm4, %v1554_v20, %v6226_v41 }
 0x1ce   : > { %v1417_v30 = vpop.permute.xlu0 %1416  ;;  %v2339_v36 = vand.u32 65535, %v6802_v37  ;;  %v1685_v21 = vsel %vm1657_vm7, %v1634_v57, %v6568_v62  ;;  %v1632_v10 = vsel %vm9072_vm5, %v1581_v26, %v6620_v54  ;;  %v1076_v41 = vshrl.u32 %v6630_v40, 16 }
 0x1cf   : > { %v1828_v50 = vsel %vm1810_vm9, %v1777_v3, %v1417_v30  ;;  %v1079_v22 = vshll.u32 %v6630_v40, 16  ;;  %v1736_v62 = vsel %vm1708_vm8, %v1685_v21, %v6593_v35  ;;  %v2340_v20 = vshrl.u32 %v6802_v37, 16 }
 0x1d0   : > { %v1930_v25 = vshrl.u32 %v1828_v50, 16  ;;  %v1933_v34 = vshll.u32 %v1828_v50, 16  ;;  %v2343_v26 = vmul.u32 43690, %v2339_v36  ;;  %v993_v50 = vsel %vm460_vm0, %v6576_v17, %v6229_v33  ;;  %v9348_v33 = vld [vmem:[#allocation25_spill] sm:$0xff] }
 0x1d1   : > { %1244 = vrot.lane.b32.xlu2 %v1195_v47, %s5126_s14  ;;  %v1683_v47 = vsel %vm1657_vm7, %v1632_v10, %v6696_v14  ;;  %v1186_v18 = vrot.slane %v6644_v44, 5  ;;  %v1078_v57 = vrot.slane %v1076_v41, 4  ;;  %v6860_v17 = vsel %vm9068_vm4, %v6712_v48, %v9348_v33 }
 0x1d2   : > { %v1932_v3 = vrot.slane %v1930_v25, 3  ;;  %v1935_v30 = vrot.slane %v1933_v34, 4  ;;  %v1734_v54 = vsel %vm1708_vm8, %v1683_v47, %v1285_v63  ;;  %v6850_v25 = vor.u32 %v1036_v32, %v1033_v24  ;;  %v9349_v24 = vld [vmem:[#allocation18_spill] sm:$0xff]  ;;  %v9350_v47 = vld [vmem:[#allocation56_spill] sm:$0xff] }
 0x1d3   : > { %1142 = vrot.lane.b32.xlu1 %v1074_v58, %s5125_s13  ;;  %v6829_v56 = vpop.permute.xlu2 %1130  ;;  %v2342_v63 = vmul.u32 43691, %v2339_v36  ;;  %v2344_v34 = vmul.u32 43691, %v2340_v20  ;;  %v2346_v58 = vshll.u32 %v2343_v26, 16  ;;  %v6865_v32 = vsel %vm9068_vm4, %v6718_v5, %v9349_v24 }
 0x1d4   : > { %v6833_v49 = vor.u32 %v1935_v30, %v1932_v3  ;;  %1300 = vrot.lane.b32.xlu0 %v6630_v40, %s5127_s15  ;;  %v1081_v3 = vrot.slane %v1079_v22, 5  ;;  %v2345_v30 = vmul.u32 43690, %v2340_v20  ;;  %v1787_v36 = vsel %vm1759_vm10, %v1736_v62, %v6615_v29  ;;  %v9353_v29 = vld [vmem:[#allocation34_spill] sm:$0xff] }
 0x1d5   : > { %v1364_v1 = vpop.permute.xlu1 %1363  ;;  %v2348_v21 = vshll.u32 %v2344_v34, 16  ;;  %vm2350_vm13 = vc.u32 %v2342_v63, %v2346_v58  ;;  %v9351_v22 = vrot.slane %v6194_v6, 5  ;;  %v2352_v5 = vadd.s32 %v2346_v58, %v2342_v63 }
 0x1d6   : > { %v1785_v14 = vsel %vm1759_vm10, %v1734_v54, %v1364_v1  ;;  %v1425_v23 = vpop.permute.xlu0 %1424  ;;  %v1937_v0 = vsel %vm1866_vm11, %v6570_v51, %v6833_v49  ;;  %v9347_v51 = vld [vmem:[#allocation73_spill] sm:$0xff]  ;;  %v9352_v54 = vrot.slane %v6390_v28, 5  ;;  %v5130_v1 = vmov 0  }
 0x1d7   : > { %v1836_v35 = vsel %vm1810_vm9, %v1785_v14, %v1425_v23  ;;  %4865 = vmatmul.msk.bf16.gmra.mxu1 %vm2081_vm12, %v1937_v0  ;;  %v2351_v20 = vsel %vm2350_vm13, 1, %v5130_v1  ;;  %v6880_v14 = vadd.s32 8, %v6802_v37  ;;  %v1667_v62 = vsel %vm1657_vm7, %v9353_v29, %v6672_v39 }
 0x1d8   : > { %v1962_v59 = vshrl.u32 %v1836_v35, 16  ;;  %v1965_v10 = vshll.u32 %v1836_v35, 16  ;;  %v1177_v48 = vsel %vm729_vm1, %v9352_v54, %v9351_v22  ;;  %v1038_v6 = vsel %vm460_vm0, %v6589_v38, %v6850_v25  ;;  %v9355_v38 = vld [vmem:[#allocation91_spill] sm:$0xff] }
 0x1d9   : > { %1440 = vrot.lane.b32.xlu2 %v9347_v51, %s5129_s17  ;;  %v9354_v28 = vrot.slane %v6433_v12, 5  ;;  %v6896_v0 = vor.u32 %v1081_v3, %v1078_v57  ;;  %v2353_v58 = vadd.s32 %v2351_v20, %v2345_v30  ;;  %vm2354_vm14 = vc.u32 %v2352_v5, %v2348_v21 }
 0x1da   : > { %v1964_v35 = vrot.slane %v1962_v59, 3  ;;  %v2368_v39 = vand.u32 65535, %v6880_v14  ;;  %v1313_v24 = vshrl.u32 %v9355_v38, 16  ;;  %v1316_v54 = vshll.u32 %v9355_v38, 16 }
 0x1db   : > { %1379 = vrot.lane.b32.xlu1 %v9350_v47, %s5128_s16  ;;  %v6871_v41 = vpop.permute.xlu2 %1357  ;;  %v6894_v23 = vsel %vm729_vm1, %v9354_v28, %v1186_v18  ;;  %v2347_v47 = vshrl.u32 %v2343_v26, 16  ;;  %v2355_v57 = vsel %vm2354_vm14, 1, %v5130_v1  ;;  %v1196_v59 = vrot.slane %v6630_v40, 5 }
 0x1dc   : > { %1124 = vrot.lane.b32.xlu0 %v993_v50, %s5125_s13  ;;  %v1967_v50 = vrot.slane %v1965_v10, 4  ;;  %v2349_v3 = vshrl.u32 %v2344_v34, 16  ;;  %v2357_v30 = vadd.s32 %v2355_v57, %v2353_v58  ;;  %v2369_v21 = vshrl.u32 %v6880_v14, 16 }
 0x1dd   : > { %v1427_v63 = vpop.permute.xlu1 %1426  ;;  %v6906_v5 = vmul.u32 43690, %v2368_v39  ;;  %v1315_v29 = vrot.slane %v1313_v24, 4  ;;  %v1318_v58 = vrot.slane %v1316_v54, 5  ;;  %v6939_v57 = vsel %vm460_vm0, %v6771_v2, %v6896_v0 }
 0x1de   : > { %v1838_v51 = vsel %vm1810_vm9, %v1787_v36, %v1427_v63  ;;  %v1269_v33 = vpop.permute.xlu0 %1268  ;;  %v2371_v36 = vmul.u32 43691, %v2368_v39  ;;  %v6908_v26 = vor.u32 %v1967_v50, %v1964_v35  ;;  %v2358_v28 = vadd.s32 %v2357_v30, %v2347_v47 }
 0x1df   : > { %v1970_v22 = vshrl.u32 %v1838_v51, 16  ;;  %v1973_v12 = vshll.u32 %v1838_v51, 16  ;;  %v6910_v63 = vmul.u32 43691, %v2369_v21  ;;  %v1718_v39 = vsel %vm1708_vm8, %v1667_v62, %v1269_v33 }
 0x1e0   : > { %v2359_v35 = vadd.s32 %v2358_v28, %v2349_v3  ;;  %v2374_v50 = vmul.u32 43690, %v2369_v21  ;;  %v6932_v62 = vsel %vm9072_vm5, %v6818_v13, %v6829_v56  ;;  %v6948_v13 = vsel %vm729_vm1, %v1194_v9, %v1196_v59  ;;  %v9356_v28 = vld [vmem:[#allocation42_spill] sm:$0xff] }
 0x1e1   : > { %v1972_v20 = vrot.slane %v1970_v22, 3  ;;  %v1975_v10 = vrot.slane %v1973_v12, 4  ;;  %1134 = vrot.lane.b32.xlu2 %v1038_v6, %s5125_s13  ;;  %v2375_v22 = vshll.u32 %v6906_v5, 16  ;;  %v6919_v6 = vadd.s32 16, %v6802_v37 }
 0x1e2   : > { %v2377_v24 = vshll.u32 %v6910_v63, 16  ;;  %v2360_v3 = vshrl.u32 %v2359_v35, 4  ;;  %v6950_v56 = vor.u32 %v1318_v58, %v1315_v29 }
 0x1e3   : > { %v6912_v51 = vor.u32 %v1975_v10, %v1972_v20  ;;  %1226 = vrot.lane.b32.xlu1 %v1177_v48, %s5126_s14  ;;  %v6915_v34 = vpop.permute.xlu2 %1367  ;;  %vm2379_vm15 = vc.u32 %v2371_v36, %v2375_v22  ;;  %v2381_v12 = vadd.s32 %v2375_v22, %v2371_v36  ;;  %v2397_v54 = vand.u32 65535, %v6919_v6 }
 0x1e4   : > { %1282 = vrot.lane.b32.xlu0 %v6179_v7, %s5127_s15  ;;  %v2380_v21 = vsel %vm2379_vm15, 1, %v5130_v1  ;;  %v2361_v36 = vmul.u32 24, %v2360_v3  ;;  %v2398_v55 = vshrl.u32 %v6919_v6, 16  ;;  %vm4160_vm15 = vcmask 27648  }
 0x1e5   : > { %v1348_v47 = vpop.permute.xlu1 %1347  ;;  %v1977_v48 = vsel %vm1866_vm11, %v6908_v26, %v6912_v51  ;;  %v2382_v2 = vadd.s32 %v2380_v21, %v2374_v50  ;;  %vm2383_vm3 = vc.u32 %v2381_v12, %v2377_v24  ;;  %v6957_v22 = vmul.u32 43690, %v2397_v54  ;;  %4161 = vst.msk [vmem:[%s6983_s25] sm:$0xf] %vm4160_vm15, %v5130_v1 }
 0x1e6   : > { %v1769_v7 = vsel %vm1759_vm10, %v1718_v39, %v1348_v47  ;;  %4870 = vmatmul.msk.bf16.vlgmr.msra.gmra.mxu2 %vm2081_vm12, %v1977_v48  ;;  %v1121_v33 = vpop.permute.xlu0 %1120  ;;  %v2362_v58 = vsub.s32 %v6802_v37, %v2361_v36  ;;  %v2384_v39 = vsel %vm2383_vm3, 1, %v5130_v1  ;;  %v1392_v24 = vrot.slane %v9355_v38, 5  ;;  %v9360_v36 = vld [vmem:[#allocation55_spill] sm:$0xff]  ;;  %4162 = vst.msk [vmem:[%s6983_s25 + $0x4] sm:$0xf] %vm4160_vm15, %v5130_v1 }
 0x1e7   : > { %v1820_v30 = vsel %vm1810_vm9, %v1769_v7, %v6759_v15  ;;  %v2376_v15 = vshrl.u32 %v6906_v5, 16  ;;  %v9357_v5 = vld [vmem:[#allocation70_spill] sm:$0xff]  ;;  %v2378_v47 = vshrl.u32 %v6910_v63, 16  ;;  %v2386_v48 = vadd.s32 %v2384_v39, %v2382_v2  ;;  %4163 = vst.msk [vmem:[%s6983_s25 + $0x8] sm:$0xf] %vm4160_vm15, %v5130_v1  ;;  %v9363_v39 = vld [vmem:[#allocation53_spill] sm:$0xff] }
 0x1e8   : > { %v1898_v20 = vshrl.u32 %v1820_v30, 16  ;;  %v1901_v10 = vshll.u32 %v1820_v30, 16  ;;  %v6967_v50 = vpack.c.b16 %v9357_v5, %v9303_v45  ;;  %vm3728_vm6 = vcmp.ne.s32.totalorder %v2362_v58, 0  ;;  %4164 = vst.msk [vmem:[%s6983_s25 + $0xc] sm:$0xf] %vm4160_vm15, %v5130_v1 }
 0x1e9   : > { %1361 = vrot.lane.b32.xlu2 %v9356_v28, %s5128_s16  ;;  %vm3776_vm13 = vcmp.lt.s32.totalorder %v2362_v58, 0  ;;  %v3872_v7 = vadd.s32 24, %v2362_v58  ;;  %v2400_v3 = vmul.u32 43691, %v2397_v54  ;;  %v2404_v30 = vshll.u32 %v6957_v22, 16  ;;  %4165 = vst.msk [vmem:[%s6983_s25 + $0x10] sm:$0xf] %vm4160_vm15, %v5130_v1 }
 0x1ea   : > { %v1900_v9 = vrot.slane %v1898_v20, 3  ;;  %v1903_v29 = vrot.slane %v1901_v10, 4  ;;  %vm6985_vm14 = vmand %vm3776_vm13, %vm3728_vm6  ;;  %v1626_v21 = vsel %vm9072_vm5, %v6765_v4, %v1121_v33  ;;  %v6998_v2 = vsel %vm460_vm0, %v9360_v36, %v6950_v56  ;;  %v9365_v36 = vld [vmem:[#allocation66_spill] sm:$0xff]  ;;  %4166 = vst.msk [vmem:[%s6983_s25 + $0x14] sm:$0xf] %vm4160_vm15, %v5130_v1 }
 0x1eb   : > { %1236 = vrot.lane.b32.xlu1 %v6894_v23, %s5126_s14  ;;  %v6963_v35 = vpop.permute.xlu2 %1138  ;;  %v6976_v23 = vmul.u32 43691, %v2398_v55  ;;  %v2387_v54 = vadd.s32 %v2386_v48, %v2376_v15  ;;  %v3920_v4 = vsel %vm6985_vm14, %v3872_v7, %v2362_v58  ;;  %v1088_v33 = vshll.u32 %v6967_v50, 16  ;;  %4263 = vst.msk [vmem:[%s6983_s25 + $0xd8] sm:$0xf] %vm4160_vm15, %v5130_v1 }
 0x1ec   : > { %v6971_v12 = vor.u32 %v1903_v29, %v1900_v9  ;;  %1292 = vrot.lane.b32.xlu0 %v6410_v42, %s5127_s15  ;;  %v2403_v28 = vmul.u32 43690, %v2398_v55  ;;  %vm7017_vm3 = vcmp.lt.s32.totalorder %v3920_v4, 16  ;;  %v2405_v5 = vshrl.u32 %v6957_v22, 16  ;;  %4264 = vst.msk [vmem:[%s6983_s25 + $0xdc] sm:$0xf] %vm4160_vm15, %v5130_v1 }
 0x1ed   : > { %v1223_v45 = vpop.permute.xlu1 %1222  ;;  %v2388_v29 = vadd.s32 %v2387_v54, %v2378_v47  ;;  %v2406_v58 = vshll.u32 %v6976_v23, 16  ;;  %vm4520_vm6 = vmpackc.low %vm7017_vm3, %vm7017_vm3  ;;  %vm2408_vm13 = vc.u32 %v2400_v3, %v2404_v30  ;;  %v2410_v48 = vadd.s32 %v2404_v30, %v2400_v3  ;;  %v4978_v47 = vld [vmem:[%s5219_s9 + $0x18] sm:$0xf]  ;;  %v9366_v54 = vld [vmem:[#allocation71_spill] sm:$0xff]  ;;  %4265 = vst.msk [vmem:[%s6983_s25 + $0xe0] sm:$0xf] %vm4160_vm15, %v5130_v1 }
 0x1ee   : > { %v1905_v20 = vsel %vm1866_vm11, %v6612_v53, %v6971_v12  ;;  %v1279_v10 = vpop.permute.xlu0 %1278  ;;  %v1085_v53 = vshrl.u32 %v6967_v50, 16  ;;  %v1677_v9 = vsel %vm1657_vm7, %v1626_v21, %v1223_v45  ;;  %v4568_v45 = vsel %vm4520_vm6, %v4978_v47, 0  ;;  %4266 = vst.msk [vmem:[%s6983_s25 + $0xe4] sm:$0xf] %vm4160_vm15, %v5130_v1 }
 0x1ef   : > { %4861 = vmatmul.msk.bf16.gmra.mxu0 %vm2081_vm12, %v1905_v20  ;;  %v1728_v55 = vsel %vm1708_vm8, %v1677_v9, %v1279_v10  ;;  %v2389_v63 = vshrl.u32 %v2388_v29, 4  ;;  %v2409_v7 = vsel %vm2408_vm13, 1, %v5130_v1  ;;  %v7041_v21 = vadd.s32 24, %v6802_v37  ;;  %v9364_v20 = vld [vmem:[#allocation62_spill] sm:$0xff]  ;;  %4616 = vst.msk [vmem:[%s7015_s26] sm:$0xf] %vm4160_vm15, %v4568_v45 }
 0x1f0   : > { %v1087_v22 = vrot.slane %v1085_v53, 4  ;;  %v1090_v3 = vrot.slane %v1088_v33, 5  ;;  %v2411_v30 = vadd.s32 %v2409_v7, %v2403_v28  ;;  %vm2412_vm14 = vc.u32 %v2410_v48, %v2406_v58 }
 0x1f1   : > { %1371 = vrot.lane.b32.xlu2 %v9363_v39, %s5128_s16  ;;  %v7053_v4 = vsel %vm729_vm1, %v9366_v54, %v1392_v24  ;;  %v7058_v9 = vsel %vm460_vm0, %v6850_v25, %v6466_v61  ;;  %v2390_v53 = vmul.u32 24, %v2389_v63  ;;  %v2413_v33 = vsel %vm2412_vm14, 1, %v5130_v1 }
 0x1f2   : > { %v9367_v29 = vrot.slane %v6410_v42, 5  ;;  %v2407_v61 = vshrl.u32 %v6976_v23, 16  ;;  %v2415_v25 = vadd.s32 %v2413_v33, %v2411_v30  ;;  %v2426_v39 = vand.u32 65535, %v7041_v21 }
 0x1f3   : > { %1422 = vrot.lane.b32.xlu1 %v9364_v20, %s5129_s17  ;;  %v1241_v10 = vpop.permute.xlu2 %1240  ;;  %v1644_v48 = vsel %vm9072_vm5, %v6790_v52, %v6963_v35  ;;  %v1779_v44 = vsel %vm1759_vm10, %v1728_v55, %v6871_v41  ;;  %v2427_v47 = vshrl.u32 %v7041_v21, 16  ;;  %v7089_v23 = vor.u32 %v1090_v3, %v1087_v22  ;;  %v7093_v52 = vld [vmem:[%s5219_s9 + $0xd8] sm:$0xff]   ;;  %v9370_v20 = vld [vmem:[#allocation88_spill] sm:$0xff] }
 0x1f4   : > { %1432 = vrot.lane.b32.xlu0 %v9365_v36, %s5129_s17  ;;  %v7069_v58 = vsel %vm729_vm1, %v1186_v18, %v9367_v29  ;;  %v2391_v18 = vsub.s32 %v6880_v14, %v2390_v53  ;;  %v9071_v45 = vrot.slane %v6967_v50, 5  ;;  %v2416_v63 = vadd.s32 %v2415_v25, %v2405_v5  ;;  %v9368_v5 = vld [vmem:[#allocation89_spill] sm:$0xff] }
 0x1f5   : > { %v1233_v28 = vpop.permute.xlu1 %1232  ;;  %v7095_v35 = vmul.u32 43690, %v2426_v39  ;;  %v9369_v7 = vunpack.c.l.b16 %v9368_v5  ;;  %v2429_v30 = vmul.u32 43691, %v2426_v39  ;;  %v7111_v36 = vunpack.c.l.b16 %v7093_v52 }
 0x1f6   : > { %v1289_v42 = vpop.permute.xlu0 %1288  ;;  %v1687_v41 = vsel %vm1657_vm7, %v6932_v62, %v1233_v28  ;;  %vm3729_vm6 = vcmp.ne.s32.totalorder %v2391_v18, 0  ;;  %vm3777_vm13 = vcmp.lt.s32.totalorder %v2391_v18, 0  ;;  %v3873_v14 = vadd.s32 24, %v2391_v18 }
 0x1f7   : > { %v1738_v55 = vsel %vm1708_vm8, %v1687_v41, %v1289_v42  ;;  %vm3825_vm14 = vmand %vm3777_vm13, %vm3729_vm6  ;;  %v7108_v22 = vpack.c.b16 %v9370_v20, %v9369_v7  ;;  %v2417_v3 = vadd.s32 %v2416_v63, %v2407_v61  ;;  %v7113_v54 = vmul.u32 43691, %v2427_v47 }
 0x1f8   : > { %v3921_v62 = vsel %vm3825_vm14, %v3873_v14, %v2391_v18  ;;  %v2433_v53 = vshll.u32 %v7095_v35, 16  ;;  %v7117_v33 = vsel %vm1657_vm7, %v1644_v48, %v1241_v10  ;;  %v7126_v28 = vsel %vm460_vm0, %v6896_v0, %v7089_v23  ;;  %v4979_v48 = vld [vmem:[%s5219_s9 + $0x1c] sm:$0xf] }
 0x1f9   : > { %1246 = vrot.lane.b32.xlu2 %v6948_v13, %s5126_s14  ;;  %vm7128_vm6 = vcmp.lt.s32.totalorder %v3921_v62, 16  ;;  %v2418_v61 = vshrl.u32 %v2417_v3, 4  ;;  %v1789_v10 = vsel %vm1759_vm10, %v1738_v55, %v6915_v34  ;;  %v7144_v0 = vsel %vm729_vm1, %v1196_v59, %v9071_v45 }
 0x1fa   : > { %vm4521_vm13 = vmpackc.low %vm7128_vm6, %vm7128_vm6  ;;  %v7148_v25 = vadd.s32 96, %v6802_v37  ;;  %v2432_v18 = vmul.u32 43690, %v2427_v47  ;;  %vm2437_vm14 = vc.u32 %v2429_v30, %v2433_v53  ;;  %v7156_v40 = vpack.c.b16 %v7111_v36, %v9370_v20  ;;  %v7166_v20 = vld [vmem:[%s5219_s9 + $0xe0] sm:$0xff]  }
 0x1fb   : > { %1144 = vrot.lane.b32.xlu1 %v6939_v57, %s5125_s13  ;;  %v7121_v13 = vpop.permute.xlu2 %1296  ;;  %v1094_v57 = vshrl.u32 %v7108_v22, 16  ;;  %v4569_v42 = vsel %vm4521_vm13, %v4979_v48, 0  ;;  %v2419_v34 = vmul.u32 24, %v2418_v61  ;;  %v1097_v59 = vshll.u32 %v7108_v22, 16 }
 0x1fc   : > { %1302 = vrot.lane.b32.xlu0 %v6967_v50, %s5127_s15  ;;  %4617 = vst.msk [vmem:[%s7015_s26 + $0x4] sm:$0xf] %vm4160_vm15, %v4569_v42  ;;  %v2435_v14 = vshll.u32 %v7113_v54, 16  ;;  %v2438_v61 = vsel %vm2437_vm14, 1, %v5130_v1 }
 0x1fd   : > { %v1419_v39 = vpop.permute.xlu1 %1418  ;;  %v2420_v47 = vsub.s32 %v6919_v6, %v2419_v34  ;;  %v1096_v62 = vrot.slane %v1094_v57, 4  ;;  %v1099_v34 = vrot.slane %v1097_v59, 5  ;;  %v2434_v59 = vshrl.u32 %v7095_v35, 16 }
 0x1fe   : > { %v1830_v63 = vsel %vm1810_vm9, %v1779_v44, %v1419_v39  ;;  %v1429_v41 = vpop.permute.xlu0 %1428 }
 0x1ff   : > { %v1938_v55 = vshrl.u32 %v1830_v63, 16  ;;  %v1941_v5 = vshll.u32 %v1830_v63, 16  ;;  %v1840_v7 = vsel %vm1810_vm9, %v1789_v10, %v1429_v41  ;;  %vm3730_vm13 = vcmp.ne.s32.totalorder %v2420_v47, 0 }
 0x200   : > { %v1978_v3 = vshrl.u32 %v1840_v7, 16  ;;  %v1981_v44 = vshll.u32 %v1840_v7, 16  ;;  %vm3778_vm4 = vcmp.lt.s32.totalorder %v2420_v47, 0  ;;  %v3874_v6 = vadd.s32 24, %v2420_v47 }
 0x201   : > { %v1940_v39 = vrot.slane %v1938_v55, 3  ;;  %v1943_v48 = vrot.slane %v1941_v5, 4  ;;  %1442 = vrot.lane.b32.xlu2 %v7053_v4, %s5129_s17  ;;  %vm7168_vm2 = vmand %vm3778_vm4, %vm3730_vm13  ;;  %v2439_v55 = vadd.s32 %v2433_v53, %v2429_v30  ;;  %v2440_v4 = vadd.s32 %v2438_v61, %v2432_v18 }
 0x202   : > { %v1980_v42 = vrot.slane %v1978_v3, 3  ;;  %v1983_v63 = vrot.slane %v1981_v44, 4  ;;  %v4897_v5 = vunpack.c.h.b16 %v7093_v52  ;;  %v3922_v3 = vsel %vm7168_vm2, %v3874_v6, %v2420_v47 }
 0x203   : > { %v7172_v57 = vor.u32 %v1943_v48, %v1940_v39  ;;  %1381 = vrot.lane.b32.xlu1 %v6998_v2, %s5128_s16  ;;  %v1376_v41 = vpop.permute.xlu2 %1375  ;;  %v7185_v44 = vunpack.c.l.b16 %v7166_v20  ;;  %vm7190_vm4 = vcmp.lt.s32.totalorder %v3922_v3, 16  ;;  %vm2441_vm14 = vc.u32 %v2439_v55, %v2435_v14  ;;  %v4980_v14 = vld [vmem:[%s5219_s9 + $0x20] sm:$0xf] }
 0x204   : > { %v7177_v7 = vor.u32 %v1983_v63, %v1980_v42  ;;  %1136 = vrot.lane.b32.xlu0 %v7058_v9, %s5125_s13  ;;  %v1322_v9 = vshrl.u32 %v7156_v40, 16  ;;  %vm4522_vm2 = vmpackc.low %vm7190_vm4, %vm7190_vm4  ;;  %v2442_v47 = vsel %vm2441_vm14, 1, %v5130_v1  ;;  %v7209_v48 = vor.u32 %v1099_v34, %v1096_v62  ;;  %v9377_v62 = vld [vmem:[#allocation28_spill] sm:$0xff] }
 0x205   : > { %v1215_v2 = vpop.permute.xlu1 %1214  ;;  %v1945_v30 = vsel %vm1866_vm11, %v6833_v49, %v7172_v57  ;;  %v9070_v49 = vrot.slane %v7156_v40, 5  ;;  %v7205_v61 = vpack.c.b16 %v7185_v44, %v4897_v5  ;;  %v4570_v39 = vsel %vm4522_vm2, %v4980_v14, 0 }
 0x206   : > { %4866 = vmatmul.msk.bf16.gmra.mxu1 %vm2081_vm12, %v1945_v30  ;;  %v1141_v18 = vpop.permute.xlu0 %1140  ;;  %v1985_v35 = vsel %vm1866_vm11, %v6912_v51, %v7177_v7  ;;  %v2436_v42 = vshrl.u32 %v7113_v54, 16  ;;  %v2444_v51 = vadd.s32 %v2442_v47, %v2440_v4  ;;  %4618 = vst.msk [vmem:[%s7015_s26 + $0x8] sm:$0xf] %vm4160_vm15, %v4570_v39  ;;  %v1325_v63 = vshll.u32 %v7156_v40, 16 }
 0x207   : > { %4871 = vmatmul.msk.bf16.gmra.mxu2 %vm2081_vm12, %v1985_v35  ;;  %v1331_v10 = vshrl.u32 %v7205_v61, 16  ;;  %v1334_v6 = vshll.u32 %v7205_v61, 16  ;;  %v2687_v55 = vand.u32 65535, %v7148_v25  ;;  %v1746_v5 = vsel %vm1708_vm8, %v7117_v33, %v7121_v13 }
 0x208   : > { %v2445_v34 = vadd.s32 %v2444_v51, %v2434_v59  ;;  %v1324_v54 = vrot.slane %v1322_v9, 4  ;;  %v2688_v4 = vshrl.u32 %v7148_v25, 16  ;;  %v7229_v3 = vsel %vm729_vm1, %v1392_v24, %v9070_v49 }
 0x209   : > { %1294 = vrot.lane.b32.xlu2 %v9377_v62, %s5127_s15  ;;  %v1327_v30 = vrot.slane %v1325_v63, 5  ;;  %v1333_v35 = vrot.slane %v1331_v10, 4  ;;  %v1336_v47 = vrot.slane %v1334_v6, 5  ;;  %v7238_v59 = vsel %vm460_vm0, %v7089_v23, %v7209_v48 }
 0x20a   : > { %v2446_v9 = vadd.s32 %v2445_v34, %v2436_v42  ;;  %v2691_v14 = vmul.u32 43690, %v2687_v55  ;;  %v7240_v38 = vmul.u32 43691, %v2688_v4  ;;  %v7243_v24 = vsel %vm1759_vm10, %v1746_v5, %v1376_v41  ;;  %v9379_v34 = vld [vmem:[#allocation21_spill] sm:$0xff] }
 0x20b   : > { %1238 = vrot.lane.b32.xlu1 %v7069_v58, %s5126_s14  ;;  %v2167_v33 = vpop.f32.mrf.mxu0  ;;  %v7233_v13 = vpop.permute.xlu2 %1438  ;;  %v9378_v58 = vld [vmem:[#allocation52_spill] sm:$0xff]  ;;  %v2690_v51 = vmul.u32 43691, %v2687_v55  ;;  %v7250_v63 = vadd.s32 104, %v6802_v37  ;;  %v1328_v6 = vor.u32 %v1327_v30, %v1324_v54  ;;  %v7252_v62 = vor.u32 %v1336_v47, %v1333_v35 }
 0x20c   : > { %v4112_v39 = vsel %vm7017_vm3, %v2167_v33, 0.0  ;;  %1373 = vrot.lane.b32.xlu0 %v9378_v58, %s5128_s16  ;;  %v2447_v42 = vshrl.u32 %v2446_v9, 4  ;;  %v1669_v41 = vsel %vm1657_vm7, %v9379_v34, %v1215_v2  ;;  %v2693_v49 = vmul.u32 43690, %v2688_v4 }
 0x20d   : > { %v4167_v23 = vpack.c.bf16 %v4112_v39, %v4112_v39  ;;  %v1271_v10 = vpop.permute.xlu1 %1270  ;;  %v4370_v5 = vmul.f32 %v4112_v39, %v4112_v39  ;;  %v2694_v33 = vshll.u32 %v2691_v14, 16  ;;  %v1646_v58 = vsel %vm9072_vm5, %v6865_v32, %v1141_v18 }
 0x20e   : > { %v1243_v15 = vpop.permute.xlu0 %1242  ;;  %v2448_v55 = vmul.u32 24, %v2447_v42  ;;  %v2696_v45 = vshll.u32 %v7240_v38, 16  ;;  %v7262_v9 = vadd.s32 32, %v6802_v37  ;;  %vm9380_vm3 = vcmask 31744  }
 0x20f   : > { %4215 = vst.msk [vmem:[%s6983_s25 + $0x18] sm:$0xf] %vm4160_vm15, %v4167_v23  ;;  %v4267_v54 = vsel %vm9380_vm3, %v4112_v39, 0.0  ;;  %vm2698_vm13 = vc.u32 %v2690_v51, %v2694_v33  ;;  %v2700_v30 = vadd.s32 %v2694_v33, %v2690_v51  ;;  %v2716_v2 = vand.u32 65535, %v7250_v63  ;;  %vm9381_vm14 = vmmov %vm9380_vm3  ;;  %v9382_v51 = vld [vmem:[#allocation68_spill] sm:$0xff] }
 0x210   : > { %v1720_v4 = vsel %vm1708_vm8, %v1669_v41, %v1271_v10  ;;  %v2449_v32 = vsub.s32 %v7041_v21, %v2448_v55  ;;  %v7272_v18 = vsel %vm460_vm0, %v1328_v6, %v7252_v62  ;;  %v2699_v35 = vsel %vm2698_vm13, 1, %v5130_v1 }
 0x211   : > { %1146 = vrot.lane.b32.xlu2 %v7126_v28, %s5125_s13  ;;  %v4418_v47 = vsel %vm9381_vm14, %v4370_v5, 0.0  ;;  %v2695_v39 = vshrl.u32 %v2691_v14, 16  ;;  %v2701_v23 = vadd.s32 %v2699_v35, %v2693_v49  ;;  %vm2702_vm2 = vc.u32 %v2700_v30, %v2696_v45 }
 0x212   : > { %vm3731_vm3 = vcmp.ne.s32.totalorder %v2449_v32, 0  ;;  %vm3779_vm5 = vcmp.lt.s32.totalorder %v2449_v32, 0  ;;  %v3875_v21 = vadd.s32 24, %v2449_v32  ;;  %v2703_v28 = vsel %vm2702_vm2, 1, %v5130_v1 }
 0x213   : > { %1434 = vrot.lane.b32.xlu1 %v9382_v51, %s5129_s17  ;;  %v2169_v10 = vpop.f32.mrf.mxu0  ;;  %v7278_v42 = vpop.permute.xlu2 %1132  ;;  %vm3827_vm13 = vmand %vm3779_vm5, %vm3731_vm3  ;;  %v2697_v45 = vshrl.u32 %v7240_v38, 16  ;;  %v2705_v49 = vadd.s32 %v2703_v28, %v2701_v23  ;;  %v2717_v14 = vshrl.u32 %v7250_v63, 16  ;;  %v1154_v38 = vpack.c.b16 %v7111_v36, %v7111_v36  ;;  %v4981_v28 = vld [vmem:[%s5219_s9 + $0x24] sm:$0xf] }
 0x214   : > { %v4113_v34 = vsel %vm7128_vm6, %v2169_v10, 0.0  ;;  %1248 = vrot.lane.b32.xlu0 %v7144_v0, %s5126_s14  ;;  %v3923_v30 = vsel %vm3827_vm13, %v3875_v21, %v2449_v32  ;;  %vm9385_vm5 = vmmov %vm9381_vm14  ;;  %v2719_v32 = vmul.u32 43691, %v2716_v2  ;;  %v7302_v10 = vmul.u32 43690, %v2716_v2 }
 0x215   : > { %v4168_v41 = vpack.c.bf16 %v4113_v34, %v4113_v34  ;;  %v4268_v5 = vsel %vm9381_vm14, %v4113_v34, 0.0  ;;  %v4371_v33 = vmul.f32 %v4113_v34, %v4113_v34  ;;  %v1350_v55 = vpop.permute.xlu1 %1349  ;;  %vm7288_vm6 = vcmp.lt.s32.totalorder %v3923_v30, 16  ;;  %vm9386_vm3 = vmmov %vm9385_vm5 }
 0x216   : > { %v4269_v35 = vadd.f32 %v4268_v5, %v4267_v54  ;;  %v1299_v29 = vpop.permute.xlu0 %1298  ;;  %v2706_v0 = vadd.s32 %v2705_v49, %v2695_v39  ;;  %vm4523_vm2 = vmpackc.low %vm7288_vm6, %vm7288_vm6  ;;  %v1329_v54 = vsel %vm460_vm0, %v6950_v56, %v1328_v6  ;;  %v7305_v49 = vmul.u32 43691, %v2717_v14 }
 0x217   : > { %4216 = vst.msk [vmem:[%s6983_s25 + $0x1c] sm:$0xf] %vm4160_vm15, %v4168_v41  ;;  %v4419_v23 = vsel %vm9385_vm5, %v4371_v33, 0.0  ;;  %v4571_v39 = vsel %vm4523_vm2, %v4981_v28, 0  ;;  %v1697_v36 = vsel %vm1657_vm7, %v1646_v58, %v1243_v15  ;;  %v1200_v41 = vrot.slane %v7108_v22, 5  ;;  %vm9389_vm13 = vmmov %vm9386_vm3 }
 0x218   : > { %v4420_v21 = vadd.f32 %v4419_v23, %v4418_v47  ;;  %v2707_v34 = vadd.s32 %v2706_v0, %v2697_v45  ;;  %4619 = vst.msk [vmem:[%s7015_s26 + $0xc] sm:$0xf] %vm4160_vm15, %v4571_v39  ;;  %v2722_v5 = vmul.u32 43690, %v2717_v14  ;;  %v2723_v56 = vshll.u32 %v7302_v10, 16 }
 0x219   : > { %1383 = vrot.lane.b32.xlu2 %v1329_v54, %s5128_s16  ;;  %v1771_v6 = vsel %vm1759_vm10, %v1720_v4, %v1350_v55  ;;  %v7314_v47 = vrot.slane %v1154_v38, 5  ;;  %v2725_v45 = vshll.u32 %v7305_v49, 16  ;;  %v1748_v33 = vsel %vm1708_vm8, %v1697_v36, %v1299_v29 }
 0x21a   : > { %v2708_v2 = vshrl.u32 %v2707_v34, 4  ;;  %v2724_v30 = vshrl.u32 %v7302_v10, 16  ;;  %vm2727_vm0 = vc.u32 %v2719_v32, %v2723_v56  ;;  %v2729_v14 = vadd.s32 %v2723_v56, %v2719_v32 }
 0x21b   : > { %1304 = vrot.lane.b32.xlu1 %v7108_v22, %s5127_s15  ;;  %v2172_v15 = vpop.f32.mrf.mxu0  ;;  %v7320_v58 = vpop.permute.xlu2 %1359  ;;  %v2728_v29 = vsel %vm2727_vm0, 1, %v5130_v1  ;;  %v4901_v0 = vunpack.c.h.b16 %v7166_v20  ;;  %vm9392_vm0 = vmmov %vm9386_vm3 }
 0x21c   : > { %v4114_v4 = vsel %vm7190_vm4, %v2172_v15, 0.0  ;;  %1444 = vrot.lane.b32.xlu0 %v7229_v3, %s5129_s17  ;;  %v2709_v55 = vmul.u32 24, %v2708_v2  ;;  %v2730_v39 = vadd.s32 %v2728_v29, %v2722_v5  ;;  %vm7332_vm4 = vc.u32 %v2729_v14, %v2725_v45 }
 0x21d   : > { %v4169_v38 = vpack.c.bf16 %v4114_v4, %v4114_v4  ;;  %v4270_v23 = vsel %vm9386_vm3, %v4114_v4, 0.0  ;;  %v4372_v54 = vmul.f32 %v4114_v4, %v4114_v4  ;;  %v1411_v28 = vpop.permute.xlu1 %1410  ;;  %v2726_v29 = vshrl.u32 %v7305_v49, 16  ;;  %vm9395_vm3 = vmmov %vm9392_vm0 }
 0x21e   : > { %v4271_v34 = vadd.f32 %v4270_v23, %v4269_v35  ;;  %v1822_v32 = vsel %vm1810_vm9, %v1771_v6, %v1411_v28  ;;  %v1378_v53 = vpop.permute.xlu0 %1377  ;;  %v2710_v36 = vsub.s32 %v7148_v25, %v2709_v55  ;;  %v2456_v28 = vshrl.u32 %v7262_v9, 16 }
 0x21f   : > { %4217 = vst.msk [vmem:[%s6983_s25 + $0x20] sm:$0xf] %vm4160_vm15, %v4169_v38  ;;  %v4421_v20 = vsel %vm9389_vm13, %v4372_v54, 0.0  ;;  %v1906_v3 = vshrl.u32 %v1822_v32, 16  ;;  %v1909_v2 = vshll.u32 %v1822_v32, 16  ;;  %v1799_v15 = vsel %vm1759_vm10, %v1748_v33, %v1378_v53 }
 0x220   : > { %v4422_v4 = vadd.f32 %v4421_v20, %v4420_v21  ;;  %v1850_v35 = vsel %vm1810_vm9, %v1799_v15, %v7233_v13  ;;  %vm3740_vm14 = vcmp.ne.s32.totalorder %v2710_v36, 0  ;;  %vm3788_vm5 = vcmp.lt.s32.totalorder %v2710_v36, 0 }
 0x221   : > { %v1908_v5 = vrot.slane %v1906_v3, 3  ;;  %v1911_v25 = vrot.slane %v1909_v2, 4  ;;  %v2018_v6 = vshrl.u32 %v1850_v35, 16  ;;  %v2021_v45 = vshll.u32 %v1850_v35, 16  ;;  %vm7342_vm2 = vmand %vm3788_vm5, %vm3740_vm14 }
 0x222   : > { %v3884_v55 = vadd.s32 24, %v2710_v36  ;;  %v2732_v21 = vsel %vm7332_vm4, 1, %v5130_v1  ;;  %v2455_v33 = vand.u32 65535, %v7262_v9  ;;  %v7355_v54 = vpack.c.b16 %v4901_v0, %v4901_v0 }
 0x223   : > { %v7351_v13 = vor.u32 %v1911_v25, %v1908_v5  ;;  %v2020_v38 = vrot.slane %v2018_v6, 3  ;;  %1148 = vrot.lane.b32.xlu1 %v7238_v59, %s5125_s13  ;;  %v2174_v23 = vpop.f32.mrf.mxu0  ;;  %v2023_v32 = vrot.slane %v2021_v45, 4  ;;  %v7360_v53 = vpop.permute.xlu2 %1369  ;;  %v2734_v20 = vadd.s32 %v2732_v21, %v2730_v39  ;;  %v4982_v6 = vld [vmem:[%s5219_s9 + $0x48] sm:$0xf] }
 0x224   : > { %v4115_v49 = vsel %vm7288_vm6, %v2174_v23, 0.0  ;;  %1306 = vrot.lane.b32.xlu0 %v7093_v52, %s5127_s15  ;;  %v3932_v56 = vsel %vm7342_vm2, %v3884_v55, %v2710_v36  ;;  %v7379_v36 = vmul.u32 43690, %v2455_v33  ;;  %v2458_v55 = vmul.u32 43691, %v2455_v33 }
 0x225   : > { %v4170_v59 = vpack.c.bf16 %v4115_v49, %v4115_v49  ;;  %v4272_v0 = vsel %vm9392_vm0, %v4115_v49, 0.0  ;;  %v4373_v3 = vmul.f32 %v4115_v49, %v4115_v49  ;;  %v1437_v2 = vpop.permute.xlu1 %1436  ;;  %v1913_v51 = vsel %vm1866_vm11, %v6971_v12, %v7351_v13 }
 0x226   : > { %v7370_v15 = vadd.f32 %v4272_v0, %v4271_v34  ;;  %v1848_v35 = vsel %vm1810_vm9, %v7243_v24, %v1437_v2  ;;  %4862 = vmatmul.msk.bf16.gmra.mxu0 %vm2081_vm12, %v1913_v51  ;;  %v1123_v52 = vpop.permute.xlu0 %1122  ;;  %vm7375_vm6 = vcmp.lt.s32.totalorder %v3932_v56, 16  ;;  %v1396_v24 = vrot.slane %v7205_v61, 5 }
 0x227   : > { %4218 = vst.msk [vmem:[%s6983_s25 + $0x24] sm:$0xf] %vm4160_vm15, %v4170_v59  ;;  %v4423_v5 = vsel %vm9395_vm3, %v4373_v3, 0.0  ;;  %v2010_v12 = vshrl.u32 %v1848_v35, 16  ;;  %v2013_v34 = vshll.u32 %v1848_v35, 16  ;;  %vm4532_vm4 = vmpackc.low %vm7375_vm6, %vm7375_vm6  ;;  %v2735_v14 = vadd.s32 %v2734_v20, %v2724_v30 }
 0x228   : > { %v7388_v25 = vadd.f32 %v4423_v5, %v4422_v4  ;;  %v4580_v45 = vsel %vm4532_vm4, %v4982_v6, 0  ;;  %v1398_v49 = vrot.slane %v7355_v54, 5  ;;  %v2460_v56 = vmul.u32 43691, %v2456_v28 }
 0x229   : > { %v2012_v21 = vrot.slane %v2010_v12, 3  ;;  %v2015_v23 = vrot.slane %v2013_v34, 4  ;;  %4628 = vst.msk [vmem:[%s7015_s26 + $0x30] sm:$0xf] %vm4160_vm15, %v4580_v45  ;;  %v7396_v59 = vor.u32 %v2023_v32, %v2020_v38  ;;  %v2736_v0 = vadd.s32 %v2735_v14, %v2726_v29  ;;  %v9397_v29 = vld [vmem:[#allocation19_spill] sm:$0xff] }
 0x22a   : > { %v2462_v61 = vshll.u32 %v7379_v36, 16  ;;  %v9396_v4 = vrot.slane %v6967_v50, 5  ;;  %v2461_v33 = vmul.u32 43690, %v2456_v28  ;;  %v2464_v20 = vshll.u32 %v2460_v56, 16 }
 0x22b   : > { %v7404_v30 = vor.u32 %v2015_v23, %v2012_v21  ;;  %1385 = vrot.lane.b32.xlu1 %v7272_v18, %s5128_s16  ;;  %v7410_v38 = vadd.s32 40, %v6802_v37  ;;  %vm9398_vm13 = vcmask 97280   ;;  %v2737_v32 = vshrl.u32 %v2736_v0, 4  ;;  %v7431_v35 = vpop.permute.xlu2 %1244 }
 0x22c   : > { %v1201_v10 = vsel %vm729_vm1, %v9396_v4, %v1200_v41  ;;  %v7415_v54 = vsel %vm9398_vm13, %v6747_v31, %v9397_v29  ;;  %1150 = vrot.lane.b32.xlu0 %v7209_v48, %s5125_s13  ;;  %v2197_v50 = vpop.f32.mrf.mxu1  ;;  %vm2466_vm14 = vc.u32 %v2458_v55, %v2462_v61  ;;  %v2468_v3 = vadd.s32 %v2462_v61, %v2458_v55  ;;  %v9402_v4 = vld [vmem:[#allocation29_spill] sm:$0xff]  ;;  %s8870_s13 = sand.u32 1, %s5112_s19  }
 0x22d   : > { %1250 = vrot.lane.b32.xlu2 %v1201_v10, %s5126_s14  ;;  %v1225_v18 = vpop.permute.xlu1 %1224  ;;  %v2025_v28 = vsel %vm1866_vm11, %v7404_v30, %v7396_v59  ;;  %v7424_v2 = vsel %vm7375_vm6, %v2197_v50, 0.0  ;;  %v2467_v31 = vsel %vm2466_vm14, 1, %v5130_v1  ;;  %v2484_v51 = vand.u32 65535, %v7410_v38  ;;  %s227_s8 = scalar_lea.vmem [#allocation2], %s8870_s13  ;;  %s233_s12 = scalar_lea.vmem [#allocation4], %s8870_s13 }
 0x22e   : > { %vm9399_vm5 = vcmask 130048   ;;  %4876 = vmatmul.msk.bf16.vlgmr.msra.gmra.mxu3 %vm2081_vm12, %v2025_v28  ;;  %v4179_v5 = vpack.c.bf16 %v7424_v2, %v7424_v2  ;;  %v1281_v12 = vpop.permute.xlu0 %1280  ;;  %v1203_v39 = vsel %vm729_vm1, %v1200_v41, %v7314_v47  ;;  %v1399_v34 = vsel %vm729_vm1, %v1396_v24, %v1398_v49  ;;  %s8881_s10 = sshll.u32 %s227_s8, 4  ;;  %s8886_s23 = sshll.u32 %s233_s12, 4  ;;  %s4693_s10 = int_to_ptr.vmem [resolvable:$true] %s8881_s10  ;;  %s4706_s23 = int_to_ptr.vmem [resolvable:$true] %s8886_s23 }
 0x22f   : > { %v1638_v48 = vsel %vm9399_vm5, %v6777_v27, %v7278_v42  ;;  %v2738_v6 = vmul.u32 24, %v2737_v32  ;;  %v2463_v45 = vshrl.u32 %v7379_v36, 16  ;;  %v2469_v14 = vadd.s32 %v2467_v31, %v2461_v33  ;;  %vm9400_vm0 = vmmov %vm9399_vm5 }
 0x230   : > { %vm2470_vm2 = vc.u32 %v2468_v3, %v2464_v20  ;;  %v1628_v27 = vsel %vm9400_vm0, %v6794_v46, %v1123_v52  ;;  %4227 = vst.msk [vmem:[%s6983_s25 + $0x48] sm:$0xf] %vm4160_vm15, %v4179_v5  ;;  %v2465_v42 = vshrl.u32 %v2460_v56, 16  ;;  %v2485_v21 = vshrl.u32 %v7410_v38, 16 }
 0x231   : > { %v2471_v55 = vsel %vm2470_vm2, 1, %v5130_v1  ;;  %v2739_v22 = vsub.s32 %v7250_v63, %v2738_v6  ;;  %v7449_v47 = vmul.u32 43690, %v2484_v51  ;;  %v7452_v23 = vadd.s32 112, %v6802_v37  ;;  %v4983_v6 = vld [vmem:[%s5219_s9 + $0x4c] sm:$0xf] }
 0x232   : > { %v2473_v41 = vadd.s32 %v2471_v55, %v2469_v14  ;;  %v1679_v36 = vsel %vm1657_vm7, %v1628_v27, %v1225_v18  ;;  %v2487_v49 = vmul.u32 43691, %v2484_v51  ;;  %v7455_v0 = vmul.u32 43691, %v2485_v21 }
 0x233   : > { %v9401_v46 = vrot.slane %v7156_v40, 5  ;;  %1252 = vrot.lane.b32.xlu1 %v1203_v39, %s5126_s14  ;;  %vm3741_vm6 = vcmp.ne.s32.totalorder %v2739_v22, 0  ;;  %vm3789_vm3 = vcmp.lt.s32.totalorder %v2739_v22, 0  ;;  %v3885_v63 = vadd.s32 24, %v2739_v22  ;;  %s5046_s14 = scalar_lea.hbm %s8944_s3, 2 }
 0x234   : > { %v2474_v56 = vadd.s32 %v2473_v41, %v2463_v45  ;;  %v1730_v61 = vsel %vm1708_vm8, %v1679_v36, %v1281_v12  ;;  %v1921_v10 = vsel %vm1866_vm11, %v7351_v13, %v9402_v4  ;;  %1387 = vrot.lane.b32.xlu0 %v7252_v62, %s5128_s16  ;;  %v2199_v40 = vpop.f32.mrf.mxu1  ;;  %vm3837_vm4 = vmand %vm3789_vm3, %vm3741_vm6  ;;  %v2491_v33 = vshll.u32 %v7449_v47, 16  ;;  %v7479_v12 = vpop.permute.xlu2 %1440 }
 0x235   : > { %v1397_v52 = vsel %vm729_vm1, %v9401_v46, %v1396_v24  ;;  %v2490_v24 = vmul.u32 43690, %v2485_v21  ;;  %v1235_v20 = vpop.permute.xlu1 %1234  ;;  %v3933_v29 = vsel %vm3837_vm4, %v3885_v63, %v2739_v22  ;;  %v2493_v32 = vshll.u32 %v7455_v0, 16 }
 0x236   : > { %1446 = vrot.lane.b32.xlu2 %v1397_v52, %s5129_s17  ;;  %v2475_v50 = vadd.s32 %v2474_v56, %v2465_v42  ;;  %v1259_v3 = vpack.c.b16 %v7185_v44, %v7185_v44  ;;  %4863 = vmatmul.msk.bf16.gmra.mxu0 %vm2081_vm12, %v1921_v10  ;;  %vm3981_vm1 = vcmp.lt.s32.totalorder %v3933_v29, 16  ;;  %v1291_v13 = vpop.permute.xlu0 %1290  ;;  %vm2495_vm13 = vc.u32 %v2487_v49, %v2491_v33 }
 0x237   : > { %v2497_v62 = vadd.s32 %v2491_v33, %v2487_v49  ;;  %v2745_v18 = vand.u32 65535, %v7452_v23  ;;  %v7474_v28 = vsel %vm3981_vm1, %v2199_v40, 0.0  ;;  %vm4533_vm14 = vmpackc.low %vm3981_vm1, %vm3981_vm1  ;;  %v2496_v51 = vsel %vm2495_vm13, 1, %v5130_v1 }
 0x238   : > { %v2476_v31 = vshrl.u32 %v2475_v50, 4  ;;  %v2746_v5 = vshrl.u32 %v7452_v23, 16  ;;  %v1689_v44 = vsel %vm1657_vm7, %v1638_v48, %v1235_v20  ;;  %v4180_v39 = vpack.c.bf16 %v7474_v28, %v7474_v28 }
 0x239   : > { %v4581_v45 = vsel %vm4533_vm14, %v4983_v6, 0  ;;  %v2492_v14 = vshrl.u32 %v7449_v47, 16  ;;  %v1740_v27 = vsel %vm1708_vm8, %v1689_v44, %v1291_v13  ;;  %v2498_v55 = vadd.s32 %v2496_v51, %v2490_v24 }
 0x23a   : > { %4629 = vst.msk [vmem:[%s7015_s26 + $0x34] sm:$0xf] %vm4160_vm15, %v4581_v45  ;;  %v2477_v42 = vmul.u32 24, %v2476_v31  ;;  %vm2499_vm5 = vc.u32 %v2497_v62, %v2493_v32  ;;  %v1781_v48 = vsel %vm1759_vm10, %v1730_v61, %v7320_v58  ;;  %v2748_v22 = vmul.u32 43691, %v2745_v18 }
 0x23b   : > { %4228 = vst.msk [vmem:[%s6983_s25 + $0x4c] sm:$0xf] %vm4160_vm15, %v4180_v39  ;;  %v2500_v21 = vsel %vm2499_vm5, 1, %v5130_v1  ;;  %v7493_v41 = vmul.u32 43690, %v2745_v18  ;;  %1448 = vrot.lane.b32.xlu1 %v1399_v34, %s5129_s17  ;;  %v2494_v36 = vshrl.u32 %v7455_v0, 16  ;;  %v7499_v46 = vmul.u32 43691, %v2746_v5  ;;  %v2177_v4 = vpop.f32.mrf.mxu0 }
 0x23c   : > { %v2478_v47 = vsub.s32 %v7262_v9, %v2477_v42  ;;  %v2502_v49 = vadd.s32 %v2500_v21, %v2498_v55  ;;  %v1791_v52 = vsel %vm1759_vm10, %v1740_v27, %v7360_v53  ;;  %v2751_v58 = vmul.u32 43690, %v2746_v5  ;;  %v4984_v39 = vld [vmem:[%s5219_s9 + $0x28] sm:$0xf]  ;;  %v7514_v45 = vpop.permute.xlu2 %1134 }
 0x23d   : > { %v2752_v63 = vshll.u32 %v7493_v41, 16  ;;  %v2753_v56 = vshrl.u32 %v7493_v41, 16  ;;  %v1421_v61 = vpop.permute.xlu1 %1420  ;;  %v2754_v40 = vshll.u32 %v7499_v46, 16  ;;  %v7508_v53 = vadd.s32 120, %v6802_v37 }
 0x23e   : > { %1308 = vrot.lane.b32.xlu2 %v1259_v3, %s5127_s15  ;;  %vm3732_vm2 = vcmp.ne.s32.totalorder %v2478_v47, 0  ;;  %vm3780_vm0 = vcmp.lt.s32.totalorder %v2478_v47, 0  ;;  %v3876_v34 = vadd.s32 24, %v2478_v47  ;;  %v2503_v9 = vadd.s32 %v2502_v49, %v2492_v14  ;;  %v1431_v10 = vpop.permute.xlu0 %1430  ;;  %s4690_s15 = scalar_lea.hbm %s8944_s3, %s5182_s22  ;;  %s4670_s22 = scalar_lea.sflag [#allocation3], %s8870_s13 }
 0x23f   : > { %vm3828_vm6 = vmand %vm3780_vm0, %vm3732_vm2  ;;  %v1832_v0 = vsel %vm1810_vm9, %v1781_v48, %v1421_v61  ;;  %vm2756_vm3 = vc.u32 %v2748_v22, %v2752_v63  ;;  %v1842_v29 = vsel %vm1810_vm9, %v1791_v52, %v1431_v10  ;;  %vm9403_vm13 = vcmask 31744   ;;  %s8883_s11 = sshll.u32 %s4690_s15, 4  ;;  %s4695_s11 = int_to_ptr.hbm [resolvable:$true] %s8883_s11 }
 0x240   : > { %v3924_v24 = vsel %vm3828_vm6, %v3876_v34, %v2478_v47  ;;  %v1946_v33 = vshrl.u32 %v1832_v0, 16  ;;  %v1949_v20 = vshll.u32 %v1832_v0, 16  ;;  %v1986_v50 = vshrl.u32 %v1842_v29, 16  ;;  %vm9404_vm14 = vmmov %vm9403_vm13  ;;  %v9408_v0 = vld [vmem:[#allocation13_spill] sm:$0xff]  ;;  %s5040_s30 = sshra.s32 %s4695_s11, 4  ;;  %s5041_s30 = int_to_ptr.hbm [resolvable:$true] %s5040_s30 }
 0x241   : > { %vm3972_vm4 = vcmp.lt.s32.totalorder %v3924_v24, 16  ;;  %v1989_v32 = vshll.u32 %v1842_v29, 16  ;;  %v2504_v3 = vadd.s32 %v2503_v9, %v2494_v36  ;;  %v2757_v31 = vsel %vm2756_vm3, 1, %v5130_v1  ;;  %s5042_s6 = scalar_lea.hbm %s5041_s30, 1  ;;  %p5047_p0 = scmp.lt.s32.totalorder %s5041_s30, %s8944_s3 }
 0x242   : > { %v4116_v13 = vsel %vm3972_vm4, %v2177_v4, 0.0  ;;  %vm4524_vm1 = vmpackc.low %vm3972_vm4, %vm3972_vm4  ;;  %v1948_v62 = vrot.slane %v1946_v33, 3  ;;  %v1951_v18 = vrot.slane %v1949_v20, 4  ;;  %v1988_v42 = vrot.slane %v1986_v50, 3  ;;  %p5043_p11 = scmp.ne.s32.totalorder %s5041_s30, %s5042_s6  ;;  %p5048_p1 = scmp.lt.s32.totalorder %s5046_s14, %s5042_s6 }
 0x243   : > { %v4171_v51 = vpack.c.bf16 %v4116_v13, %v4116_v13  ;;  %v4274_v5 = vsel %vm9403_vm13, %v4116_v13, 0.0  ;;  %v4374_v44 = vmul.f32 %v4116_v13, %v4116_v13  ;;  %v4572_v6 = vsel %vm4524_vm1, %v4984_v39, 0 }
 0x244   : > { %v7517_v14 = vadd.f32 %v4274_v5, %v7370_v15  ;;  %4620 = vst.msk [vmem:[%s7015_s26 + $0x10] sm:$0xf] %vm4160_vm15, %v4572_v6  ;;  %v7521_v27 = vor.u32 %v1951_v18, %v1948_v62  ;;  %v1991_v55 = vrot.slane %v1989_v32, 4  ;;  %v2505_v21 = vshrl.u32 %v2504_v3, 4  ;;  %v2179_v32 = vpop.f32.mrf.mxu0  ;;  %v7572_v18 = vpop.permute.xlu2 %1361  ;;  %p5044_p12 = pnand %p5043_p11, %p5199_p5  ;;  %p5049_p2 = por %p5048_p1, %p5047_p0 }
 0x245   : > { %4219 = vst.msk [vmem:[%s6983_s25 + $0x28] sm:$0xf] %vm4160_vm15, %v4171_v51  ;;  %v4425_v48 = vsel %vm9404_vm14, %v4374_v44, 0.0  ;;  %v2758_v47 = vadd.s32 %v2752_v63, %v2748_v22  ;;  %v2759_v36 = vadd.s32 %v2757_v31, %v2751_v58  ;;  %v1143_v15 = vpop.permute.xlu1 %1142  ;;  %v2774_v61 = vand.u32 65535, %v7508_v53  ;;  %v9406_v58 = vld [vmem:[#allocation26_spill] sm:$0xff] }
 0x246   : > { %v7527_v49 = vadd.f32 %v4425_v48, %v7388_v25  ;;  %v7529_v52 = vor.u32 %v1991_v55, %v1988_v42  ;;  %v1953_v34 = vsel %vm1866_vm11, %v7172_v57, %v7521_v27  ;;  %v2506_v9 = vmul.u32 24, %v2505_v21  ;;  %v1301_v22 = vpop.permute.xlu0 %1300  ;;  %p5045_p13 = pneg %p5044_p12 }
 0x247   : > { %vm9405_vm5 = vcmask 130048   ;;  %4867 = vmatmul.msk.bf16.gmra.mxu1 %vm2081_vm12, %v1953_v34  ;;  %vm2760_vm2 = vc.u32 %v2758_v47, %v2754_v40  ;;  %v2775_v25 = vshrl.u32 %v7508_v53, 16  ;;  %vm9407_vm0 = vcmask 97280   ;;  %v4985_v34 = vld [vmem:[%s5219_s9 + $0x2c] sm:$0xf] }
 0x248   : > { %v1648_v4 = vsel %vm9405_vm5, %v7415_v54, %v1143_v15  ;;  %v7542_v63 = vsel %vm9407_vm0, %v6738_v11, %v9406_v58  ;;  %vm9409_vm6 = vmmov %vm9407_vm0  ;;  %v1993_v54 = vsel %vm1866_vm11, %v7177_v7, %v7529_v52  ;;  %v2761_v10 = vsel %vm2760_vm2, 1, %v5130_v1  ;;  %p5050_p3 = pnand %p5049_p2, %p5045_p13 }
 0x249   : > { %v7547_v57 = vsel %vm9409_vm6, %v6728_v8, %v9408_v0  ;;  %v2507_v40 = vsub.s32 %v7410_v38, %v2506_v9  ;;  %4872 = vmatmul.msk.bf16.gmra.mxu2 %vm2081_vm12, %v1993_v54  ;;  %v2755_v24 = vshrl.u32 %v7499_v46, 16  ;;  %v2763_v33 = vadd.s32 %v2761_v10, %v2759_v36 }
 0x24a   : > { %v7556_v11 = vmul.u32 43690, %v2774_v61  ;;  %v1699_v20 = vsel %vm1657_vm7, %v1648_v4, %v7431_v35  ;;  %v2777_v8 = vmul.u32 43691, %v2774_v61  ;;  %v7560_v29 = vmul.u32 43691, %v2775_v25 }
 0x24b   : > { %v7563_v50 = vadd.s32 192, %v6802_v37  ;;  %vm3733_vm3 = vcmp.ne.s32.totalorder %v2507_v40, 0  ;;  %vm3781_vm4 = vcmp.lt.s32.totalorder %v2507_v40, 0  ;;  %v3877_v7 = vadd.s32 24, %v2507_v40 }
 0x24c   : > { %v2764_v38 = vadd.s32 %v2763_v33, %v2753_v56  ;;  %vm3829_vm1 = vmand %vm3781_vm4, %vm3733_vm3  ;;  %v1750_v46 = vsel %vm1708_vm8, %v1699_v20, %v1301_v22  ;;  %v2780_v3 = vmul.u32 43690, %v2775_v25  ;;  %v2781_v13 = vshll.u32 %v7556_v11, 16 }
 0x24d   : > { %v7570_v35 = vadd.s32 48, %v6802_v37  ;;  %v3925_v62 = vsel %vm3829_vm1, %v3877_v7, %v2507_v40  ;;  %v2782_v51 = vshrl.u32 %v7556_v11, 16  ;;  %v2783_v41 = vshll.u32 %v7560_v29, 16  ;;  %v1380_v5 = vpop.permute.xlu1 %1379 }
 0x24e   : > { %v2765_v31 = vadd.s32 %v2764_v38, %v2755_v24  ;;  %vm7576_vm13 = vcmp.lt.s32.totalorder %v3925_v62, 16  ;;  %vm2785_vm14 = vc.u32 %v2777_v8, %v2781_v13  ;;  %v2787_v44 = vadd.s32 %v2781_v13, %v2777_v8  ;;  %v1125_v55 = vpop.permute.xlu0 %1124  ;;  %v9414_v38 = vld [vmem:[#allocation14_spill] sm:$0xff]  ;;  %v7622_v13 = vpop.permute.xlu2 %1371 }
 0x24f   : > { %v3035_v39 = vand.u32 65535, %v7563_v50  ;;  %v4117_v6 = vsel %vm7576_vm13, %v2179_v32, 0.0  ;;  %vm4525_vm5 = vmpackc.low %vm7576_vm13, %vm7576_vm13  ;;  %v1801_v42 = vsel %vm1759_vm10, %v1750_v46, %v1380_v5  ;;  %v2786_v21 = vsel %vm2785_vm14, 1, %v5130_v1 }
 0x250   : > { %v2766_v48 = vshrl.u32 %v2765_v31, 4  ;;  %v4172_v47 = vpack.c.bf16 %v4117_v6, %v4117_v6  ;;  %vm9412_vm2 = vcmask 31744   ;;  %v4375_v15 = vmul.f32 %v4117_v6, %v4117_v6 }
 0x251   : > { %v4276_v36 = vsel %vm9412_vm2, %v4117_v6, 0.0  ;;  %v4573_v61 = vsel %vm4525_vm5, %v4985_v34, 0  ;;  %v1852_v4 = vsel %vm1810_vm9, %v1801_v42, %v7479_v12  ;;  %v3036_v25 = vshrl.u32 %v7563_v50, 16  ;;  %vm9413_vm0 = vmmov %vm9412_vm2 }
 0x252   : > { %v7591_v9 = vadd.f32 %v4276_v36, %v7517_v14  ;;  %4621 = vst.msk [vmem:[%s7015_s26 + $0x14] sm:$0xf] %vm4160_vm15, %v4573_v61  ;;  %v2767_v22 = vmul.u32 24, %v2766_v48  ;;  %v4427_v58 = vsel %vm9413_vm0, %v4375_v15, 0.0  ;;  %v2026_v0 = vshrl.u32 %v1852_v4, 16  ;;  %vm9416_vm13 = vmmov %vm9413_vm0 }
 0x253   : > { %4220 = vst.msk [vmem:[%s6983_s25 + $0x2c] sm:$0xf] %vm4160_vm15, %v4172_v47  ;;  %v2029_v54 = vshll.u32 %v1852_v4, 16  ;;  %v2788_v10 = vadd.s32 %v2786_v21, %v2780_v3  ;;  %v7602_v40 = vadd.f32 %v4427_v58, %v7527_v49  ;;  %v2784_v24 = vshrl.u32 %v7560_v29, 16  ;;  %v4986_v47 = vld [vmem:[%s5219_s9 + $0x50] sm:$0xf] }
 0x254   : > { %v2768_v14 = vsub.s32 %v7452_v23, %v2767_v22  ;;  %vm2789_vm6 = vc.u32 %v2787_v44, %v2783_v41  ;;  %v2028_v33 = vrot.slane %v2026_v0, 3  ;;  %v7607_v20 = vmul.u32 43690, %v3035_v39  ;;  %v2202_v46 = vpop.f32.mrf.mxu1 }
 0x255   : > { %v2031_v12 = vrot.slane %v2029_v54, 4  ;;  %v2790_v11 = vsel %vm2789_vm6, 1, %v5130_v1  ;;  %vm9415_vm1 = vcmask 97280   ;;  %v7616_v23 = vsel %vm9416_vm13, %v7424_v2, 0.0  ;;  %v1227_v29 = vpop.permute.xlu1 %1226 }
 0x256   : > { %vm3742_vm3 = vcmp.ne.s32.totalorder %v2768_v14, 0  ;;  %vm3790_vm4 = vcmp.lt.s32.totalorder %v2768_v14, 0  ;;  %v3886_v8 = vadd.s32 24, %v2768_v14  ;;  %v2792_v7 = vadd.s32 %v2790_v11, %v2788_v10  ;;  %v1283_v31 = vpop.permute.xlu0 %1282 }
 0x257   : > { %v7612_v49 = vsel %vm9415_vm1, %v6753_v19, %v9414_v38  ;;  %v7618_v32 = vor.u32 %v2031_v12, %v2028_v33  ;;  %vm3838_vm14 = vmand %vm3790_vm4, %vm3742_vm3  ;;  %v7620_v3 = vmul.u32 43691, %v3036_v25  ;;  %v3038_v56 = vmul.u32 43691, %v3035_v39 }
 0x258   : > { %v3934_v62 = vsel %vm3838_vm14, %v3886_v8, %v2768_v14  ;;  %v2793_v41 = vadd.s32 %v2792_v7, %v2782_v51  ;;  %v3042_v19 = vshll.u32 %v7607_v20, 16  ;;  %v4382_v5 = vmul.f32 %v7424_v2, %v7424_v2 }
 0x259   : > { %v2033_v44 = vsel %vm1866_vm11, %v7396_v59, %v7618_v32  ;;  %vm3982_vm5 = vcmp.lt.s32.totalorder %v3934_v62, 16  ;;  %v2513_v6 = vand.u32 65535, %v7570_v35  ;;  %v3041_v39 = vmul.u32 43690, %v3036_v25 }
 0x25a   : > { %4877 = vmatmul.msk.bf16.gmra.mxu3 %vm2081_vm12, %v2033_v44  ;;  %v7632_v42 = vsel %vm3982_vm5, %v2202_v46, 0.0  ;;  %vm4534_vm2 = vmpackc.low %vm3982_vm5, %vm3982_vm5  ;;  %v2794_v51 = vadd.s32 %v2793_v41, %v2784_v24  ;;  %v3044_v48 = vshll.u32 %v7620_v3, 16  ;;  %vm9417_vm0 = vcmask 130048   ;;  %v7655_v46 = vpop.permute.xlu2 %1246 }
 0x25b   : > { %v1640_v2 = vsel %vm9417_vm0, %v6860_v17, %v7514_v45  ;;  %vm9418_vm6 = vmmov %vm9417_vm0  ;;  %v4181_v21 = vpack.c.bf16 %v7632_v42, %v7632_v42  ;;  %v4582_v36 = vsel %vm4534_vm2, %v4986_v47, 0  ;;  %vm3046_vm3 = vc.u32 %v3038_v56, %v3042_v19 }
 0x25c   : > { %v1630_v59 = vsel %vm9418_vm6, %v6806_v43, %v1125_v55  ;;  %4630 = vst.msk [vmem:[%s7015_s26 + $0x38] sm:$0xf] %vm4160_vm15, %v4582_v36  ;;  %v2795_v15 = vshrl.u32 %v2794_v51, 4  ;;  %v3048_v34 = vadd.s32 %v3042_v19, %v3038_v56  ;;  %v2514_v61 = vshrl.u32 %v7570_v35, 16  ;;  %v2204_v41 = vpop.f32.mrf.mxu1 }
 0x25d   : > { %4229 = vst.msk [vmem:[%s6983_s25 + $0x50] sm:$0xf] %vm4160_vm15, %v4181_v21  ;;  %v3043_v4 = vshrl.u32 %v7607_v20, 16  ;;  %v3047_v17 = vsel %vm3046_vm3, 1, %v5130_v1  ;;  %v2516_v45 = vmul.u32 43691, %v2513_v6  ;;  %v2517_v43 = vmul.u32 43690, %v2513_v6  ;;  %v1237_v0 = vpop.permute.xlu1 %1236 }
 0x25e   : > { %v2796_v55 = vmul.u32 24, %v2795_v15  ;;  %v3049_v22 = vadd.s32 %v3047_v17, %v3041_v39  ;;  %vm3050_vm4 = vc.u32 %v3048_v34, %v3044_v48  ;;  %v2518_v25 = vmul.u32 43691, %v2514_v61  ;;  %v1293_v33 = vpop.permute.xlu0 %1292  ;;  %v4987_v15 = vld [vmem:[%s5219_s9 + $0x54] sm:$0xf] }
 0x25f   : > { %v1681_v58 = vsel %vm1657_vm7, %v1630_v59, %v1227_v29  ;;  %v3045_v54 = vshrl.u32 %v7620_v3, 16  ;;  %v3051_v10 = vsel %vm3050_vm4, 1, %v5130_v1  ;;  %v2520_v14 = vshll.u32 %v2517_v43, 16 }
 0x260   : > { %v2797_v24 = vsub.s32 %v7508_v53, %v2796_v55  ;;  %v3053_v12 = vadd.s32 %v3051_v10, %v3049_v22  ;;  %v2519_v11 = vmul.u32 43690, %v2514_v61  ;;  %v2522_v20 = vshll.u32 %v2518_v25, 16 }
 0x261   : > { %v1732_v8 = vsel %vm1708_vm8, %v1681_v58, %v1283_v31  ;;  %v2521_v7 = vshrl.u32 %v2517_v43, 16  ;;  %vm2524_vm1 = vc.u32 %v2516_v45, %v2520_v14  ;;  %v2526_v38 = vadd.s32 %v2520_v14, %v2516_v45 }
 0x262   : > { %vm3743_vm13 = vcmp.ne.s32.totalorder %v2797_v24, 0  ;;  %vm3791_vm14 = vcmp.lt.s32.totalorder %v2797_v24, 0  ;;  %v3887_v29 = vadd.s32 24, %v2797_v24  ;;  %v3054_v3 = vadd.s32 %v3053_v12, %v3043_v4 }
 0x263   : > { %v1691_v62 = vsel %vm1657_vm7, %v1640_v2, %v1237_v0  ;;  %vm3839_vm5 = vmand %vm3791_vm14, %vm3743_vm13  ;;  %v2525_v53 = vsel %vm2524_vm1, 1, %v5130_v1  ;;  %vm2528_vm2 = vc.u32 %v2526_v38, %v2522_v20  ;;  %v7660_v56 = vadd.s32 200, %v6802_v37  ;;  %v7693_v20 = vpop.permute.xlu2 %1442 }
 0x264   : > { %v3935_v31 = vsel %vm3839_vm5, %v3887_v29, %v2797_v24  ;;  %v3055_v19 = vadd.s32 %v3054_v3, %v3045_v54  ;;  %v2527_v44 = vadd.s32 %v2525_v53, %v2519_v11  ;;  %v2529_v6 = vsel %vm2528_vm2, 1, %v5130_v1 }
 0x265   : > { %vm9419_vm0 = vcmask 31744   ;;  %v4383_v39 = vmul.f32 %v7474_v28, %v7474_v28  ;;  %vm3983_vm6 = vcmp.lt.s32.totalorder %v3935_v31, 16  ;;  %v1742_v48 = vsel %vm1708_vm8, %v1691_v62, %v1293_v33 }
 0x266   : > { %v7664_v51 = vsel %vm9419_vm0, %v4382_v5, 0.0  ;;  %v7669_v2 = vsel %vm3983_vm6, %v2204_v41, 0.0  ;;  %vm4535_vm3 = vmpackc.low %vm3983_vm6, %vm3983_vm6  ;;  %v3056_v59 = vshrl.u32 %v3055_v19, 4  ;;  %v2523_v21 = vshrl.u32 %v2518_v25, 16  ;;  %v1423_v5 = vpop.permute.xlu1 %1422  ;;  %v1433_v55 = vpop.permute.xlu0 %1432 }
 0x267   : > { %v2531_v47 = vadd.s32 %v2529_v6, %v2527_v44  ;;  %v4182_v36 = vpack.c.bf16 %v7669_v2, %v7669_v2  ;;  %v4583_v34 = vsel %vm4535_vm3, %v4987_v15, 0  ;;  %v1783_v61 = vsel %vm1759_vm10, %v1732_v8, %v7572_v18  ;;  %vm9420_vm4 = vmmov %vm9419_vm0 }
 0x268   : > { %v3064_v4 = vand.u32 65535, %v7660_v56  ;;  %4631 = vst.msk [vmem:[%s7015_s26 + $0x3c] sm:$0xf] %vm4160_vm15, %v4583_v34  ;;  %v1834_v17 = vsel %vm1810_vm9, %v1783_v61, %v1423_v5  ;;  %v3057_v45 = vmul.u32 24, %v3056_v59  ;;  %v1793_v43 = vsel %vm1759_vm10, %v1742_v48, %v7622_v13  ;;  %vm9421_vm5 = vmmov %vm9419_vm0  ;;  %v4988_v34 = vld [vmem:[%s5219_s9 + $0x78] sm:$0xf] }
 0x269   : > { %v2532_v22 = vadd.s32 %v2531_v47, %v2521_v7  ;;  %4230 = vst.msk [vmem:[%s6983_s25 + $0x54] sm:$0xf] %vm4160_vm15, %v4182_v36  ;;  %v1954_v25 = vshrl.u32 %v1834_v17, 16  ;;  %v1957_v58 = vshll.u32 %v1834_v17, 16  ;;  %v1844_v0 = vsel %vm1810_vm9, %v1793_v43, %v1433_v55  ;;  %v2227_v29 = vpop.f32.mrf.mxu2 }
 0x26a   : > { %v3065_v18 = vshrl.u32 %v7660_v56, 16  ;;  %v3058_v54 = vsub.s32 %v7563_v50, %v3057_v45  ;;  %v1994_v10 = vshrl.u32 %v1844_v0, 16  ;;  %v1997_v14 = vshll.u32 %v1844_v0, 16 }
 0x26b   : > { %v2533_v24 = vadd.s32 %v2532_v22, %v2523_v21  ;;  %v7689_v33 = vsel %vm9420_vm4, %v7474_v28, 0.0  ;;  %v1956_v13 = vrot.slane %v1954_v25, 3  ;;  %v1959_v12 = vrot.slane %v1957_v58, 4 }
 0x26c   : > { %v7691_v11 = vmul.u32 43690, %v3064_v4  ;;  %vm3752_vm1 = vcmp.ne.s32.totalorder %v3058_v54, 0  ;;  %vm3800_vm13 = vcmp.lt.s32.totalorder %v3058_v54, 0  ;;  %v3896_v8 = vadd.s32 24, %v3058_v54 }
 0x26d   : > { %v1996_v7 = vrot.slane %v1994_v10, 3  ;;  %v1960_v38 = vor.u32 %v1959_v12, %v1956_v13  ;;  %vm3848_vm14 = vmand %vm3800_vm13, %vm3752_vm1  ;;  %v1999_v50 = vrot.slane %v1997_v14, 4  ;;  %v2534_v3 = vshrl.u32 %v2533_v24, 4  ;;  %v7740_v10 = vpop.permute.xlu2 %1294 }
 0x26e   : > { %v7695_v62 = vmul.u32 43691, %v3065_v18  ;;  %v7698_v28 = vsel %vm9421_vm5, %v4383_v39, 0.0  ;;  %v3944_v41 = vsel %vm3848_vm14, %v3896_v8, %v3058_v54  ;;  %v3067_v53 = vmul.u32 43691, %v3064_v4  ;;  %v1145_v6 = vpop.permute.xlu1 %1144  ;;  %v1303_v47 = vpop.permute.xlu0 %1302 }
 0x26f   : > { %v3071_v31 = vshll.u32 %v7691_v11, 16  ;;  %vm3992_vm2 = vcmp.lt.s32.totalorder %v3944_v41, 16  ;;  %v7701_v19 = vor.u32 %v1999_v50, %v1996_v7  ;;  %v2535_v44 = vmul.u32 24, %v2534_v3 }
 0x270   : > { %v1961_v48 = vsel %vm1866_vm11, %v7521_v27, %v1960_v38  ;;  %v7707_v59 = vsel %vm9419_vm0, %v7632_v42, 0.0  ;;  %v7709_v39 = vsel %vm3992_vm2, %v2227_v29, 0.0  ;;  %vm4544_vm6 = vmpackc.low %vm3992_vm2, %vm3992_vm2  ;;  %v3070_v21 = vmul.u32 43690, %v3065_v18 }
 0x271   : > { %4868 = vmatmul.msk.bf16.gmra.mxu1 %vm2081_vm12, %v1961_v48  ;;  %v7713_v36 = vadd.s32 56, %v6802_v37  ;;  %v4191_v15 = vpack.c.bf16 %v7709_v39, %v7709_v39  ;;  %v4592_v27 = vsel %vm4544_vm6, %v4988_v34, 0  ;;  %v3073_v5 = vshll.u32 %v7695_v62, 16 }
 0x272   : > { %v7720_v61 = vadd.s32 128, %v6802_v37  ;;  %4640 = vst.msk [vmem:[%s7015_s26 + $0x60] sm:$0xf] %vm4160_vm15, %v4592_v27  ;;  %v2536_v4 = vsub.s32 %v7570_v35, %v2535_v44  ;;  %vm9422_vm3 = vcmask 130048   ;;  %vm3075_vm4 = vc.u32 %v3067_v53, %v3071_v31 }
 0x273   : > { %v1650_v17 = vsel %vm9422_vm3, %v6810_v60, %v1145_v6  ;;  %v3077_v45 = vadd.s32 %v3071_v31, %v3067_v53  ;;  %4239 = vst.msk [vmem:[%s6983_s25 + $0x78] sm:$0xf] %vm4160_vm15, %v4191_v15  ;;  %v3072_v43 = vshrl.u32 %v7691_v11, 16  ;;  %v3074_v55 = vshrl.u32 %v7695_v62, 16  ;;  %v2182_v60 = vpop.f32.mrf.mxu0  ;;  %v4989_v31 = vld [vmem:[%s5219_s9 + $0x30] sm:$0xf] }
 0x274   : > { %v3076_v22 = vsel %vm3075_vm4, 1, %v5130_v1  ;;  %v2001_v25 = vsel %vm1866_vm11, %v7529_v52, %v7701_v19  ;;  %vm3734_vm1 = vcmp.ne.s32.totalorder %v2536_v4, 0  ;;  %vm3782_vm13 = vcmp.lt.s32.totalorder %v2536_v4, 0 }
 0x275   : > { %v3878_v35 = vadd.s32 24, %v2536_v4  ;;  %v3078_v58 = vadd.s32 %v3076_v22, %v3070_v21  ;;  %4873 = vmatmul.msk.bf16.gmra.mxu2 %vm2081_vm12, %v2001_v25  ;;  %vm3830_vm14 = vmand %vm3782_vm13, %vm3734_vm1  ;;  %vm3079_vm5 = vc.u32 %v3077_v45, %v3073_v5  ;;  %v1701_v0 = vsel %vm1657_vm7, %v1650_v17, %v7655_v46 }
 0x276   : > { %v2542_v18 = vand.u32 65535, %v7713_v36  ;;  %v2543_v54 = vshrl.u32 %v7713_v36, 16  ;;  %v3080_v52 = vsel %vm3079_vm5, 1, %v5130_v1  ;;  %v1752_v24 = vsel %vm1708_vm8, %v1701_v0, %v1303_v47  ;;  %v1382_v8 = vpop.permute.xlu1 %1381  ;;  %v1137_v3 = vpop.permute.xlu0 %1136 }
 0x277   : > { %v3926_v14 = vsel %vm3830_vm14, %v3878_v35, %v2536_v4  ;;  %v1969_v13 = vsel %vm1866_vm11, %v1960_v38, %v6908_v26  ;;  %v3082_v46 = vadd.s32 %v3080_v52, %v3078_v58  ;;  %v2803_v7 = vand.u32 65535, %v7720_v61 }
 0x278   : > { %vm7746_vm2 = vcmp.lt.s32.totalorder %v3926_v14, 16  ;;  %v2546_v11 = vmul.u32 43690, %v2542_v18  ;;  %v2545_v50 = vmul.u32 43691, %v2542_v18  ;;  %v2547_v26 = vmul.u32 43691, %v2543_v54 }
 0x279   : > { %v4118_v29 = vsel %vm7746_vm2, %v2182_v60, 0.0  ;;  %vm4526_vm0 = vmpackc.low %vm7746_vm2, %vm7746_vm2  ;;  %v1803_v38 = vsel %vm1759_vm10, %v1752_v24, %v1382_v8  ;;  %vm9425_vm6 = vcmask 31744   ;;  %v3083_v48 = vadd.s32 %v3082_v46, %v3072_v43 }
 0x27a   : > { %v4173_v62 = vpack.c.bf16 %v4118_v29, %v4118_v29  ;;  %v4278_v41 = vsel %vm9425_vm6, %v4118_v29, 0.0  ;;  %v4376_v53 = vmul.f32 %v4118_v29, %v4118_v29  ;;  %v4574_v44 = vsel %vm4526_vm0, %v4989_v31, 0  ;;  %vm9426_vm3 = vmmov %vm9425_vm6 }
 0x27b   : > { %v7760_v6 = vadd.f32 %v4278_v41, %v7591_v9  ;;  %4622 = vst.msk [vmem:[%s7015_s26 + $0x18] sm:$0xf] %vm4160_vm15, %v4574_v44  ;;  %v2548_v21 = vmul.u32 43690, %v2543_v54  ;;  %v2549_v47 = vshll.u32 %v2546_v11, 16  ;;  %v2551_v34 = vshll.u32 %v2547_v26, 16 }
 0x27c   : > { %4221 = vst.msk [vmem:[%s6983_s25 + $0x30] sm:$0xf] %vm4160_vm15, %v4173_v62  ;;  %v4429_v15 = vsel %vm9426_vm3, %v4376_v53, 0.0  ;;  %v1854_v27 = vsel %vm1810_vm9, %v1803_v38, %v7693_v20  ;;  %v2804_v5 = vshrl.u32 %v7720_v61, 16  ;;  %v3084_v9 = vadd.s32 %v3083_v48, %v3074_v55 }
 0x27d   : > { %v7771_v4 = vadd.f32 %v4429_v15, %v7602_v40  ;;  %vm2553_vm4 = vc.u32 %v2545_v50, %v2549_v47  ;;  %v2555_v17 = vadd.s32 %v2549_v47, %v2545_v50  ;;  %v2550_v45 = vshrl.u32 %v2546_v11, 16  ;;  %v1147_v40 = vpop.permute.xlu2 %1146 }
 0x27e   : > { %v2554_v43 = vsel %vm2553_vm4, 1, %v5130_v1  ;;  %v2034_v22 = vshrl.u32 %v1854_v27, 16  ;;  %v2037_v25 = vshll.u32 %v1854_v27, 16  ;;  %v3085_v35 = vshrl.u32 %v3084_v9, 4  ;;  %v1239_v54 = vpop.permute.xlu1 %1238  ;;  %v1374_v12 = vpop.permute.xlu0 %1373 }
 0x27f   : > { %v2556_v58 = vadd.s32 %v2554_v43, %v2548_v21  ;;  %vm2557_vm1 = vc.u32 %v2555_v17, %v2551_v34  ;;  %v2806_v60 = vmul.u32 43691, %v2803_v7  ;;  %v7775_v14 = vmul.u32 43690, %v2803_v7 }
 0x280   : > { %v2558_v0 = vsel %vm2557_vm1, 1, %v5130_v1  ;;  %v2036_v20 = vrot.slane %v2034_v22, 3  ;;  %v2039_v18 = vrot.slane %v2037_v25, 4  ;;  %v3086_v55 = vmul.u32 24, %v3085_v35  ;;  %v4990_v22 = vld [vmem:[%s5219_s9 + $0x7c] sm:$0xf] }
 0x281   : > { %v2552_v52 = vshrl.u32 %v2547_v26, 16  ;;  %v2560_v24 = vadd.s32 %v2558_v0, %v2556_v58  ;;  %4869 = vmatmul.msk.bf16.gmra.mxu1 %vm2081_vm12, %v1969_v13  ;;  %v7778_v46 = vmul.u32 43691, %v2804_v5  ;;  %v7782_v11 = vmul.f32 %v7632_v42, %v7632_v42 }
 0x282   : > { %vm9427_vm13 = vcmask 130048   ;;  %v7786_v29 = vor.u32 %v2039_v18, %v2036_v20  ;;  %v2810_v7 = vshll.u32 %v7775_v14, 16  ;;  %v3087_v50 = vsub.s32 %v7660_v56, %v3086_v55  ;;  %v2229_v56 = vpop.f32.mrf.mxu2 }
 0x283   : > { %v1642_v8 = vsel %vm9427_vm13, %v7542_v63, %v1137_v3  ;;  %v2561_v26 = vadd.s32 %v2560_v24, %v2550_v45  ;;  %v2809_v13 = vmul.u32 43690, %v2804_v5  ;;  %vm9428_vm14 = vmmov %vm9427_vm13  ;;  %v2812_v41 = vshll.u32 %v7778_v46, 16 }
 0x284   : > { %v1693_v38 = vsel %vm1657_vm7, %v1642_v8, %v1239_v54  ;;  %v1652_v62 = vsel %vm9428_vm14, %v7547_v57, %v1147_v40  ;;  %v2041_v42 = vsel %vm1866_vm11, %v7618_v32, %v7786_v29  ;;  %vm2814_vm5 = vc.u32 %v2806_v60, %v2810_v7 }
 0x285   : > { %vm3753_vm2 = vcmp.ne.s32.totalorder %v3087_v50, 0  ;;  %vm3801_vm0 = vcmp.lt.s32.totalorder %v3087_v50, 0  ;;  %v3897_v63 = vadd.s32 24, %v3087_v50  ;;  %v2562_v3 = vadd.s32 %v2561_v26, %v2552_v52  ;;  %4878 = vmatmul.msk.bf16.gmra.mxu3 %vm2081_vm12, %v2041_v42 }
 0x286   : > { %vm3849_vm6 = vmand %vm3801_vm0, %vm3753_vm2  ;;  %v1744_v53 = vsel %vm1708_vm8, %v1693_v38, %v7740_v10  ;;  %v2815_v57 = vsel %vm2814_vm5, 1, %v5130_v1  ;;  %v2816_v31 = vadd.s32 %v2810_v7, %v2806_v60  ;;  %v7802_v44 = vadd.s32 136, %v6802_v37  ;;  %v1435_v34 = vpop.permute.xlu1 %1434  ;;  %v1249_v45 = vpop.permute.xlu0 %1248 }
 0x287   : > { %v3945_v32 = vsel %vm3849_vm6, %v3897_v63, %v3087_v50  ;;  %v2563_v48 = vshrl.u32 %v2562_v3, 4  ;;  %v1795_v21 = vsel %vm1759_vm10, %v1744_v53, %v1374_v12  ;;  %v2817_v47 = vadd.s32 %v2815_v57, %v2809_v13  ;;  %v2184_v12 = vpop.f32.mrf.mxu0 }
 0x288   : > { %vm3993_vm3 = vcmp.lt.s32.totalorder %v3945_v32, 16  ;;  %v2811_v15 = vshrl.u32 %v7775_v14, 16  ;;  %vm2818_vm4 = vc.u32 %v2816_v31, %v2812_v41  ;;  %v2832_v10 = vand.u32 65535, %v7802_v44 }
 0x289   : > { %v7807_v27 = vsel %vm3993_vm3, %v2229_v56, 0.0  ;;  %vm4545_vm1 = vmpackc.low %vm3993_vm3, %vm3993_vm3  ;;  %v2564_v5 = vmul.u32 24, %v2563_v48  ;;  %v2819_v9 = vsel %vm2818_vm4, 1, %v5130_v1  ;;  %v1846_v17 = vsel %vm1810_vm9, %v1795_v21, %v1435_v34  ;;  %v4991_v21 = vld [vmem:[%s5219_s9 + $0x34] sm:$0xf] }
 0x28a   : > { %v4192_v43 = vpack.c.bf16 %v7807_v27, %v7807_v27  ;;  %v4593_v25 = vsel %vm4545_vm1, %v4990_v22, 0  ;;  %v2813_v35 = vshrl.u32 %v7778_v46, 16  ;;  %v2833_v58 = vshrl.u32 %v7802_v44, 16 }
 0x28b   : > { %4641 = vst.msk [vmem:[%s7015_s26 + $0x64] sm:$0xf] %vm4160_vm15, %v4593_v25  ;;  %v2565_v60 = vsub.s32 %v7713_v36, %v2564_v5  ;;  %v2821_v0 = vadd.s32 %v2819_v9, %v2817_v47  ;;  %v2002_v20 = vshrl.u32 %v1846_v17, 16  ;;  %v2005_v18 = vshll.u32 %v1846_v17, 16 }
 0x28c   : > { %4240 = vst.msk [vmem:[%s6983_s25 + $0x7c] sm:$0xf] %vm4160_vm15, %v4192_v43  ;;  %v1703_v54 = vsel %vm1657_vm7, %v1652_v62, %v1249_v45  ;;  %v2835_v14 = vmul.u32 43691, %v2832_v10  ;;  %v2836_v40 = vmul.u32 43690, %v2832_v10  ;;  %v7823_v55 = vadd.s32 208, %v6802_v37  ;;  %v1384_v62 = vpop.permute.xlu2 %1383 }
 0x28d   : > { %vm3735_vm13 = vcmp.ne.s32.totalorder %v2565_v60, 0  ;;  %vm3783_vm14 = vcmp.lt.s32.totalorder %v2565_v60, 0  ;;  %v3879_v52 = vadd.s32 24, %v2565_v60  ;;  %v2822_v24 = vadd.s32 %v2821_v0, %v2811_v15 }
 0x28e   : > { %vm3831_vm5 = vmand %vm3783_vm14, %vm3735_vm13  ;;  %v2004_v46 = vrot.slane %v2002_v20, 3  ;;  %v2007_v36 = vrot.slane %v2005_v18, 4  ;;  %v2837_v8 = vmul.u32 43691, %v2833_v58  ;;  %v2838_v7 = vmul.u32 43690, %v2833_v58  ;;  %v1305_v3 = vpop.permute.xlu1 %1304  ;;  %v1445_v43 = vpop.permute.xlu0 %1444 }
 0x28f   : > { %v3927_v50 = vsel %vm3831_vm5, %v3879_v52, %v2565_v60  ;;  %v2823_v26 = vadd.s32 %v2822_v24, %v2813_v35  ;;  %v2839_v38 = vshll.u32 %v2836_v40, 16  ;;  %v2840_v13 = vshrl.u32 %v2836_v40, 16 }
 0x290   : > { %vm3975_vm2 = vcmp.lt.s32.totalorder %v3927_v50, 16  ;;  %v7825_v42 = vor.u32 %v2007_v36, %v2004_v46  ;;  %v2841_v41 = vshll.u32 %v2837_v8, 16  ;;  %v2842_v63 = vshrl.u32 %v2837_v8, 16 }
 0x291   : > { %v4119_v56 = vsel %vm3975_vm2, %v2184_v12, 0.0  ;;  %vm4527_vm0 = vmpackc.low %vm3975_vm2, %vm3975_vm2  ;;  %v2824_v53 = vshrl.u32 %v2823_v26, 4  ;;  %vm2843_vm6 = vc.u32 %v2835_v14, %v2839_v38  ;;  %v2845_v57 = vadd.s32 %v2839_v38, %v2835_v14 }
 0x292   : > { %v4174_v31 = vpack.c.bf16 %v4119_v56, %v4119_v56  ;;  %vm9429_vm3 = vcmask 31744   ;;  %v4377_v48 = vmul.f32 %v4119_v56, %v4119_v56  ;;  %v4575_v47 = vsel %vm4527_vm0, %v4991_v21, 0 }
 0x293   : > { %v4280_v32 = vsel %vm9429_vm3, %v4119_v56, 0.0  ;;  %4623 = vst.msk [vmem:[%s7015_s26 + $0x1c] sm:$0xf] %vm4160_vm15, %v4575_v47  ;;  %v2825_v34 = vmul.u32 24, %v2824_v53  ;;  %v2844_v10 = vsel %vm2843_vm6, 1, %v5130_v1  ;;  %vm2847_vm4 = vc.u32 %v2845_v57, %v2841_v41  ;;  %vm9430_vm1 = vmmov %vm9429_vm3 }
 0x294   : > { %v7830_v15 = vadd.f32 %v4280_v32, %v7760_v6  ;;  %4222 = vst.msk [vmem:[%s6983_s25 + $0x34] sm:$0xf] %vm4160_vm15, %v4174_v31  ;;  %v4431_v5 = vsel %vm9430_vm1, %v4377_v48, 0.0  ;;  %v2846_v9 = vadd.s32 %v2844_v10, %v2838_v7  ;;  %v2848_v17 = vsel %vm2847_vm4, 1, %v5130_v1  ;;  %vm9431_vm13 = vmmov %vm9430_vm1  ;;  %v1251_v36 = vpop.permute.xlu2 %1250  ;;  %v4992_v56 = vld [vmem:[%s5219_s9 + $0x58] sm:$0xf] }
 0x295   : > { %v1754_v45 = vsel %vm1708_vm8, %v1703_v54, %v1305_v3  ;;  %v7841_v22 = vadd.f32 %v4431_v5, %v7771_v4  ;;  %v2826_v6 = vsub.s32 %v7720_v61, %v2825_v34  ;;  %v3093_v35 = vand.u32 65535, %v7823_v55  ;;  %vm9432_vm2 = vmmov %vm9430_vm1  ;;  %v2207_v54 = vpop.f32.mrf.mxu1 }
 0x296   : > { %v1805_v25 = vsel %vm1759_vm10, %v1754_v45, %v1384_v62  ;;  %v2850_v58 = vadd.s32 %v2848_v17, %v2846_v9  ;;  %v3094_v60 = vshrl.u32 %v7823_v55, 16  ;;  %v2009_v0 = vsel %vm1866_vm11, %v7701_v19, %v7825_v42  ;;  %v1149_v52 = vpop.permute.xlu1 %1148  ;;  %v1307_v48 = vpop.permute.xlu0 %1306 }
 0x297   : > { %v1856_v20 = vsel %vm1810_vm9, %v1805_v25, %v1445_v43  ;;  %v7853_v18 = vsel %vm9431_vm13, %v7782_v11, 0.0  ;;  %vm3744_vm14 = vcmp.ne.s32.totalorder %v2826_v6, 0  ;;  %vm3792_vm5 = vcmp.lt.s32.totalorder %v2826_v6, 0  ;;  %4874 = vmatmul.msk.bf16.gmra.mxu2 %vm2081_vm12, %v2009_v0 }
 0x298   : > { %v3888_v61 = vadd.s32 24, %v2826_v6  ;;  %v7858_v4 = vsel %vm9432_vm2, %v7669_v2, 0.0  ;;  %vm3840_vm0 = vmand %vm3792_vm5, %vm3744_vm14  ;;  %v2851_v14 = vadd.s32 %v2850_v58, %v2840_v13  ;;  %v3097_v40 = vmul.u32 43690, %v3093_v35 }
 0x299   : > { %v7860_v19 = vmul.u32 43691, %v3094_v60  ;;  %v3096_v12 = vmul.u32 43691, %v3093_v35  ;;  %v2042_v11 = vshrl.u32 %v1856_v20, 16  ;;  %v2045_v46 = vshll.u32 %v1856_v20, 16 }
 0x29a   : > { %v3936_v24 = vsel %vm3840_vm0, %v3888_v61, %v2826_v6  ;;  %v2852_v8 = vadd.s32 %v2851_v14, %v2842_v63  ;;  %v3100_v7 = vshll.u32 %v3097_v40, 16  ;;  %v7863_v50 = vadd.s32 216, %v6802_v37 }
 0x29b   : > { %vm3984_vm6 = vcmp.lt.s32.totalorder %v3936_v24, 16  ;;  %v3099_v38 = vmul.u32 43690, %v3094_v60  ;;  %v3102_v13 = vshll.u32 %v7860_v19, 16  ;;  %v2044_v62 = vrot.slane %v2042_v11, 3 }
 0x29c   : > { %v7865_v26 = vsel %vm3984_vm6, %v2207_v54, 0.0  ;;  %vm4536_vm3 = vmpackc.low %vm3984_vm6, %vm3984_vm6  ;;  %v4385_v41 = vmul.f32 %v7669_v2, %v7669_v2  ;;  %v7872_v3 = vmul.f32 %v7709_v39, %v7709_v39  ;;  %v2853_v57 = vshrl.u32 %v2852_v8, 4 }
 0x29d   : > { %v4183_v63 = vpack.c.bf16 %v7865_v26, %v7865_v26  ;;  %v4584_v53 = vsel %vm4536_vm3, %v4992_v56, 0  ;;  %vm3104_vm4 = vc.u32 %v3096_v12, %v3100_v7  ;;  %v3106_v31 = vadd.s32 %v3100_v7, %v3096_v12 }
 0x29e   : > { %4632 = vst.msk [vmem:[%s7015_s26 + $0x40] sm:$0xf] %vm4160_vm15, %v4584_v53  ;;  %v2047_v32 = vrot.slane %v2045_v46, 4  ;;  %v3101_v21 = vshrl.u32 %v3097_v40, 16  ;;  %v3105_v2 = vsel %vm3104_vm4, 1, %v5130_v1  ;;  %vm9433_vm1 = vcmask 130048   ;;  %v1386_v25 = vpop.permute.xlu1 %1385  ;;  %v1151_v56 = vpop.permute.xlu0 %1150 }
 0x29f   : > { %4231 = vst.msk [vmem:[%s6983_s25 + $0x58] sm:$0xf] %vm4160_vm15, %v4183_v63  ;;  %v1654_v47 = vsel %vm9433_vm1, %v7612_v49, %v1149_v52  ;;  %v3122_v34 = vand.u32 65535, %v7863_v50  ;;  %v2854_v10 = vmul.u32 24, %v2853_v57  ;;  %v3107_v5 = vadd.s32 %v3105_v2, %v3099_v38  ;;  %v1447_v52 = vpop.permute.xlu2 %1446 }
 0x2a0   : > { %vm3108_vm13 = vc.u32 %v3106_v31, %v3102_v13  ;;  %v7885_v9 = vor.u32 %v2047_v32, %v2044_v62  ;;  %v3123_v45 = vshrl.u32 %v7863_v50, 16  ;;  %v3103_v58 = vshrl.u32 %v7860_v19, 16  ;;  %v4993_v32 = vld [vmem:[%s5219_s9 + $0x5c] sm:$0xf] }
 0x2a1   : > { %v3109_v17 = vsel %vm3108_vm13, 1, %v5130_v1  ;;  %v3125_v43 = vmul.u32 43691, %v3122_v34  ;;  %v3126_v6 = vmul.u32 43690, %v3122_v34  ;;  %v2855_v35 = vsub.s32 %v7802_v44, %v2854_v10  ;;  %v2209_v44 = vpop.f32.mrf.mxu1 }
 0x2a2   : > { %v3111_v60 = vadd.s32 %v3109_v17, %v3107_v5  ;;  %v2049_v49 = vsel %vm1866_vm11, %v7786_v29, %v7885_v9  ;;  %v1705_v0 = vsel %vm1657_vm7, %v1654_v47, %v1251_v36  ;;  %v3127_v20 = vmul.u32 43691, %v3123_v45 }
 0x2a3   : > { %v3128_v61 = vmul.u32 43690, %v3123_v45  ;;  %v3129_v54 = vshll.u32 %v3126_v6, 16  ;;  %4879 = vmatmul.msk.bf16.gmra.mxu3 %vm2081_vm12, %v2049_v49  ;;  %vm3745_vm14 = vcmp.ne.s32.totalorder %v2855_v35, 0  ;;  %vm3793_vm5 = vcmp.lt.s32.totalorder %v2855_v35, 0 }
 0x2a4   : > { %v3889_v14 = vadd.s32 24, %v2855_v35  ;;  %v3112_v40 = vadd.s32 %v3111_v60, %v3101_v21  ;;  %vm3841_vm2 = vmand %vm3793_vm5, %vm3745_vm14  ;;  %v3131_v19 = vshll.u32 %v3127_v20, 16  ;;  %v1756_v12 = vsel %vm1708_vm8, %v1705_v0, %v1307_v48 }
 0x2a5   : > { %vm3133_vm0 = vc.u32 %v3125_v43, %v3129_v54  ;;  %v3135_v24 = vadd.s32 %v3129_v54, %v3125_v43  ;;  %v1807_v36 = vsel %vm1759_vm10, %v1756_v12, %v1386_v25  ;;  %v3130_v8 = vshrl.u32 %v3126_v6, 16  ;;  %v2232_v25 = vpop.f32.mrf.mxu2 }
 0x2a6   : > { %v3937_v29 = vsel %vm3841_vm2, %v3889_v14, %v2855_v35  ;;  %v3113_v11 = vadd.s32 %v3112_v40, %v3103_v58  ;;  %v3134_v46 = vsel %vm3133_vm0, 1, %v5130_v1  ;;  %v1858_v63 = vsel %vm1810_vm9, %v1807_v36, %v1447_v52  ;;  %v1253_v17 = vpop.permute.xlu1 %1252 }
 0x2a7   : > { %vm3985_vm6 = vcmp.lt.s32.totalorder %v3937_v29, 16  ;;  %v3136_v7 = vadd.s32 %v3134_v46, %v3128_v61  ;;  %vm3137_vm3 = vc.u32 %v3135_v24, %v3131_v19  ;;  %vm9434_vm1 = vcmask 31744   ;;  %v1309_v49 = vpop.permute.xlu2 %1308 }
 0x2a8   : > { %v7899_v38 = vsel %vm3985_vm6, %v2209_v44, 0.0  ;;  %vm4537_vm4 = vmpackc.low %vm3985_vm6, %vm3985_vm6  ;;  %v3114_v13 = vshrl.u32 %v3113_v11, 4  ;;  %v3138_v62 = vsel %vm3137_vm3, 1, %v5130_v1  ;;  %v7904_v53 = vsel %vm9434_vm1, %v4385_v41, 0.0 }
 0x2a9   : > { %vm9435_vm13 = vmmov %vm9434_vm1  ;;  %v4184_v31 = vpack.c.bf16 %v7899_v38, %v7899_v38  ;;  %v4585_v48 = vsel %vm4537_vm4, %v4993_v32, 0  ;;  %v3132_v47 = vshrl.u32 %v3127_v20, 16  ;;  %v3140_v34 = vadd.s32 %v3138_v62, %v3136_v7 }
 0x2aa   : > { %v7908_v57 = vsel %vm9435_vm13, %v7709_v39, 0.0  ;;  %vm9436_vm14 = vmmov %vm9434_vm1  ;;  %4633 = vst.msk [vmem:[%s7015_s26 + $0x44] sm:$0xf] %vm4160_vm15, %v4585_v48  ;;  %v3115_v2 = vmul.u32 24, %v3114_v13  ;;  %v2050_v41 = vshrl.u32 %v1858_v63, 16  ;;  %v2053_v10 = vshll.u32 %v1858_v63, 16 }
 0x2ab   : > { %v7915_v21 = vsel %vm9436_vm14, %v7872_v3, 0.0  ;;  %4232 = vst.msk [vmem:[%s6983_s25 + $0x5c] sm:$0xf] %vm4160_vm15, %v4184_v31  ;;  %v2017_v39 = vsel %vm1866_vm11, %v7825_v42, %v7404_v30  ;;  %v7925_v5 = vadd.s32 64, %v6802_v37  ;;  %vm9437_vm5 = vmmov %vm9434_vm1  ;;  %v3141_v43 = vadd.s32 %v3140_v34, %v3130_v8  ;;  %v4994_v8 = vld [vmem:[%s5219_s9 + $0x80] sm:$0xf] }
 0x2ac   : > { %v7929_v3 = vsel %vm9437_vm5, %v7807_v27, 0.0  ;;  %v3116_v45 = vsub.s32 %v7823_v55, %v3115_v2  ;;  %4875 = vmatmul.msk.bf16.gmra.mxu2 %vm2081_vm12, %v2017_v39  ;;  %vm9438_vm2 = vcmask 130048   ;;  %v7939_v58 = vadd.s32 72, %v6802_v37 }
 0x2ad   : > { %v1656_v6 = vsel %vm9438_vm2, %v6822_v16, %v1151_v56  ;;  %v2571_v35 = vand.u32 65535, %v7925_v5  ;;  %v2572_v30 = vshrl.u32 %v7925_v5, 16  ;;  %v3142_v55 = vadd.s32 %v3141_v43, %v3132_v47 }
 0x2ae   : > { %v1707_v42 = vsel %vm1657_vm7, %v1656_v6, %v1253_v17  ;;  %vm3754_vm0 = vcmp.ne.s32.totalorder %v3116_v45, 0  ;;  %vm3802_vm6 = vcmp.lt.s32.totalorder %v3116_v45, 0  ;;  %v3898_v60 = vadd.s32 24, %v3116_v45 }
 0x2af   : > { %vm3850_vm3 = vmand %vm3802_vm6, %vm3754_vm0  ;;  %v2052_v0 = vrot.slane %v2050_v41, 3  ;;  %v2055_v20 = vrot.slane %v2053_v10, 4  ;;  %v7941_v61 = vmul.u32 43690, %v2571_v35  ;;  %v7943_v16 = vmul.u32 43691, %v2572_v30  ;;  %v2234_v10 = vpop.f32.mrf.mxu2 }
 0x2b0   : > { %v4395_v54 = vmul.f32 %v7807_v27, %v7807_v27  ;;  %v3946_v14 = vsel %vm3850_vm3, %v3898_v60, %v3116_v45  ;;  %v3143_v40 = vshrl.u32 %v3142_v55, 4  ;;  %v2574_v52 = vmul.u32 43691, %v2571_v35  ;;  %v1388_v27 = vpop.permute.xlu0 %1387  ;;  %v1449_v45 = vpop.permute.xlu1 %1448 }
 0x2b1   : > { %v7949_v44 = vmul.f32 %v7865_v26, %v7865_v26  ;;  %vm3994_vm7 = vcmp.lt.s32.totalorder %v3946_v14, 16  ;;  %v2578_v19 = vshll.u32 %v7941_v61, 16  ;;  %v1758_v24 = vsel %vm1708_vm8, %v1707_v42, %v1309_v49 }
 0x2b2   : > { %v7953_v12 = vsel %vm3994_vm7, %v2232_v25, 0.0  ;;  %vm4546_vm4 = vmpackc.low %vm3994_vm7, %vm3994_vm7  ;;  %v3144_v29 = vmul.u32 24, %v3143_v40  ;;  %v2577_v11 = vmul.u32 43690, %v2572_v30  ;;  %v2600_v46 = vand.u32 65535, %v7939_v58 }
 0x2b3   : > { %v4193_v36 = vpack.c.bf16 %v7953_v12, %v7953_v12  ;;  %v4594_v7 = vsel %vm4546_vm4, %v4994_v8, 0  ;;  %v7959_v13 = vor.u32 %v2055_v20, %v2052_v0  ;;  %v2580_v62 = vshll.u32 %v7943_v16, 16 }
 0x2b4   : > { %4642 = vst.msk [vmem:[%s7015_s26 + $0x68] sm:$0xf] %vm4160_vm15, %v4594_v7  ;;  %v3145_v63 = vsub.s32 %v7863_v50, %v3144_v29  ;;  %vm2582_vm8 = vc.u32 %v2574_v52, %v2578_v19  ;;  %v2584_v56 = vadd.s32 %v2578_v19, %v2574_v52  ;;  %v2601_v31 = vshrl.u32 %v7939_v58, 16 }
 0x2b5   : > { %4241 = vst.msk [vmem:[%s6983_s25 + $0x80] sm:$0xf] %vm4160_vm15, %v4193_v36  ;;  %v2583_v32 = vsel %vm2582_vm8, 1, %v5130_v1  ;;  %v1809_v48 = vsel %vm1759_vm10, %v1758_v24, %v1388_v27  ;;  %v2603_v2 = vmul.u32 43691, %v2600_v46  ;;  %v2604_v47 = vmul.u32 43690, %v2600_v46 }
 0x2b6   : > { %vm3755_vm1 = vcmp.ne.s32.totalorder %v3145_v63, 0  ;;  %vm3803_vm13 = vcmp.lt.s32.totalorder %v3145_v63, 0  ;;  %v3899_v34 = vadd.s32 24, %v3145_v63  ;;  %v2585_v41 = vadd.s32 %v2583_v32, %v2577_v11 }
 0x2b7   : > { %vm3851_vm14 = vmand %vm3803_vm13, %vm3755_vm1  ;;  %v2579_v50 = vshrl.u32 %v7941_v61, 16  ;;  %vm2586_vm5 = vc.u32 %v2584_v56, %v2580_v62  ;;  %v2605_v39 = vmul.u32 43691, %v2601_v31  ;;  %v2607_v17 = vshll.u32 %v2604_v47, 16 }
 0x2b8   : > { %v3947_v43 = vsel %vm3851_vm14, %v3899_v34, %v3145_v63  ;;  %v2581_v6 = vshrl.u32 %v7943_v16, 16  ;;  %v2587_v25 = vsel %vm2586_vm5, 1, %v5130_v1  ;;  %v2057_v35 = vsel %vm1866_vm11, %v7885_v9, %v7959_v13  ;;  %v4995_v16 = vld [vmem:[%s5219_s9 + $0x84] sm:$0xf] }
 0x2b9   : > { %vm3995_vm10 = vcmp.lt.s32.totalorder %v3947_v43, 16  ;;  %v2589_v30 = vadd.s32 %v2587_v25, %v2585_v41  ;;  %v2606_v42 = vmul.u32 43690, %v2601_v31  ;;  %v2609_v60 = vshll.u32 %v2605_v39, 16  ;;  %4880 = vmatmul.msk.bf16.gmra.mxu3 %vm2081_vm12, %v2057_v35 }
 0x2ba   : > { %v7977_v55 = vsel %vm3995_vm10, %v2234_v10, 0.0  ;;  %vm4547_vm2 = vmpackc.low %vm3995_vm10, %vm3995_vm10  ;;  %vm2611_vm0 = vc.u32 %v2603_v2, %v2607_v17  ;;  %v2613_v49 = vadd.s32 %v2607_v17, %v2603_v2  ;;  %v1860_v0 = vsel %vm1810_vm9, %v1809_v48, %v1449_v45  ;;  %v2187_v17 = vpop.f32.mrf.mxu0 }
 0x2bb   : > { %vm9439_vm6 = vcmask 31744   ;;  %v4194_v61 = vpack.c.bf16 %v7977_v55, %v7977_v55  ;;  %v4595_v14 = vsel %vm4547_vm2, %v4995_v16, 0  ;;  %v2590_v40 = vadd.s32 %v2589_v30, %v2579_v50 }
 0x2bc   : > { %v7981_v20 = vsel %vm9439_vm6, %v4395_v54, 0.0  ;;  %vm9440_vm3 = vmmov %vm9439_vm6  ;;  %4643 = vst.msk [vmem:[%s7015_s26 + $0x6c] sm:$0xf] %vm4160_vm15, %v4595_v14  ;;  %v2612_v52 = vsel %vm2611_vm0, 1, %v5130_v1  ;;  %vm2615_vm7 = vc.u32 %v2613_v49, %v2609_v60  ;;  %v2058_v19 = vshrl.u32 %v1860_v0, 16 }
 0x2bd   : > { %v7985_v9 = vsel %vm9440_vm3, %v7865_v26, 0.0  ;;  %4242 = vst.msk [vmem:[%s6983_s25 + $0x84] sm:$0xf] %vm4160_vm15, %v4194_v61  ;;  %v2608_v54 = vshrl.u32 %v2604_v47, 16  ;;  %v2614_v24 = vadd.s32 %v2612_v52, %v2606_v42  ;;  %v2616_v29 = vsel %vm2615_vm7, 1, %v5130_v1  ;;  %vm9441_vm9 = vmmov %vm9440_vm3 }
 0x2be   : > { %v2061_v26 = vshll.u32 %v1860_v0, 16  ;;  %v7998_v11 = vsel %vm9441_vm9, %v7949_v44, 0.0  ;;  %v2591_v27 = vadd.s32 %v2590_v40, %v2581_v6  ;;  %v8001_v46 = vadd.s32 288, %v6802_v37  ;;  %vm9444_vm0 = vmmov %vm9440_vm3 }
 0x2bf   : > { %v8004_v36 = vadd.s32 80, %v6802_v37  ;;  %v2610_v8 = vshrl.u32 %v2605_v39, 16  ;;  %v2618_v7 = vadd.s32 %v2616_v29, %v2614_v24  ;;  %v8006_v62 = vrot.slane %v2058_v19, 3  ;;  %vm9445_vm7 = vmmov %vm9444_vm0 }
 0x2c0   : > { %v8009_v63 = vadd.s32 296, %v6802_v37  ;;  %v2592_v56 = vshrl.u32 %v2591_v27, 4  ;;  %v3383_v31 = vand.u32 65535, %v8001_v46  ;;  %v3384_v44 = vshrl.u32 %v8001_v46, 16 }
 0x2c1   : > { %v2629_v32 = vand.u32 65535, %v8004_v36  ;;  %v2619_v48 = vadd.s32 %v2618_v7, %v2608_v54  ;;  %v8014_v2 = vrot.slane %v2061_v26, 4  ;;  %v2630_v47 = vshrl.u32 %v8004_v36, 16 }
 0x2c2   : > { %v8018_v34 = vadd.s32 88, %v6802_v37  ;;  %v2593_v41 = vmul.u32 24, %v2592_v56  ;;  %v3386_v10 = vmul.u32 43691, %v3383_v31  ;;  %v3387_v50 = vmul.u32 43690, %v3383_v31 }
 0x2c3   : > { %v8020_v39 = vmul.u32 43691, %v3384_v44  ;;  %v2620_v45 = vadd.s32 %v2619_v48, %v2610_v8  ;;  %v3389_v43 = vmul.u32 43690, %v3384_v44  ;;  %v8022_v6 = vmul.u32 43690, %v2629_v32 }
 0x2c4   : > { %v3412_v25 = vand.u32 65535, %v8009_v63  ;;  %v2594_v35 = vsub.s32 %v7925_v5, %v2593_v41  ;;  %v3390_v30 = vshll.u32 %v3387_v50, 16  ;;  %v3391_v42 = vshrl.u32 %v3387_v50, 16  ;;  %v4996_v41 = vld [vmem:[%s5219_s9 + $0x38] sm:$0xf] }
 0x2c5   : > { %v2632_v60 = vmul.u32 43691, %v2629_v32  ;;  %v2621_v49 = vshrl.u32 %v2620_v45, 4  ;;  %v3392_v0 = vshll.u32 %v8020_v39, 16  ;;  %v3393_v61 = vshrl.u32 %v8020_v39, 16 }
 0x2c6   : > { %v8028_v16 = vmul.u32 43691, %v2630_v47  ;;  %vm3736_vm4 = vcmp.ne.s32.totalorder %v2594_v35, 0  ;;  %vm3784_vm8 = vcmp.lt.s32.totalorder %v2594_v35, 0  ;;  %v3880_v14 = vadd.s32 24, %v2594_v35 }
 0x2c7   : > { %vm3394_vm1 = vc.u32 %v3386_v10, %v3390_v30  ;;  %vm3832_vm13 = vmand %vm3784_vm8, %vm3736_vm4  ;;  %v2622_v40 = vmul.u32 24, %v2621_v49  ;;  %v3396_v19 = vadd.s32 %v3390_v30, %v3386_v10  ;;  %v2636_v5 = vshll.u32 %v8022_v6, 16 }
 0x2c8   : > { %v3395_v52 = vsel %vm3394_vm1, 1, %v5130_v1  ;;  %v3928_v54 = vsel %vm3832_vm13, %v3880_v14, %v2594_v35  ;;  %v2635_v29 = vmul.u32 43690, %v2630_v47  ;;  %v2637_v26 = vshrl.u32 %v8022_v6, 16  ;;  %vm9446_vm13 = vmmov %vm9444_vm0 }
 0x2c9   : > { %v3397_v24 = vadd.s32 %v3395_v52, %v3389_v43  ;;  %vm3976_vm14 = vcmp.lt.s32.totalorder %v3928_v54, 16  ;;  %v2623_v27 = vsub.s32 %v7939_v58, %v2622_v40  ;;  %vm3398_vm5 = vc.u32 %v3396_v19, %v3392_v0 }
 0x2ca   : > { %v2638_v8 = vshll.u32 %v8028_v16, 16  ;;  %v4120_v7 = vsel %vm3976_vm14, %v2187_v17, 0.0  ;;  %vm4528_vm10 = vmpackc.low %vm3976_vm14, %vm3976_vm14  ;;  %v3399_v56 = vsel %vm3398_vm5, 1, %v5130_v1  ;;  %vm8036_vm2 = vc.u32 %v2632_v60, %v2636_v5  ;;  %v2189_v17 = vpop.f32.mrf.mxu0 }
 0x2cb   : > { %v2642_v44 = vadd.s32 %v2636_v5, %v2632_v60  ;;  %v4175_v32 = vpack.c.bf16 %v4120_v7, %v4120_v7  ;;  %v4282_v48 = vsel %vm9444_vm0, %v4120_v7, 0.0  ;;  %v4378_v47 = vmul.f32 %v4120_v7, %v4120_v7  ;;  %vm9447_vm14 = vmmov %vm9444_vm0 }
 0x2cc   : > { %v4576_v10 = vsel %vm4528_vm10, %v4996_v41, 0  ;;  %v4283_v58 = vadd.f32 %v4282_v48, %v7830_v15  ;;  %vm3737_vm6 = vcmp.ne.s32.totalorder %v2623_v27, 0  ;;  %vm3785_vm3 = vcmp.lt.s32.totalorder %v2623_v27, 0 }
 0x2cd   : > { %4624 = vst.msk [vmem:[%s7015_s26 + $0x20] sm:$0xf] %vm4160_vm15, %v4576_v10  ;;  %v3881_v50 = vadd.s32 24, %v2623_v27  ;;  %v4433_v39 = vsel %vm9445_vm7, %v4378_v47, 0.0  ;;  %vm3833_vm9 = vmand %vm3785_vm3, %vm3737_vm6  ;;  %v3401_v45 = vadd.s32 %v3399_v56, %v3397_v24  ;;  %v2641_v43 = vsel %vm8036_vm2, 1, %v5130_v1 }
 0x2ce   : > { %4223 = vst.msk [vmem:[%s6983_s25 + $0x38] sm:$0xf] %vm4160_vm15, %v4175_v32  ;;  %vm2644_vm4 = vc.u32 %v2642_v44, %v2638_v8  ;;  %v4434_v6 = vadd.f32 %v4433_v39, %v7841_v22  ;;  %v2643_v35 = vadd.s32 %v2641_v43, %v2635_v29  ;;  %v2639_v49 = vshrl.u32 %v8028_v16, 16  ;;  %v4997_v24 = vld [vmem:[%s5219_s9 + $0x3c] sm:$0xf] }
 0x2cf   : > { %v3929_v15 = vsel %vm3833_vm9, %v3881_v50, %v2623_v27  ;;  %v2645_v30 = vsel %vm2644_vm4, 1, %v5130_v1  ;;  %v3402_v60 = vadd.s32 %v3401_v45, %v3391_v42  ;;  %v3413_v0 = vshrl.u32 %v8009_v63, 16 }
 0x2d0   : > { %vm3977_vm8 = vcmp.lt.s32.totalorder %v3929_v15, 16  ;;  %v2647_v40 = vadd.s32 %v2645_v30, %v2643_v35  ;;  %v3415_v52 = vmul.u32 43691, %v3412_v25  ;;  %v3416_v19 = vmul.u32 43690, %v3412_v25 }
 0x2d1   : > { %v4121_v14 = vsel %vm3977_vm8, %v2189_v17, 0.0  ;;  %vm4529_vm1 = vmpackc.low %vm3977_vm8, %vm3977_vm8  ;;  %v3403_v42 = vadd.s32 %v3402_v60, %v3393_v61  ;;  %v3417_v8 = vmul.u32 43691, %v3413_v0  ;;  %v3418_v56 = vmul.u32 43690, %v3413_v0 }
 0x2d2   : > { %v4176_v5 = vpack.c.bf16 %v4121_v14, %v4121_v14  ;;  %v4284_v22 = vsel %vm9446_vm13, %v4121_v14, 0.0  ;;  %v4379_v54 = vmul.f32 %v4121_v14, %v4121_v14  ;;  %v4577_v29 = vsel %vm4529_vm1, %v4997_v24, 0 }
 0x2d3   : > { %v8057_v27 = vadd.f32 %v4284_v22, %v4283_v58  ;;  %4625 = vst.msk [vmem:[%s7015_s26 + $0x24] sm:$0xf] %vm4160_vm15, %v4577_v29  ;;  %v2648_v16 = vadd.s32 %v2647_v40, %v2637_v26  ;;  %v3419_v31 = vshll.u32 %v3416_v19, 16  ;;  %v2658_v25 = vand.u32 65535, %v8018_v34 }
 0x2d4   : > { %4224 = vst.msk [vmem:[%s6983_s25 + $0x3c] sm:$0xf] %vm4160_vm15, %v4176_v5  ;;  %v4435_v7 = vsel %vm9447_vm14, %v4379_v54, 0.0  ;;  %v3404_v32 = vshrl.u32 %v3403_v42, 4  ;;  %v3421_v47 = vshll.u32 %v3417_v8, 16  ;;  %v3420_v41 = vshrl.u32 %v3416_v19, 16  ;;  %v2257_v5 = vpop.f32.mrf.mxu3 }
 0x2d5   : > { %v8065_v44 = vadd.f32 %v4435_v7, %v4434_v6  ;;  %v2649_v48 = vadd.s32 %v2648_v16, %v2639_v49  ;;  %vm3423_vm5 = vc.u32 %v3415_v52, %v3419_v31  ;;  %v3425_v10 = vadd.s32 %v3419_v31, %v3415_v52 }
 0x2d6   : > { %v2659_v61 = vshrl.u32 %v8018_v34, 16  ;;  %v3405_v26 = vmul.u32 24, %v3404_v32  ;;  %v3424_v50 = vsel %vm3423_vm5, 1, %v5130_v1  ;;  %v2661_v39 = vmul.u32 43691, %v2658_v25 }
 0x2d7   : > { %v2650_v58 = vshrl.u32 %v2649_v48, 4  ;;  %v3426_v17 = vadd.s32 %v3424_v50, %v3418_v56  ;;  %vm3427_vm10 = vc.u32 %v3425_v10, %v3421_v47  ;;  %v2662_v45 = vmul.u32 43690, %v2658_v25  ;;  %v4998_v25 = vld [vmem:[%s5219_s9 + $0xa8] sm:$0xf] }
 0x2d8   : > { %v8069_v43 = vmul.u32 43691, %v2659_v61  ;;  %v3406_v6 = vsub.s32 %v8001_v46, %v3405_v26  ;;  %v3422_v35 = vshrl.u32 %v3417_v8, 16  ;;  %v3428_v30 = vsel %vm3427_vm10, 1, %v5130_v1 }
 0x2d9   : > { %v2651_v15 = vmul.u32 24, %v2650_v58  ;;  %v3430_v60 = vadd.s32 %v3428_v30, %v3426_v17  ;;  %v2664_v49 = vmul.u32 43690, %v2659_v61  ;;  %v2665_v0 = vshll.u32 %v2662_v45, 16 }
 0x2da   : > { %v2667_v14 = vshll.u32 %v8069_v43, 16  ;;  %vm3764_vm2 = vcmp.ne.s32.totalorder %v3406_v6, 0  ;;  %vm3812_vm0 = vcmp.lt.s32.totalorder %v3406_v6, 0  ;;  %v3908_v40 = vadd.s32 24, %v3406_v6 }
 0x2db   : > { %v2652_v52 = vsub.s32 %v8004_v36, %v2651_v15  ;;  %v2064_v19 = vor.u32 %v8014_v2, %v8006_v62  ;;  %vm3860_vm6 = vmand %vm3812_vm0, %vm3764_vm2  ;;  %v3431_v46 = vadd.s32 %v3430_v60, %v3420_v41  ;;  %vm2669_vm3 = vc.u32 %v2661_v39, %v2665_v0  ;;  %v2192_v2 = vpop.f32.mrf.mxu0 }
 0x2dc   : > { %v2671_v22 = vadd.s32 %v2665_v0, %v2661_v39  ;;  %v3956_v54 = vsel %vm3860_vm6, %v3908_v40, %v3406_v6  ;;  %v2670_v42 = vsel %vm2669_vm3, 1, %v5130_v1  ;;  %v4387_v56 = vmul.f32 %v7899_v38, %v7899_v38  ;;  %v4999_v6 = vld [vmem:[%s5219_s9 + $0x40] sm:$0xf] }
 0x2dd   : > { %vm3738_vm7 = vcmp.ne.s32.totalorder %v2652_v52, 0  ;;  %vm3786_vm9 = vcmp.lt.s32.totalorder %v2652_v52, 0  ;;  %v3882_v24 = vadd.s32 24, %v2652_v52  ;;  %vm4004_vm4 = vcmp.lt.s32.totalorder %v3956_v54, 16 }
 0x2de   : > { %vm8077_vm8 = vmand %vm3786_vm9, %vm3738_vm7  ;;  %v3432_v36 = vadd.s32 %v3431_v46, %v3422_v35  ;;  %vm2673_vm1 = vc.u32 %v2671_v22, %v2667_v14  ;;  %v8082_v62 = vsel %vm4004_vm4, %v2257_v5, 0.0  ;;  %v2672_v8 = vadd.s32 %v2670_v42, %v2664_v49 }
 0x2df   : > { %vm4556_vm13 = vmpackc.low %vm4004_vm4, %vm4004_vm4  ;;  %v3930_v16 = vsel %vm8077_vm8, %v3882_v24, %v2652_v52  ;;  %v2674_v7 = vsel %vm2673_vm1, 1, %v5130_v1  ;;  %v4203_v31 = vpack.c.bf16 %v8082_v62, %v8082_v62  ;;  %v2666_v48 = vshrl.u32 %v2662_v45, 16 }
 0x2e0   : > { %v4604_v32 = vsel %vm4556_vm13, %v4998_v25, 0  ;;  %vm8094_vm14 = vcmp.lt.s32.totalorder %v3930_v16, 16  ;;  %v3433_v41 = vshrl.u32 %v3432_v36, 4  ;;  %v2676_v10 = vadd.s32 %v2674_v7, %v2672_v8  ;;  %v2259_v36 = vpop.f32.mrf.mxu3 }
 0x2e1   : > { %4652 = vst.msk [vmem:[%s7015_s26 + $0x90] sm:$0xf] %vm4160_vm15, %v4604_v32  ;;  %v2065_v61 = vsel %vm1866_vm11, %v7959_v13, %v2064_v19  ;;  %v4122_v26 = vsel %vm8094_vm14, %v2192_v2, 0.0  ;;  %vm4530_vm5 = vmpackc.low %vm8094_vm14, %vm8094_vm14  ;;  %v2668_v58 = vshrl.u32 %v8069_v43, 16  ;;  %v8110_v50 = vadd.s32 144, %v6802_v37 }
 0x2e2   : > { %4251 = vst.msk [vmem:[%s6983_s25 + $0xa8] sm:$0xf] %vm4160_vm15, %v4203_v31  ;;  %4881 = vmatmul.msk.bf16.gmra.mxu3 %vm2081_vm12, %v2065_v61  ;;  %v8113_v39 = vadd.s32 152, %v6802_v37  ;;  %v4177_v13 = vpack.c.bf16 %v4122_v26, %v4122_v26  ;;  %vm9452_vm11 = vcmask 31744   ;;  %v4380_v45 = vmul.f32 %v4122_v26, %v4122_v26 }
 0x2e3   : > { %v4286_v17 = vsel %vm9452_vm11, %v4122_v26, 0.0  ;;  %v4578_v15 = vsel %vm4530_vm5, %v4999_v6, 0  ;;  %v3434_v43 = vmul.u32 24, %v3433_v41  ;;  %v2677_v30 = vadd.s32 %v2676_v10, %v2666_v48  ;;  %vm9453_vm12 = vmmov %vm9452_vm11  ;;  %v5000_v26 = vld [vmem:[%s5219_s9 + $0xac] sm:$0xf] }
 0x2e4   : > { %v8118_v35 = vadd.f32 %v4286_v17, %v8057_v27  ;;  %4626 = vst.msk [vmem:[%s7015_s26 + $0x28] sm:$0xf] %vm4160_vm15, %v4578_v15  ;;  %v2861_v60 = vand.u32 65535, %v8110_v50  ;;  %v8125_v49 = vsel %vm9453_vm12, %v7899_v38, 0.0  ;;  %vm9454_vm10 = vmmov %vm9452_vm11  ;;  %v2862_v27 = vshrl.u32 %v8110_v50, 16 }
 0x2e5   : > { %v8128_v0 = vsel %vm9454_vm10, %v4387_v56, 0.0  ;;  %4225 = vst.msk [vmem:[%s6983_s25 + $0x40] sm:$0xf] %vm4160_vm15, %v4177_v13  ;;  %vm9455_vm2 = vmmov %vm9454_vm10  ;;  %v3435_v52 = vsub.s32 %v8009_v63, %v3434_v43  ;;  %v2678_v19 = vadd.s32 %v2677_v30, %v2668_v58  ;;  %v2890_v5 = vand.u32 65535, %v8113_v39 }
 0x2e6   : > { %v4437_v14 = vsel %vm9455_vm2, %v4380_v45, 0.0  ;;  %v2864_v46 = vmul.u32 43691, %v2861_v60  ;;  %v8139_v38 = vmul.u32 43690, %v2861_v60  ;;  %v8141_v22 = vmul.u32 43691, %v2862_v27  ;;  %vm9456_vm3 = vmmov %vm9455_vm2  ;;  %v2194_v45 = vpop.f32.mrf.mxu0 }
 0x2e7   : > { %v8135_v40 = vadd.f32 %v4437_v14, %v8065_v44  ;;  %v2891_v54 = vshrl.u32 %v8113_v39, 16  ;;  %vm3765_vm0 = vcmp.ne.s32.totalorder %v3435_v52, 0  ;;  %vm3813_vm6 = vcmp.lt.s32.totalorder %v3435_v52, 0 }
 0x2e8   : > { %v3909_v24 = vadd.s32 24, %v3435_v52  ;;  %v2679_v29 = vshrl.u32 %v2678_v19, 4  ;;  %v8146_v44 = vsel %vm9456_vm3, %v7953_v12, 0.0  ;;  %vm3861_vm7 = vmand %vm3813_vm6, %vm3765_vm0  ;;  %v2867_v63 = vmul.u32 43690, %v2862_v27 }
 0x2e9   : > { %v2868_v42 = vshll.u32 %v8139_v38, 16  ;;  %v2893_v2 = vmul.u32 43691, %v2890_v5  ;;  %v2870_v7 = vshll.u32 %v8141_v22, 16  ;;  %v8150_v56 = vmul.u32 43690, %v2890_v5  ;;  %vm9457_vm6 = vmmov %vm9455_vm2 }
 0x2ea   : > { %v3957_v16 = vsel %vm3861_vm7, %v3909_v24, %v3435_v52  ;;  %v2680_v8 = vmul.u32 24, %v2679_v29  ;;  %v8152_v25 = vmul.u32 43691, %v2891_v54  ;;  %v8161_v10 = vmul.f32 %v7953_v12, %v7953_v12  ;;  %v5001_v29 = vld [vmem:[%s5219_s9 + $0x44] sm:$0xf] }
 0x2eb   : > { %vm4005_vm9 = vcmp.lt.s32.totalorder %v3957_v16, 16  ;;  %vm2872_vm4 = vc.u32 %v2864_v46, %v2868_v42  ;;  %v2874_v31 = vadd.s32 %v2868_v42, %v2864_v46  ;;  %v2897_v41 = vshll.u32 %v8150_v56, 16 }
 0x2ec   : > { %v8154_v32 = vsel %vm4005_vm9, %v2259_v36, 0.0  ;;  %vm4557_vm8 = vmpackc.low %vm4005_vm9, %vm4005_vm9  ;;  %v2681_v48 = vsub.s32 %v8018_v34, %v2680_v8  ;;  %v2873_v47 = vsel %vm2872_vm4, 1, %v5130_v1  ;;  %v2896_v13 = vmul.u32 43690, %v2891_v54 }
 0x2ed   : > { %v4204_v61 = vpack.c.bf16 %v8154_v32, %v8154_v32  ;;  %v4605_v58 = vsel %vm4557_vm8, %v5000_v26, 0  ;;  %v2875_v34 = vadd.s32 %v2873_v47, %v2867_v63  ;;  %v2869_v6 = vshrl.u32 %v8139_v38, 16 }
 0x2ee   : > { %4653 = vst.msk [vmem:[%s7015_s26 + $0x94] sm:$0xf] %vm4160_vm15, %v4605_v58  ;;  %vm3739_vm1 = vcmp.ne.s32.totalorder %v2681_v48, 0  ;;  %vm3787_vm13 = vcmp.lt.s32.totalorder %v2681_v48, 0  ;;  %v3883_v17 = vadd.s32 24, %v2681_v48  ;;  %v2871_v12 = vshrl.u32 %v8141_v22, 16 }
 0x2ef   : > { %4252 = vst.msk [vmem:[%s6983_s25 + $0xac] sm:$0xf] %vm4160_vm15, %v4204_v61  ;;  %vm3835_vm14 = vmand %vm3787_vm13, %vm3739_vm1  ;;  %vm2876_vm5 = vc.u32 %v2874_v31, %v2870_v7  ;;  %v2898_v15 = vshrl.u32 %v8150_v56, 16  ;;  %v2899_v60 = vshll.u32 %v8152_v25, 16  ;;  %vm2901_vm11 = vc.u32 %v2893_v2, %v2897_v41 }
 0x2f0   : > { %v3931_v43 = vsel %vm3835_vm14, %v3883_v17, %v2681_v48  ;;  %v2877_v30 = vsel %vm2876_vm5, 1, %v5130_v1  ;;  %v2902_v27 = vsel %vm2901_vm11, 1, %v5130_v1  ;;  %v2903_v52 = vadd.s32 %v2897_v41, %v2893_v2  ;;  %vm9460_vm14 = vmmov %vm9455_vm2 }
 0x2f1   : > { %vm3979_vm12 = vcmp.lt.s32.totalorder %v3931_v43, 16  ;;  %v2879_v14 = vadd.s32 %v2877_v30, %v2875_v34  ;;  %v2904_v5 = vadd.s32 %v2902_v27, %v2896_v13  ;;  %v8177_v46 = vadd.s32 224, %v6802_v37  ;;  %v2212_v27 = vpop.f32.mrf.mxu1 }
 0x2f2   : > { %v4123_v19 = vsel %vm3979_vm12, %v2194_v45, 0.0  ;;  %vm4531_vm10 = vmpackc.low %vm3979_vm12, %vm3979_vm12  ;;  %v8180_v38 = vadd.s32 232, %v6802_v37  ;;  %vm2905_vm0 = vc.u32 %v2903_v52, %v2899_v60  ;;  %v2900_v8 = vshrl.u32 %v8152_v25, 16 }
 0x2f3   : > { %v4178_v22 = vpack.c.bf16 %v4123_v19, %v4123_v19  ;;  %v4288_v54 = vsel %vm9455_vm2, %v4123_v19, 0.0  ;;  %v4381_v24 = vmul.f32 %v4123_v19, %v4123_v19  ;;  %v4579_v36 = vsel %vm4531_vm10, %v5001_v29, 0  ;;  %vm9461_vm12 = vmmov %vm9455_vm2 }
 0x2f4   : > { %v4289_v63 = vadd.f32 %v4288_v54, %v8118_v35  ;;  %4627 = vst.msk [vmem:[%s7015_s26 + $0x2c] sm:$0xf] %vm4160_vm15, %v4579_v36  ;;  %v2880_v42 = vadd.s32 %v2879_v14, %v2869_v6  ;;  %v3151_v2 = vand.u32 65535, %v8177_v46  ;;  %v2906_v7 = vsel %vm2905_vm0, 1, %v5130_v1 }
 0x2f5   : > { %4226 = vst.msk [vmem:[%s6983_s25 + $0x44] sm:$0xf] %vm4160_vm15, %v4178_v22  ;;  %v4439_v16 = vsel %vm9457_vm6, %v4381_v24, 0.0  ;;  %v3152_v56 = vshrl.u32 %v8177_v46, 16  ;;  %v2908_v47 = vadd.s32 %v2906_v7, %v2904_v5  ;;  %v3180_v58 = vand.u32 65535, %v8180_v38 }
 0x2f6   : > { %v4291_v31 = vadd.f32 %v7616_v23, %v4289_v63  ;;  %v4440_v35 = vadd.f32 %v4439_v16, %v8135_v40  ;;  %v2881_v48 = vadd.s32 %v2880_v42, %v2871_v12  ;;  %v3154_v41 = vmul.u32 43691, %v3151_v2  ;;  %v2237_v16 = vpop.f32.mrf.mxu2 }
 0x2f7   : > { %v8196_v61 = vmul.u32 43690, %v3151_v2  ;;  %v8198_v26 = vmul.u32 43691, %v3152_v56  ;;  %v2909_v34 = vadd.s32 %v2908_v47, %v2898_v15  ;;  %v3157_v45 = vmul.u32 43690, %v3152_v56 }
 0x2f8   : > { %v4293_v13 = vadd.f32 %v7689_v33, %v4291_v31  ;;  %v4442_v25 = vadd.f32 %v7664_v51, %v4440_v35  ;;  %v2882_v17 = vshrl.u32 %v2881_v48, 4  ;;  %v3181_v51 = vshrl.u32 %v8180_v38, 16 }
 0x2f9   : > { %v3158_v23 = vshll.u32 %v8196_v61, 16  ;;  %v3159_v40 = vshrl.u32 %v8196_v61, 16  ;;  %v3160_v6 = vshll.u32 %v8198_v26, 16  ;;  %v2910_v60 = vadd.s32 %v2909_v34, %v2900_v8 }
 0x2fa   : > { %v4295_v12 = vadd.f32 %v7707_v59, %v4293_v13  ;;  %v4444_v43 = vadd.f32 %v7698_v28, %v4442_v25  ;;  %v2883_v30 = vmul.u32 24, %v2882_v17  ;;  %v3161_v14 = vshrl.u32 %v8198_v26, 16  ;;  %v2214_v17 = vpop.f32.mrf.mxu1 }
 0x2fb   : > { %vm3162_vm3 = vc.u32 %v3154_v41, %v3158_v23  ;;  %v3164_v33 = vadd.s32 %v3158_v23, %v3154_v41  ;;  %v2911_v5 = vshrl.u32 %v2910_v60, 4  ;;  %v8214_v28 = vmul.u32 43690, %v3180_v58  ;;  %v5002_v41 = vld [vmem:[%s5219_s9 + $0x60] sm:$0xf] }
 0x2fc   : > { %v4446_v15 = vadd.f32 %v7853_v18, %v4444_v43  ;;  %v2884_v52 = vsub.s32 %v8110_v50, %v2883_v30  ;;  %v4297_v19 = vadd.f32 %v7858_v4, %v4295_v12  ;;  %v3163_v59 = vsel %vm3162_vm3, 1, %v5130_v1 }
 0x2fd   : > { %vm3166_vm7 = vc.u32 %v3164_v33, %v3160_v6  ;;  %v8216_v22 = vmul.u32 43691, %v3181_v51  ;;  %v2912_v29 = vmul.u32 24, %v2911_v5  ;;  %v3165_v50 = vadd.s32 %v3163_v59, %v3157_v45 }
 0x2fe   : > { %vm3746_vm9 = vcmp.ne.s32.totalorder %v2884_v52, 0  ;;  %vm3794_vm4 = vcmp.lt.s32.totalorder %v2884_v52, 0  ;;  %v3890_v54 = vadd.s32 24, %v2884_v52  ;;  %v4299_v24 = vadd.f32 %v7985_v9, %v4297_v19  ;;  %v5003_v19 = vld [vmem:[%s5219_s9 + $0x64] sm:$0xf] }
 0x2ff   : > { %vm3842_vm8 = vmand %vm3794_vm4, %vm3746_vm9  ;;  %v4448_v18 = vadd.f32 %v7904_v53, %v4446_v15  ;;  %v3167_v4 = vsel %vm3166_vm7, 1, %v5130_v1  ;;  %v3183_v42 = vmul.u32 43691, %v3180_v58  ;;  %v3187_v2 = vshll.u32 %v8214_v28, 16 }
 0x300   : > { %v3938_v36 = vsel %vm3842_vm8, %v3890_v54, %v2884_v52  ;;  %v4301_v63 = vadd.f32 %v8125_v49, %v4299_v24  ;;  %v2913_v8 = vsub.s32 %v8113_v39, %v2912_v29  ;;  %v3169_v53 = vadd.s32 %v3167_v4, %v3165_v50  ;;  %vm9462_vm7 = vmmov %vm9461_vm12 }
 0x301   : > { %vm8223_vm1 = vcmp.lt.s32.totalorder %v3938_v36, 16  ;;  %v4450_v9 = vadd.f32 %v7998_v11, %v4448_v18  ;;  %v3186_v49 = vmul.u32 43690, %v3181_v51  ;;  %v3188_v56 = vshrl.u32 %v8214_v28, 16  ;;  %vm9463_vm9 = vmmov %vm9462_vm7 }
 0x302   : > { %v4130_v7 = vsel %vm8223_vm1, %v2212_v27, 0.0  ;;  %vm4538_vm13 = vmpackc.low %vm8223_vm1, %vm8223_vm1  ;;  %v3189_v31 = vshll.u32 %v8216_v22, 16  ;;  %vm3747_vm5 = vcmp.ne.s32.totalorder %v2913_v8, 0  ;;  %vm3795_vm11 = vcmp.lt.s32.totalorder %v2913_v8, 0 }
 0x303   : > { %v4185_v35 = vpack.c.bf16 %v4130_v7, %v4130_v7  ;;  %v4302_v11 = vsel %vm9460_vm14, %v4130_v7, 0.0  ;;  %v4388_v48 = vmul.f32 %v4130_v7, %v4130_v7  ;;  %v4452_v39 = vadd.f32 %v8128_v0, %v4450_v9  ;;  %vm3843_vm10 = vmand %vm3795_vm11, %vm3747_vm5 }
 0x304   : > { %v4303_v47 = vadd.f32 %v4302_v11, %v4301_v63  ;;  %v4586_v61 = vsel %vm4538_vm13, %v5002_v41, 0  ;;  %v3891_v58 = vadd.s32 24, %v2913_v8  ;;  %v3170_v13 = vadd.s32 %v3169_v53, %v3159_v40  ;;  %vm9464_vm4 = vmmov %vm9462_vm7 }
 0x305   : > { %4233 = vst.msk [vmem:[%s6983_s25 + $0x60] sm:$0xf] %vm4160_vm15, %v4185_v35  ;;  %v4453_v26 = vsel %vm9461_vm12, %v4388_v48, 0.0  ;;  %vm3191_vm2 = vc.u32 %v3183_v42, %v3187_v2  ;;  %v3193_v0 = vadd.s32 %v3187_v2, %v3183_v42  ;;  %v8246_v45 = vadd.s32 304, %v6802_v37 }
 0x306   : > { %v4454_v25 = vadd.f32 %v4453_v26, %v4452_v39  ;;  %4634 = vst.msk [vmem:[%s7015_s26 + $0x48] sm:$0xf] %vm4160_vm15, %v4586_v61  ;;  %v3192_v34 = vsel %vm3191_vm2, 1, %v5130_v1  ;;  %v3939_v23 = vsel %vm3843_vm10, %v3891_v58, %v2913_v8  ;;  %v3171_v6 = vadd.s32 %v3170_v13, %v3161_v14  ;;  %vm9465_vm10 = vmmov %vm9464_vm4 }
 0x307   : > { %v3194_v12 = vadd.s32 %v3192_v34, %v3186_v49  ;;  %v8249_v43 = vadd.s32 312, %v6802_v37  ;;  %vm3987_vm0 = vcmp.lt.s32.totalorder %v3939_v23, 16  ;;  %vm3195_vm6 = vc.u32 %v3193_v0, %v3189_v31 }
 0x308   : > { %v3441_v40 = vand.u32 65535, %v8246_v45  ;;  %v3442_v30 = vshrl.u32 %v8246_v45, 16  ;;  %v4131_v60 = vsel %vm3987_vm0, %v2214_v17, 0.0  ;;  %vm4539_vm3 = vmpackc.low %vm3987_vm0, %vm3987_vm0  ;;  %v3172_v33 = vshrl.u32 %v3171_v6, 4  ;;  %v5004_v17 = vld [vmem:[%s5219_s9 + $0x88] sm:$0xf] }
 0x309   : > { %v3190_v51 = vshrl.u32 %v8216_v22, 16  ;;  %v3196_v15 = vsel %vm3195_vm6, 1, %v5130_v1  ;;  %v4186_v14 = vpack.c.bf16 %v4131_v60, %v4131_v60  ;;  %v4304_v27 = vsel %vm9462_vm7, %v4131_v60, 0.0 }
 0x30a   : > { %v4389_v52 = vmul.f32 %v4131_v60, %v4131_v60  ;;  %v4587_v5 = vsel %vm4539_vm3, %v5003_v19, 0  ;;  %v8257_v59 = vadd.f32 %v4304_v27, %v4303_v47  ;;  %v3173_v28 = vmul.u32 24, %v3172_v33 }
 0x30b   : > { %4635 = vst.msk [vmem:[%s7015_s26 + $0x4c] sm:$0xf] %vm4160_vm15, %v4587_v5  ;;  %v3198_v54 = vadd.s32 %v3196_v15, %v3194_v12  ;;  %v3470_v24 = vand.u32 65535, %v8249_v43  ;;  %v3444_v18 = vmul.u32 43691, %v3441_v40  ;;  %v3445_v29 = vmul.u32 43690, %v3441_v40 }
 0x30c   : > { %4234 = vst.msk [vmem:[%s6983_s25 + $0x64] sm:$0xf] %vm4160_vm15, %v4186_v14  ;;  %v4455_v22 = vsel %vm9463_vm9, %v4389_v52, 0.0  ;;  %v3446_v50 = vmul.u32 43691, %v3442_v30  ;;  %v3174_v36 = vsub.s32 %v8177_v46, %v3173_v28  ;;  %v3471_v42 = vshrl.u32 %v8249_v43, 16  ;;  %v2239_v14 = vpop.f32.mrf.mxu2 }
 0x30d   : > { %v8265_v4 = vadd.f32 %v4455_v22, %v4454_v25  ;;  %v3199_v63 = vadd.s32 %v3198_v54, %v3188_v56  ;;  %v8271_v2 = vsel %vm9464_vm4, %v8161_v10, 0.0  ;;  %v3447_v9 = vmul.u32 43690, %v3442_v30 }
 0x30e   : > { %v3448_v8 = vshll.u32 %v3445_v29, 16  ;;  %v3450_v53 = vshll.u32 %v3446_v50, 16  ;;  %vm3756_vm8 = vcmp.ne.s32.totalorder %v3174_v36, 0  ;;  %vm3804_vm1 = vcmp.lt.s32.totalorder %v3174_v36, 0 }
 0x30f   : > { %v3900_v7 = vadd.s32 24, %v3174_v36  ;;  %v3200_v49 = vadd.s32 %v3199_v63, %v3190_v51  ;;  %vm3852_vm13 = vmand %vm3804_vm1, %vm3756_vm8  ;;  %v3449_v31 = vshrl.u32 %v3445_v29, 16  ;;  %v3474_v46 = vmul.u32 43690, %v3470_v24 }
 0x310   : > { %vm3452_vm14 = vc.u32 %v3444_v18, %v3448_v8  ;;  %v3454_v35 = vadd.s32 %v3448_v8, %v3444_v18  ;;  %v8274_v10 = vmul.u32 43691, %v3471_v42  ;;  %v3473_v47 = vmul.u32 43691, %v3470_v24  ;;  %vm9466_vm8 = vmmov %vm9465_vm10 }
 0x311   : > { %v3948_v56 = vsel %vm3852_vm13, %v3900_v7, %v3174_v36  ;;  %v3201_v11 = vshrl.u32 %v3200_v49, 4  ;;  %v3453_v48 = vsel %vm3452_vm14, 1, %v5130_v1  ;;  %v3477_v58 = vshll.u32 %v3474_v46, 16  ;;  %vm9467_vm1 = vmmov %vm9466_vm8 }
 0x312   : > { %vm3996_vm5 = vcmp.lt.s32.totalorder %v3948_v56, 16  ;;  %v3455_v39 = vadd.s32 %v3453_v48, %v3447_v9  ;;  %vm3456_vm11 = vc.u32 %v3454_v35, %v3450_v53  ;;  %v8281_v13 = vsel %vm9465_vm10, %v7977_v55, 0.0  ;;  %vm9468_vm13 = vmmov %vm9467_vm1 }
 0x313   : > { %v8276_v41 = vsel %vm3996_vm5, %v2237_v16, 0.0  ;;  %vm4548_vm12 = vmpackc.low %vm3996_vm5, %vm3996_vm5  ;;  %v3202_v61 = vmul.u32 24, %v3201_v11  ;;  %v3457_v26 = vsel %vm3456_vm11, 1, %v5130_v1  ;;  %v3451_v0 = vshrl.u32 %v3446_v50, 16  ;;  %v5005_v16 = vld [vmem:[%s5219_s9 + $0x8c] sm:$0xf] }
 0x314   : > { %v4195_v25 = vpack.c.bf16 %v8276_v41, %v8276_v41  ;;  %v4596_v34 = vsel %vm4548_vm12, %v5004_v17, 0  ;;  %v3459_v6 = vadd.s32 %v3457_v26, %v3455_v39  ;;  %v3476_v12 = vmul.u32 43690, %v3471_v42  ;;  %vm9469_vm14 = vmmov %vm9467_vm1 }
 0x315   : > { %4644 = vst.msk [vmem:[%s7015_s26 + $0x70] sm:$0xf] %vm4160_vm15, %v4596_v34  ;;  %v3203_v23 = vsub.s32 %v8180_v38, %v3202_v61  ;;  %v3479_v40 = vshll.u32 %v8274_v10, 16  ;;  %v4397_v30 = vmul.f32 %v7977_v55, %v7977_v55  ;;  %v3478_v60 = vshrl.u32 %v3474_v46, 16  ;;  %v2262_v46 = vpop.f32.mrf.mxu3 }
 0x316   : > { %4243 = vst.msk [vmem:[%s6983_s25 + $0x88] sm:$0xf] %vm4160_vm15, %v4195_v25  ;;  %vm3481_vm2 = vc.u32 %v3473_v47, %v3477_v58  ;;  %v3483_v33 = vadd.s32 %v3477_v58, %v3473_v47  ;;  %v3460_v15 = vadd.s32 %v3459_v6, %v3449_v31  ;;  %v8296_v27 = vadd.s32 160, %v6802_v37 }
 0x317   : > { %vm3757_vm0 = vcmp.ne.s32.totalorder %v3203_v23, 0  ;;  %vm3805_vm6 = vcmp.lt.s32.totalorder %v3203_v23, 0  ;;  %v3901_v51 = vadd.s32 24, %v3203_v23  ;;  %v3482_v38 = vsel %vm3481_vm2, 1, %v5130_v1 }
 0x318   : > { %vm3853_vm3 = vmand %vm3805_vm6, %vm3757_vm0  ;;  %vm3485_vm7 = vc.u32 %v3483_v33, %v3479_v40  ;;  %v8299_v52 = vadd.s32 168, %v6802_v37  ;;  %v3461_v19 = vadd.s32 %v3460_v15, %v3451_v0  ;;  %v3484_v5 = vadd.s32 %v3482_v38, %v3476_v12 }
 0x319   : > { %v3949_v55 = vsel %vm3853_vm3, %v3901_v51, %v3203_v23  ;;  %v3486_v28 = vsel %vm3485_vm7, 1, %v5130_v1  ;;  %v4406_v54 = vmul.f32 %v8082_v62, %v8082_v62  ;;  %v2919_v24 = vand.u32 65535, %v8296_v27 }
 0x31a   : > { %vm3997_vm9 = vcmp.lt.s32.totalorder %v3949_v55, 16  ;;  %v2920_v22 = vshrl.u32 %v8296_v27, 16  ;;  %v3462_v29 = vshrl.u32 %v3461_v19, 4  ;;  %v3480_v50 = vshrl.u32 %v8274_v10, 16  ;;  %v5006_v55 = vld [vmem:[%s5219_s9 + $0xb0] sm:$0xf] }
 0x31b   : > { %v8306_v18 = vsel %vm3997_vm9, %v2239_v14, 0.0  ;;  %vm4549_vm4 = vmpackc.low %vm3997_vm9, %vm3997_vm9  ;;  %v3488_v36 = vadd.s32 %v3486_v28, %v3484_v5  ;;  %v8310_v63 = vsel %vm9466_vm8, %v4397_v30, 0.0  ;;  %v2948_v8 = vand.u32 65535, %v8299_v52 }
 0x31c   : > { %v4196_v42 = vpack.c.bf16 %v8306_v18, %v8306_v18  ;;  %v4597_v9 = vsel %vm4549_vm4, %v5005_v16, 0  ;;  %v8318_v53 = vsel %vm9467_vm1, %v8082_v62, 0.0  ;;  %v3463_v7 = vmul.u32 24, %v3462_v29 }
 0x31d   : > { %4645 = vst.msk [vmem:[%s7015_s26 + $0x74] sm:$0xf] %vm4160_vm15, %v4597_v9  ;;  %v3489_v49 = vadd.s32 %v3488_v36, %v3478_v60  ;;  %v2923_v31 = vmul.u32 43690, %v2919_v24  ;;  %v8323_v35 = vsel %vm9468_vm13, %v4406_v54, 0.0  ;;  %v2922_v56 = vmul.u32 43691, %v2919_v24 }
 0x31e   : > { %4244 = vst.msk [vmem:[%s6983_s25 + $0x8c] sm:$0xf] %vm4160_vm15, %v4196_v42  ;;  %v2924_v11 = vmul.u32 43691, %v2920_v22  ;;  %v2949_v48 = vshrl.u32 %v8299_v52, 16  ;;  %v8330_v10 = vsel %vm9469_vm14, %v8154_v32, 0.0  ;;  %v3464_v62 = vsub.s32 %v8246_v45, %v3463_v7 }
 0x31f   : > { %v3490_v39 = vadd.s32 %v3489_v49, %v3480_v50  ;;  %v2926_v47 = vshll.u32 %v2923_v31, 16  ;;  %v4407_v61 = vmul.f32 %v8154_v32, %v8154_v32  ;;  %v2925_v26 = vmul.u32 43690, %v2920_v22 }
 0x320   : > { %v2928_v58 = vshll.u32 %v2924_v11, 16  ;;  %v8335_v25 = vmul.u32 43690, %v2948_v8  ;;  %vm3766_vm5 = vcmp.ne.s32.totalorder %v3464_v62, 0  ;;  %vm3814_vm11 = vcmp.lt.s32.totalorder %v3464_v62, 0 }
 0x321   : > { %v3910_v17 = vadd.s32 24, %v3464_v62  ;;  %v3491_v34 = vshrl.u32 %v3490_v39, 4  ;;  %vm3862_vm12 = vmand %vm3814_vm11, %vm3766_vm5  ;;  %vm2930_vm10 = vc.u32 %v2922_v56, %v2926_v47  ;;  %v2932_v0 = vadd.s32 %v2926_v47, %v2922_v56 }
 0x322   : > { %v2951_v23 = vmul.u32 43691, %v2948_v8  ;;  %v8337_v6 = vmul.u32 43691, %v2949_v48  ;;  %v2927_v40 = vshrl.u32 %v2923_v31, 16  ;;  %v2931_v32 = vsel %vm2930_vm10, 1, %v5130_v1  ;;  %vm9470_vm5 = vmmov %vm9469_vm14 }
 0x323   : > { %v3958_v45 = vsel %vm3862_vm12, %v3910_v17, %v3464_v62  ;;  %v3492_v12 = vmul.u32 24, %v3491_v34  ;;  %v2933_v30 = vadd.s32 %v2931_v32, %v2925_v26  ;;  %vm2934_vm0 = vc.u32 %v2932_v0, %v2928_v58  ;;  %v5007_v62 = vld [vmem:[%s5219_s9 + $0xb4] sm:$0xf]  ;;  %v2217_v32 = vpop.f32.mrf.mxu1 }
 0x324   : > { %vm4006_vm2 = vcmp.lt.s32.totalorder %v3958_v45, 16  ;;  %v2955_v60 = vshll.u32 %v8335_v25, 16  ;;  %v2929_v15 = vshrl.u32 %v2924_v11, 16  ;;  %v2935_v14 = vsel %vm2934_vm0, 1, %v5130_v1 }
 0x325   : > { %v8341_v33 = vsel %vm4006_vm2, %v2262_v46, 0.0  ;;  %vm4558_vm6 = vmpackc.low %vm4006_vm2, %vm4006_vm2  ;;  %v3493_v51 = vsub.s32 %v8249_v43, %v3492_v12  ;;  %v2954_v5 = vmul.u32 43690, %v2949_v48  ;;  %v2957_v28 = vshll.u32 %v8337_v6, 16  ;;  %v2264_v43 = vpop.f32.mrf.mxu3 }
 0x326   : > { %v4205_v38 = vpack.c.bf16 %v8341_v33, %v8341_v33  ;;  %v4606_v19 = vsel %vm4558_vm6, %v5006_v55, 0  ;;  %v2937_v24 = vadd.s32 %v2935_v14, %v2933_v30  ;;  %v2956_v22 = vshrl.u32 %v8335_v25, 16 }
 0x327   : > { %4654 = vst.msk [vmem:[%s7015_s26 + $0x98] sm:$0xf] %vm4160_vm15, %v4606_v19  ;;  %vm3767_vm3 = vcmp.ne.s32.totalorder %v3493_v51, 0  ;;  %vm3815_vm7 = vcmp.lt.s32.totalorder %v3493_v51, 0  ;;  %v3911_v54 = vadd.s32 24, %v3493_v51  ;;  %vm2959_vm4 = vc.u32 %v2951_v23, %v2955_v60 }
 0x328   : > { %4253 = vst.msk [vmem:[%s6983_s25 + $0xb0] sm:$0xf] %vm4160_vm15, %v4205_v38  ;;  %vm3863_vm9 = vmand %vm3815_vm7, %vm3767_vm3  ;;  %v2961_v29 = vadd.s32 %v2955_v60, %v2951_v23  ;;  %v8355_v50 = vadd.s32 240, %v6802_v37  ;;  %v2938_v42 = vadd.s32 %v2937_v24, %v2927_v40  ;;  %v2960_v16 = vsel %vm2959_vm4, 1, %v5130_v1 }
 0x329   : > { %v3959_v36 = vsel %vm3863_vm9, %v3911_v54, %v3493_v51  ;;  %v8359_v9 = vadd.s32 176, %v6802_v37  ;;  %v2962_v8 = vadd.s32 %v2960_v16, %v2954_v5  ;;  %v8367_v11 = vsel %vm9469_vm14, %v4407_v61, 0.0  ;;  %vm9471_vm9 = vmmov %vm9470_vm5 }
 0x32a   : > { %vm4007_vm8 = vcmp.lt.s32.totalorder %v3959_v36, 16  ;;  %vm2963_vm1 = vc.u32 %v2961_v29, %v2957_v28  ;;  %v3209_v7 = vand.u32 65535, %v8355_v50  ;;  %v2939_v31 = vadd.s32 %v2938_v42, %v2929_v15 }
 0x32b   : > { %v8362_v49 = vsel %vm4007_vm8, %v2264_v43, 0.0  ;;  %vm4559_vm13 = vmpackc.low %vm4007_vm8, %vm4007_vm8  ;;  %v2964_v46 = vsel %vm2963_vm1, 1, %v5130_v1  ;;  %v3210_v56 = vshrl.u32 %v8355_v50, 16  ;;  %v2958_v47 = vshrl.u32 %v8337_v6, 16 }
 0x32c   : > { %v4206_v48 = vpack.c.bf16 %v8362_v49, %v8362_v49  ;;  %v4607_v39 = vsel %vm4559_vm13, %v5007_v62, 0  ;;  %v2940_v26 = vshrl.u32 %v2939_v31, 4  ;;  %v2966_v58 = vadd.s32 %v2964_v46, %v2962_v8  ;;  %vm9472_vm1 = vmmov %vm9470_vm5 }
 0x32d   : > { %4655 = vst.msk [vmem:[%s7015_s26 + $0x9c] sm:$0xf] %vm4160_vm15, %v4607_v39  ;;  %v3212_v25 = vmul.u32 43691, %v3209_v7  ;;  %v3213_v17 = vmul.u32 43690, %v3209_v7  ;;  %v8377_v34 = vsel %vm9470_vm5, %v8276_v41, 0.0  ;;  %v8381_v61 = vmul.f32 %v8276_v41, %v8276_v41 }
 0x32e   : > { %4254 = vst.msk [vmem:[%s6983_s25 + $0xb4] sm:$0xf] %vm4160_vm15, %v4206_v48  ;;  %v8385_v0 = vmul.u32 43691, %v3210_v56  ;;  %v2977_v23 = vand.u32 65535, %v8359_v9  ;;  %v2941_v6 = vmul.u32 24, %v2940_v26  ;;  %v2967_v45 = vadd.s32 %v2966_v58, %v2956_v22 }
 0x32f   : > { %v3215_v12 = vmul.u32 43690, %v3210_v56  ;;  %v3216_v40 = vshll.u32 %v3213_v17, 16  ;;  %v3217_v30 = vshrl.u32 %v3213_v17, 16  ;;  %v2978_v15 = vshrl.u32 %v8359_v9, 16  ;;  %v5008_v26 = vld [vmem:[%s5219_s9 + $0x68] sm:$0xf] }
 0x330   : > { %v3218_v60 = vshll.u32 %v8385_v0, 16  ;;  %v3219_v51 = vshrl.u32 %v8385_v0, 16  ;;  %v2942_v41 = vsub.s32 %v8296_v27, %v2941_v6  ;;  %v2968_v14 = vadd.s32 %v2967_v45, %v2958_v47  ;;  %v2219_v0 = vpop.f32.mrf.mxu1 }
 0x331   : > { %vm3220_vm11 = vc.u32 %v3212_v25, %v3216_v40  ;;  %v3222_v38 = vadd.s32 %v3216_v40, %v3212_v25  ;;  %v2980_v19 = vmul.u32 43691, %v2977_v23  ;;  %v8393_v5 = vmul.u32 43690, %v2977_v23 }
 0x332   : > { %v3221_v55 = vsel %vm3220_vm11, 1, %v5130_v1  ;;  %v8395_v28 = vmul.u32 43691, %v2978_v15  ;;  %vm3748_vm12 = vcmp.ne.s32.totalorder %v2942_v41, 0  ;;  %vm3796_vm10 = vcmp.lt.s32.totalorder %v2942_v41, 0 }
 0x333   : > { %v3892_v54 = vadd.s32 24, %v2942_v41  ;;  %v2969_v24 = vshrl.u32 %v2968_v14, 4  ;;  %vm3844_vm2 = vmand %vm3796_vm10, %vm3748_vm12  ;;  %v3223_v43 = vadd.s32 %v3221_v55, %v3215_v12  ;;  %vm3224_vm0 = vc.u32 %v3222_v38, %v3218_v60 }
 0x334   : > { %v2983_v22 = vmul.u32 43690, %v2978_v15  ;;  %v2984_v27 = vshll.u32 %v8393_v5, 16  ;;  %v3225_v42 = vsel %vm3224_vm0, 1, %v5130_v1  ;;  %v2985_v16 = vshrl.u32 %v8393_v5, 16  ;;  %vm9473_vm12 = vmmov %vm9472_vm1  ;;  %v5009_v5 = vld [vmem:[%s5219_s9 + $0x6c] sm:$0xf] }
 0x335   : > { %v3940_v29 = vsel %vm3844_vm2, %v3892_v54, %v2942_v41  ;;  %v2970_v36 = vmul.u32 24, %v2969_v24  ;;  %v3227_v8 = vadd.s32 %v3225_v42, %v3223_v43  ;;  %v2986_v7 = vshll.u32 %v8395_v28, 16  ;;  %vm9474_vm10 = vmmov %vm9472_vm1 }
 0x336   : > { %vm3988_vm6 = vcmp.lt.s32.totalorder %v3940_v29, 16  ;;  %vm2988_vm3 = vc.u32 %v2980_v19, %v2984_v27  ;;  %v2990_v48 = vadd.s32 %v2984_v27, %v2980_v19  ;;  %v8414_v40 = vadd.s32 248, %v6802_v37  ;;  %vm9475_vm2 = vmmov %vm9472_vm1 }
 0x337   : > { %v4132_v31 = vsel %vm3988_vm6, %v2217_v32, 0.0  ;;  %vm4540_vm7 = vmpackc.low %vm3988_vm6, %vm3988_vm6  ;;  %v2971_v46 = vsub.s32 %v8299_v52, %v2970_v36  ;;  %v2989_v56 = vsel %vm2988_vm3, 1, %v5130_v1  ;;  %v3228_v23 = vadd.s32 %v3227_v8, %v3217_v30 }
 0x338   : > { %v4187_v62 = vpack.c.bf16 %v4132_v31, %v4132_v31  ;;  %v4306_v39 = vsel %vm9471_vm9, %v4132_v31, 0.0  ;;  %v4390_v47 = vmul.f32 %v4132_v31, %v4132_v31  ;;  %v4588_v58 = vsel %vm4540_vm7, %v5008_v26, 0  ;;  %vm9476_vm0 = vmmov %vm9472_vm1 }
 0x339   : > { %v4307_v25 = vadd.f32 %v4306_v39, %v8257_v59  ;;  %4636 = vst.msk [vmem:[%s7015_s26 + $0x50] sm:$0xf] %vm4160_vm15, %v4588_v58  ;;  %vm3749_vm4 = vcmp.ne.s32.totalorder %v2971_v46, 0  ;;  %vm3797_vm8 = vcmp.lt.s32.totalorder %v2971_v46, 0  ;;  %v3893_v17 = vadd.s32 24, %v2971_v46 }
 0x33a   : > { %4235 = vst.msk [vmem:[%s6983_s25 + $0x68] sm:$0xf] %vm4160_vm15, %v4187_v62  ;;  %v4457_v52 = vsel %vm9472_vm1, %v4390_v47, 0.0  ;;  %vm3845_vm13 = vmand %vm3797_vm8, %vm3749_vm4  ;;  %v2991_v6 = vadd.s32 %v2989_v56, %v2983_v22  ;;  %vm2992_vm14 = vc.u32 %v2990_v48, %v2986_v7  ;;  %v3229_v32 = vadd.s32 %v3228_v23, %v3219_v51 }
 0x33b   : > { %v4458_v45 = vadd.f32 %v4457_v52, %v8265_v4  ;;  %v3941_v12 = vsel %vm3845_vm13, %v3893_v17, %v2971_v46  ;;  %v2993_v59 = vsel %vm2992_vm14, 1, %v5130_v1  ;;  %v2987_v60 = vshrl.u32 %v8395_v28, 16  ;;  %v2242_v52 = vpop.f32.mrf.mxu2 }
 0x33c   : > { %vm3989_vm5 = vcmp.lt.s32.totalorder %v3941_v12, 16  ;;  %v2995_v15 = vadd.s32 %v2993_v59, %v2991_v6  ;;  %v3238_v30 = vand.u32 65535, %v8414_v40  ;;  %v3239_v4 = vshrl.u32 %v8414_v40, 16 }
 0x33d   : > { %v4133_v41 = vsel %vm3989_vm5, %v2219_v0, 0.0  ;;  %vm4541_vm11 = vmpackc.low %vm3989_vm5, %vm3989_vm5  ;;  %v8420_v14 = vadd.s32 320, %v6802_v37  ;;  %v8426_v51 = vsel %vm9474_vm10, %v8381_v61, 0.0  ;;  %v3230_v24 = vshrl.u32 %v3229_v32, 4 }
 0x33e   : > { %v4188_v38 = vpack.c.bf16 %v4133_v41, %v4133_v41  ;;  %v4308_v55 = vsel %vm9473_vm12, %v4133_v41, 0.0  ;;  %v4391_v19 = vmul.f32 %v4133_v41, %v4133_v41  ;;  %v4589_v54 = vsel %vm4541_vm11, %v5009_v5, 0 }
 0x33f   : > { %v8428_v28 = vadd.f32 %v4308_v55, %v4307_v25  ;;  %4637 = vst.msk [vmem:[%s7015_s26 + $0x54] sm:$0xf] %vm4160_vm15, %v4589_v54  ;;  %v2996_v43 = vadd.s32 %v2995_v15, %v2985_v16  ;;  %v3241_v27 = vmul.u32 43691, %v3238_v30  ;;  %v3242_v29 = vmul.u32 43690, %v3238_v30  ;;  %v2222_v55 = vpop.f32.mrf.mxu1 }
 0x340   : > { %4236 = vst.msk [vmem:[%s6983_s25 + $0x6c] sm:$0xf] %vm4160_vm15, %v4188_v38  ;;  %v4459_v22 = vsel %vm9475_vm2, %v4391_v19, 0.0  ;;  %v8435_v36 = vmul.u32 43691, %v3239_v4  ;;  %v3231_v8 = vmul.u32 24, %v3230_v24  ;;  %v3499_v61 = vand.u32 65535, %v8420_v14  ;;  %vm9477_vm2 = vmmov %vm9476_vm0 }
 0x341   : > { %v8437_v42 = vadd.f32 %v4459_v22, %v4458_v45  ;;  %v2997_v7 = vadd.s32 %v2996_v43, %v2987_v60  ;;  %v8442_v31 = vsel %vm9476_vm0, %v8306_v18, 0.0  ;;  %v8446_v16 = vmul.f32 %v8306_v18, %v8306_v18 }
 0x342   : > { %v3245_v46 = vshll.u32 %v3242_v29, 16  ;;  %v3247_v56 = vshll.u32 %v8435_v36, 16  ;;  %v3232_v48 = vsub.s32 %v8355_v50, %v3231_v8  ;;  %v3244_v39 = vmul.u32 43690, %v3239_v4  ;;  %v5010_v4 = vld [vmem:[%s5219_s9 + $0x90] sm:$0xf] }
 0x343   : > { %v2998_v62 = vshrl.u32 %v2997_v7, 4  ;;  %v3500_v47 = vshrl.u32 %v8420_v14, 16  ;;  %v8451_v58 = vmul.u32 43690, %v3499_v61  ;;  %v8454_v25 = vadd.s32 184, %v6802_v37 }
 0x344   : > { %vm3249_vm6 = vc.u32 %v3241_v27, %v3245_v46  ;;  %v3251_v26 = vadd.s32 %v3245_v46, %v3241_v27  ;;  %vm3758_vm3 = vcmp.ne.s32.totalorder %v3232_v48, 0  ;;  %vm3806_vm7 = vcmp.lt.s32.totalorder %v3232_v48, 0 }
 0x345   : > { %v3902_v18 = vadd.s32 24, %v3232_v48  ;;  %v2999_v17 = vmul.u32 24, %v2998_v62  ;;  %vm3854_vm9 = vmand %vm3806_vm7, %vm3758_vm3  ;;  %v3246_v0 = vshrl.u32 %v3242_v29, 16  ;;  %v3250_v50 = vsel %vm3249_vm6, 1, %v5130_v1  ;;  %v5011_v62 = vld [vmem:[%s5219_s9 + $0x70] sm:$0xf] }
 0x346   : > { %vm3253_vm4 = vc.u32 %v3251_v26, %v3247_v56  ;;  %v3502_v23 = vmul.u32 43691, %v3499_v61  ;;  %v3252_v12 = vadd.s32 %v3250_v50, %v3244_v39  ;;  %v8458_v59 = vmul.u32 43691, %v3500_v47  ;;  %vm9478_vm6 = vmmov %vm9477_vm2 }
 0x347   : > { %v3950_v6 = vsel %vm3854_vm9, %v3902_v18, %v3232_v48  ;;  %v3000_v45 = vsub.s32 %v8359_v9, %v2999_v17  ;;  %v3254_v32 = vsel %vm3253_vm4, 1, %v5130_v1  ;;  %v3505_v60 = vmul.u32 43690, %v3500_v47  ;;  %vm9479_vm3 = vmmov %vm9477_vm2 }
 0x348   : > { %vm3998_vm8 = vcmp.lt.s32.totalorder %v3950_v6, 16  ;;  %v3506_v15 = vshll.u32 %v8451_v58, 16  ;;  %v3248_v19 = vshrl.u32 %v8435_v36, 16  ;;  %v3006_v5 = vand.u32 65535, %v8454_v25  ;;  %vm9480_vm7 = vmmov %vm9477_vm2 }
 0x349   : > { %v8462_v41 = vsel %vm3998_vm8, %v2242_v52, 0.0  ;;  %vm4550_vm1 = vmpackc.low %vm3998_vm8, %vm3998_vm8  ;;  %vm3750_vm13 = vcmp.ne.s32.totalorder %v3000_v45, 0  ;;  %vm3798_vm14 = vcmp.lt.s32.totalorder %v3000_v45, 0  ;;  %v3894_v30 = vadd.s32 24, %v3000_v45 }
 0x34a   : > { %v4197_v9 = vpack.c.bf16 %v8462_v41, %v8462_v41  ;;  %v4598_v38 = vsel %vm4550_vm1, %v5010_v4, 0  ;;  %vm3846_vm5 = vmand %vm3798_vm14, %vm3750_vm13  ;;  %v3256_v24 = vadd.s32 %v3254_v32, %v3252_v12  ;;  %v3508_v43 = vshll.u32 %v8458_v59, 16 }
 0x34b   : > { %4646 = vst.msk [vmem:[%s7015_s26 + $0x78] sm:$0xf] %vm4160_vm15, %v4598_v38  ;;  %v3942_v54 = vsel %vm3846_vm5, %v3894_v30, %v3000_v45  ;;  %vm3510_vm11 = vc.u32 %v3502_v23, %v3506_v15  ;;  %v3507_v22 = vshrl.u32 %v8451_v58, 16  ;;  %v3512_v29 = vadd.s32 %v3506_v15, %v3502_v23  ;;  %vm9481_vm14 = vmmov %vm9477_vm2 }
 0x34c   : > { %4245 = vst.msk [vmem:[%s6983_s25 + $0x90] sm:$0xf] %vm4160_vm15, %v4197_v9  ;;  %vm3990_vm12 = vcmp.lt.s32.totalorder %v3942_v54, 16  ;;  %v3511_v27 = vsel %vm3510_vm11, 1, %v5130_v1  ;;  %v3257_v8 = vadd.s32 %v3256_v24, %v3246_v0  ;;  %v3007_v61 = vshrl.u32 %v8454_v25, 16 }
 0x34d   : > { %v4134_v36 = vsel %vm3990_vm12, %v2222_v55, 0.0  ;;  %vm4542_vm10 = vmpackc.low %vm3990_vm12, %vm3990_vm12  ;;  %v3513_v7 = vadd.s32 %v3511_v27, %v3505_v60  ;;  %vm3514_vm0 = vc.u32 %v3512_v29, %v3508_v43  ;;  %v3009_v58 = vmul.u32 43691, %v3006_v5 }
 0x34e   : > { %v4189_v46 = vpack.c.bf16 %v4134_v36, %v4134_v36  ;;  %v4310_v56 = vsel %vm9477_vm2, %v4134_v36, 0.0  ;;  %v4392_v48 = vmul.f32 %v4134_v36, %v4134_v36  ;;  %v4590_v39 = vsel %vm4542_vm10, %v5011_v62, 0 }
 0x34f   : > { %v8480_v47 = vadd.f32 %v4310_v56, %v8428_v28  ;;  %4638 = vst.msk [vmem:[%s7015_s26 + $0x58] sm:$0xf] %vm4160_vm15, %v4590_v39  ;;  %v3258_v26 = vadd.s32 %v3257_v8, %v3248_v19  ;;  %v3515_v17 = vsel %vm3514_vm0, 1, %v5130_v1  ;;  %v3010_v52 = vmul.u32 43690, %v3006_v5 }
 0x350   : > { %4237 = vst.msk [vmem:[%s6983_s25 + $0x70] sm:$0xf] %vm4160_vm15, %v4189_v46  ;;  %v4461_v18 = vsel %vm9478_vm6, %v4392_v48, 0.0  ;;  %v3011_v0 = vmul.u32 43691, %v3007_v61  ;;  %v3509_v28 = vshrl.u32 %v8458_v59, 16  ;;  %v3517_v6 = vadd.s32 %v3515_v17, %v3513_v7 }
 0x351   : > { %v8489_v50 = vadd.f32 %v4461_v18, %v8437_v42  ;;  %v3259_v23 = vshrl.u32 %v3258_v26, 4  ;;  %v8494_v45 = vsel %vm9479_vm3, %v8446_v16, 0.0  ;;  %v3012_v12 = vmul.u32 43690, %v3007_v61 }
 0x352   : > { %v3013_v32 = vshll.u32 %v3010_v52, 16  ;;  %v3015_v60 = vshll.u32 %v3011_v0, 16  ;;  %v8498_v15 = vsel %vm9480_vm7, %v8341_v33, 0.0  ;;  %v3518_v9 = vadd.s32 %v3517_v6, %v3507_v22 }
 0x353   : > { %v3260_v30 = vmul.u32 24, %v3259_v23  ;;  %v8501_v42 = vadd.s32 328, %v6802_v37  ;;  %v8505_v59 = vmul.f32 %v8341_v33, %v8341_v33  ;;  %v3014_v4 = vshrl.u32 %v3010_v52, 16 }
 0x354   : > { %vm3017_vm9 = vc.u32 %v3009_v58, %v3013_v32  ;;  %v3019_v16 = vadd.s32 %v3013_v32, %v3009_v58  ;;  %v3519_v55 = vadd.s32 %v3518_v9, %v3509_v28  ;;  %v8512_v43 = vadd.s32 256, %v6802_v37 }
 0x355   : > { %v3261_v38 = vsub.s32 %v8414_v40, %v3260_v30  ;;  %v3018_v19 = vsel %vm3017_vm9, 1, %v5130_v1  ;;  %v3528_v5 = vand.u32 65535, %v8501_v42  ;;  %v3529_v24 = vshrl.u32 %v8501_v42, 16  ;;  %v2244_v40 = vpop.f32.mrf.mxu2 }
 0x356   : > { %v3020_v54 = vadd.s32 %v3018_v19, %v3012_v12  ;;  %vm3021_vm4 = vc.u32 %v3019_v16, %v3015_v60  ;;  %v3520_v22 = vshrl.u32 %v3519_v55, 4  ;;  %v8516_v27 = vmul.f32 %v8362_v49, %v8362_v49  ;;  %v2267_v60 = vpop.f32.mrf.mxu3 }
 0x357   : > { %vm3759_vm8 = vcmp.ne.s32.totalorder %v3261_v38, 0  ;;  %vm3807_vm1 = vcmp.lt.s32.totalorder %v3261_v38, 0  ;;  %v3903_v33 = vadd.s32 24, %v3261_v38  ;;  %v3022_v29 = vsel %vm3021_vm4, 1, %v5130_v1 }
 0x358   : > { %vm3855_vm13 = vmand %vm3807_vm1, %vm3759_vm8  ;;  %v8519_v36 = vmul.u32 43690, %v3528_v5  ;;  %v8521_v8 = vmul.u32 43691, %v3529_v24  ;;  %v3521_v61 = vmul.u32 24, %v3520_v22  ;;  %v3016_v46 = vshrl.u32 %v3011_v0, 16  ;;  %v5012_v0 = vld [vmem:[%s5219_s9 + $0x94] sm:$0xf] }
 0x359   : > { %v3951_v7 = vsel %vm3855_vm13, %v3903_v33, %v3261_v38  ;;  %v3024_v56 = vadd.s32 %v3022_v29, %v3020_v54  ;;  %v8525_v48 = vsel %vm9481_vm14, %v8462_v41, 0.0  ;;  %v3531_v62 = vmul.u32 43691, %v3528_v5 }
 0x35a   : > { %vm3999_vm5 = vcmp.lt.s32.totalorder %v3951_v7, 16  ;;  %v3535_v39 = vshll.u32 %v8519_v36, 16  ;;  %v3522_v58 = vsub.s32 %v8420_v14, %v3521_v61  ;;  %v3267_v17 = vand.u32 65535, %v8512_v43 }
 0x35b   : > { %v8528_v26 = vsel %vm3999_vm5, %v2244_v40, 0.0  ;;  %vm4551_vm11 = vmpackc.low %vm3999_vm5, %vm3999_vm5  ;;  %v3025_v18 = vadd.s32 %v3024_v56, %v3014_v4  ;;  %v3534_v28 = vmul.u32 43690, %v3529_v24  ;;  %v3537_v6 = vshll.u32 %v8521_v8, 16  ;;  %v5013_v40 = vld [vmem:[%s5219_s9 + $0xb8] sm:$0xf] }
 0x35c   : > { %v4198_v52 = vpack.c.bf16 %v8528_v26, %v8528_v26  ;;  %v4599_v23 = vsel %vm4551_vm11, %v5012_v0, 0  ;;  %vm3768_vm12 = vcmp.ne.s32.totalorder %v3522_v58, 0  ;;  %vm3816_vm10 = vcmp.lt.s32.totalorder %v3522_v58, 0 }
 0x35d   : > { %4647 = vst.msk [vmem:[%s7015_s26 + $0x7c] sm:$0xf] %vm4160_vm15, %v4599_v23  ;;  %v3912_v12 = vadd.s32 24, %v3522_v58  ;;  %v3026_v32 = vadd.s32 %v3025_v18, %v3016_v46  ;;  %v8540_v14 = vmul.f32 %v8462_v41, %v8462_v41  ;;  %vm3864_vm2 = vmand %vm3816_vm10, %vm3768_vm12  ;;  %vm3539_vm0 = vc.u32 %v3531_v62, %v3535_v39 }
 0x35e   : > { %4246 = vst.msk [vmem:[%s6983_s25 + $0x94] sm:$0xf] %vm4160_vm15, %v4198_v52  ;;  %v3541_v30 = vadd.s32 %v3535_v39, %v3531_v62  ;;  %v3268_v9 = vshrl.u32 %v8512_v43, 16  ;;  %v3536_v38 = vshrl.u32 %v8519_v36, 16  ;;  %v3540_v55 = vsel %vm3539_vm0, 1, %v5130_v1 }
 0x35f   : > { %v3960_v4 = vsel %vm3864_vm2, %v3912_v12, %v3522_v58  ;;  %v3027_v16 = vshrl.u32 %v3026_v32, 4  ;;  %v3542_v19 = vadd.s32 %v3540_v55, %v3534_v28  ;;  %v8547_v41 = vmul.u32 43690, %v3267_v17 }
 0x360   : > { %vm4008_vm6 = vcmp.lt.s32.totalorder %v3960_v4, 16  ;;  %vm3543_vm3 = vc.u32 %v3541_v30, %v3537_v6  ;;  %v8552_v33 = vmul.u32 43691, %v3268_v9  ;;  %v3270_v36 = vmul.u32 43691, %v3267_v17 }
 0x361   : > { %v8549_v5 = vsel %vm4008_vm6, %v2267_v60, 0.0  ;;  %vm4560_vm7 = vmpackc.low %vm4008_vm6, %vm4008_vm6  ;;  %v3028_v54 = vmul.u32 24, %v3027_v16  ;;  %v3544_v24 = vsel %vm3543_vm3, 1, %v5130_v1  ;;  %v8558_v7 = vadd.s32 264, %v6802_v37 }
 0x362   : > { %v4207_v22 = vpack.c.bf16 %v8549_v5, %v8549_v5  ;;  %v4608_v29 = vsel %vm4560_vm7, %v5013_v40, 0  ;;  %v3538_v46 = vshrl.u32 %v8521_v8, 16  ;;  %v3546_v56 = vadd.s32 %v3544_v24, %v3542_v19  ;;  %v2224_v8 = vpop.f32.mrf.mxu1  ;;  %v5014_v24 = vld [vmem:[%s5219_s9 + $0x74] sm:$0xf] }
 0x363   : > { %4656 = vst.msk [vmem:[%s7015_s26 + $0xa0] sm:$0xf] %vm4160_vm15, %v4608_v29  ;;  %v3029_v61 = vsub.s32 %v8454_v25, %v3028_v54  ;;  %v3274_v62 = vshll.u32 %v8547_v41, 16  ;;  %v8567_v39 = vmul.f32 %v8528_v26, %v8528_v26  ;;  %v3273_v58 = vmul.u32 43690, %v3268_v9 }
 0x364   : > { %4255 = vst.msk [vmem:[%s6983_s25 + $0xb8] sm:$0xf] %vm4160_vm15, %v4207_v22  ;;  %v3276_v18 = vshll.u32 %v8552_v33, 16  ;;  %v8573_v17 = vadd.s32 336, %v6802_v37  ;;  %v3547_v52 = vadd.s32 %v3546_v56, %v3536_v38  ;;  %v3275_v0 = vshrl.u32 %v8547_v41, 16 }
 0x365   : > { %vm3751_vm9 = vcmp.ne.s32.totalorder %v3029_v61, 0  ;;  %vm3799_vm4 = vcmp.lt.s32.totalorder %v3029_v61, 0  ;;  %v3895_v25 = vadd.s32 24, %v3029_v61  ;;  %vm3278_vm1 = vc.u32 %v3270_v36, %v3274_v62 }
 0x366   : > { %vm3847_vm8 = vmand %vm3799_vm4, %vm3751_vm9  ;;  %v3280_v23 = vadd.s32 %v3274_v62, %v3270_v36  ;;  %v3296_v28 = vand.u32 65535, %v8558_v7  ;;  %v3548_v12 = vadd.s32 %v3547_v52, %v3538_v46  ;;  %v3279_v32 = vsel %vm3278_vm1, 1, %v5130_v1 }
 0x367   : > { %v3943_v6 = vsel %vm3847_vm8, %v3895_v25, %v3029_v61  ;;  %v3297_v60 = vshrl.u32 %v8558_v7, 16  ;;  %v3281_v30 = vadd.s32 %v3279_v32, %v3273_v58  ;;  %vm9482_vm11 = vcmask 31744  }
 0x368   : > { %vm3991_vm13 = vcmp.lt.s32.totalorder %v3943_v6, 16  ;;  %vm3282_vm14 = vc.u32 %v3280_v23, %v3276_v18  ;;  %v3299_v9 = vmul.u32 43691, %v3296_v28  ;;  %v3549_v16 = vshrl.u32 %v3548_v12, 4  ;;  %vm9483_vm12 = vmmov %vm9482_vm11 }
 0x369   : > { %v4135_v4 = vsel %vm3991_vm13, %v2224_v8, 0.0  ;;  %vm4543_vm5 = vmpackc.low %vm3991_vm13, %vm3991_vm13  ;;  %v3283_v38 = vsel %vm3282_vm14, 1, %v5130_v1  ;;  %v3300_v55 = vmul.u32 43690, %v3296_v28  ;;  %v8585_v61 = vmul.u32 43691, %v3297_v60 }
 0x36a   : > { %v4190_v19 = vpack.c.bf16 %v4135_v4, %v4135_v4  ;;  %v4312_v41 = vsel %vm9482_vm11, %v4135_v4, 0.0  ;;  %v4393_v54 = vmul.f32 %v4135_v4, %v4135_v4  ;;  %v4591_v22 = vsel %vm4543_vm5, %v5014_v24, 0  ;;  %vm9486_vm4 = vmmov %vm9482_vm11 }
 0x36b   : > { %v4313_v40 = vadd.f32 %v4312_v41, %v8480_v47  ;;  %4639 = vst.msk [vmem:[%s7015_s26 + $0x5c] sm:$0xf] %vm4160_vm15, %v4591_v22  ;;  %v3550_v29 = vmul.u32 24, %v3549_v16  ;;  %v3285_v36 = vadd.s32 %v3283_v38, %v3281_v30  ;;  %v3277_v56 = vshrl.u32 %v8552_v33, 16  ;;  %vm9487_vm13 = vmmov %vm9486_vm4 }
 0x36c   : > { %4238 = vst.msk [vmem:[%s6983_s25 + $0x74] sm:$0xf] %vm4160_vm15, %v4190_v19  ;;  %v4463_v46 = vsel %vm9483_vm12, %v4393_v54, 0.0  ;;  %v3302_v62 = vmul.u32 43690, %v3297_v60  ;;  %v3303_v58 = vshll.u32 %v3300_v55, 16  ;;  %v3305_v8 = vshll.u32 %v8585_v61, 16  ;;  %v2269_v60 = vpop.f32.mrf.mxu3  ;;  %vm9488_vm14 = vmmov %vm9486_vm4 }
 0x36d   : > { %v4315_v18 = vadd.f32 %v7908_v57, %v4313_v40  ;;  %v4464_v25 = vadd.f32 %v4463_v46, %v8489_v50  ;;  %v3551_v47 = vsub.s32 %v8501_v42, %v3550_v29  ;;  %v3286_v52 = vadd.s32 %v3285_v36, %v3275_v0 }
 0x36e   : > { %vm3307_vm10 = vc.u32 %v3299_v9, %v3303_v58  ;;  %v3309_v23 = vadd.s32 %v3303_v58, %v3299_v9  ;;  %v3557_v28 = vand.u32 65535, %v8573_v17  ;;  %v3304_v4 = vshrl.u32 %v3300_v55, 16 }
 0x36f   : > { %v4317_v6 = vadd.f32 %v7929_v3, %v4315_v18  ;;  %v4466_v12 = vadd.f32 %v7915_v21, %v4464_v25  ;;  %vm3769_vm2 = vcmp.ne.s32.totalorder %v3551_v47, 0  ;;  %vm3817_vm0 = vcmp.lt.s32.totalorder %v3551_v47, 0  ;;  %v2247_v25 = vpop.f32.mrf.mxu2 }
 0x370   : > { %vm8598_vm6 = vmand %vm3817_vm0, %vm3769_vm2  ;;  %v3913_v57 = vadd.s32 24, %v3551_v47  ;;  %v3287_v50 = vadd.s32 %v3286_v52, %v3277_v56  ;;  %v3308_v42 = vsel %vm3307_vm10, 1, %v5130_v1  ;;  %vm3311_vm3 = vc.u32 %v3309_v23, %v3305_v8 }
 0x371   : > { %v4319_v0 = vadd.f32 %v8146_v44, %v4317_v6  ;;  %v4468_v32 = vadd.f32 %v7981_v20, %v4466_v12  ;;  %v3310_v30 = vadd.s32 %v3308_v42, %v3302_v62  ;;  %v3312_v3 = vsel %vm3311_vm3, 1, %v5130_v1  ;;  %vm9489_vm2 = vmmov %vm9486_vm4  ;;  %v5016_v42 = vld [vmem:[%s5219_s9 + $0x98] sm:$0xf] }
 0x372   : > { %v3961_v21 = vsel %vm8598_vm6, %v3913_v57, %v3551_v47  ;;  %v3288_v9 = vshrl.u32 %v3287_v50, 4  ;;  %v3558_v16 = vshrl.u32 %v8573_v17, 16  ;;  %v3306_v54 = vshrl.u32 %v8585_v61, 16  ;;  %vm9490_vm0 = vmmov %vm9489_vm2 }
 0x373   : > { %v4321_v38 = vadd.f32 %v8281_v13, %v4319_v0  ;;  %v4470_v19 = vadd.f32 %v8271_v2, %v4468_v32  ;;  %vm4009_vm7 = vcmp.lt.s32.totalorder %v3961_v21, 16  ;;  %v3314_v44 = vadd.s32 %v3312_v3, %v3310_v30  ;;  %v5015_v2 = vld [vmem:[%s5219_s9 + $0xbc] sm:$0xf]  ;;  %vm9491_vm3 = vmmov %vm9490_vm0 }
 0x374   : > { %v8611_v20 = vsel %vm4009_vm7, %v2269_v60, 0.0  ;;  %vm4561_vm9 = vmpackc.low %vm4009_vm7, %vm4009_vm7  ;;  %v3289_v41 = vmul.u32 24, %v3288_v9  ;;  %v8614_v24 = vmul.u32 43690, %v3557_v28  ;;  %v3560_v13 = vmul.u32 43691, %v3557_v28 }
 0x375   : > { %v4472_v55 = vadd.f32 %v8310_v63, %v4470_v19  ;;  %v4208_v22 = vpack.c.bf16 %v8611_v20, %v8611_v20  ;;  %v8619_v40 = vmul.u32 43691, %v3558_v16  ;;  %v4609_v29 = vsel %vm4561_vm9, %v5015_v2, 0  ;;  %vm9492_vm7 = vmmov %vm9490_vm0 }
 0x376   : > { %v3290_v36 = vsub.s32 %v8512_v43, %v3289_v41  ;;  %v4323_v46 = vadd.f32 %v8377_v34, %v4321_v38  ;;  %v3315_v56 = vadd.s32 %v3314_v44, %v3304_v4  ;;  %v4477_v61 = vsel %vm9486_vm4, %v8540_v14, 0.0  ;;  %4657 = vst.msk [vmem:[%s7015_s26 + $0xa4] sm:$0xf] %vm4160_vm15, %v4609_v29 }
 0x377   : > { %4256 = vst.msk [vmem:[%s6983_s25 + $0xbc] sm:$0xf] %vm4160_vm15, %v4208_v22  ;;  %v4474_v63 = vadd.f32 %v8426_v51, %v4472_v55  ;;  %v3563_v62 = vmul.u32 43690, %v3558_v16  ;;  %v3564_v58 = vshll.u32 %v8614_v24, 16  ;;  %v4328_v34 = vsel %vm9487_vm13, %v8528_v26, 0.0  ;;  %v2249_v55 = vpop.f32.mrf.mxu2 }
 0x378   : > { %vm3760_vm8 = vcmp.ne.s32.totalorder %v3290_v36, 0  ;;  %vm3808_vm1 = vcmp.lt.s32.totalorder %v3290_v36, 0  ;;  %v3904_v18 = vadd.s32 24, %v3290_v36  ;;  %v4325_v43 = vadd.f32 %v8442_v31, %v4323_v46 }
 0x379   : > { %v4479_v14 = vsel %vm9488_vm14, %v8567_v39, 0.0  ;;  %vm3856_vm5 = vmand %vm3808_vm1, %vm3760_vm8  ;;  %v4476_v51 = vadd.f32 %v8494_v45, %v4474_v63  ;;  %v3316_v47 = vadd.s32 %v3315_v56, %v3306_v54  ;;  %v3566_v23 = vshll.u32 %v8619_v40, 16 }
 0x37a   : > { %v3952_v52 = vsel %vm3856_vm5, %v3904_v18, %v3290_v36  ;;  %v4327_v8 = vadd.f32 %v8525_v48, %v4325_v43  ;;  %vm3568_vm11 = vc.u32 %v3560_v13, %v3564_v58  ;;  %v3570_v12 = vadd.s32 %v3564_v58, %v3560_v13  ;;  %vm9493_vm1 = vmmov %vm9490_vm0 }
 0x37b   : > { %vm4000_vm12 = vcmp.lt.s32.totalorder %v3952_v52, 16  ;;  %v4478_v31 = vadd.f32 %v4477_v61, %v4476_v51  ;;  %v3317_v28 = vshrl.u32 %v3316_v47, 4  ;;  %v3569_v26 = vsel %vm3568_vm11, 1, %v5130_v1  ;;  %vm9494_vm5 = vmmov %vm9490_vm0 }
 0x37c   : > { %v4144_v6 = vsel %vm4000_vm12, %v2247_v25, 0.0  ;;  %v4329_v39 = vadd.f32 %v4328_v34, %v4327_v8  ;;  %vm4552_vm10 = vmpackc.low %vm4000_vm12, %vm4000_vm12  ;;  %v3571_v33 = vadd.s32 %v3569_v26, %v3563_v62  ;;  %v8643_v45 = vsel %vm9489_vm2, %v8505_v59, 0.0  ;;  %v5017_v34 = vld [vmem:[%s5219_s9 + $0x9c] sm:$0xf] }
 0x37d   : > { %v8647_v48 = vsel %vm9490_vm0, %v8362_v49, 0.0  ;;  %v4199_v57 = vpack.c.bf16 %v4144_v6, %v4144_v6  ;;  %v4480_v50 = vadd.f32 %v4479_v14, %v4478_v31  ;;  %v4600_v0 = vsel %vm4552_vm10, %v5016_v42, 0 }
 0x37e   : > { %v3318_v32 = vmul.u32 24, %v3317_v28  ;;  %v3565_v60 = vshrl.u32 %v8614_v24, 16  ;;  %vm3572_vm6 = vc.u32 %v3570_v12, %v3566_v23  ;;  %v8653_v30 = vsel %vm9491_vm3, %v8516_v27, 0.0  ;;  %4648 = vst.msk [vmem:[%s7015_s26 + $0x80] sm:$0xf] %vm4160_vm15, %v4600_v0 }
 0x37f   : > { %4247 = vst.msk [vmem:[%s6983_s25 + $0x98] sm:$0xf] %vm4160_vm15, %v4199_v57  ;;  %v3573_v59 = vsel %vm3572_vm6, 1, %v5130_v1  ;;  %v8659_v3 = vadd.s32 272, %v6802_v37  ;;  %v8662_v49 = vadd.s32 344, %v6802_v37  ;;  %v8666_v21 = vsel %vm9492_vm7, %v8549_v5, 0.0 }
 0x380   : > { %v3319_v9 = vsub.s32 %v8558_v7, %v3318_v32  ;;  %v3567_v27 = vshrl.u32 %v8619_v40, 16  ;;  %v3575_v4 = vadd.s32 %v3573_v59, %v3571_v33  ;;  %v8674_v16 = vmul.f32 %v8549_v5, %v8549_v5  ;;  %v2272_v32 = vpop.f32.mrf.mxu3 }
 0x381   : > { %v3325_v38 = vand.u32 65535, %v8659_v3  ;;  %v3326_v19 = vshrl.u32 %v8659_v3, 16  ;;  %v3586_v44 = vand.u32 65535, %v8662_v49  ;;  %v4402_v24 = vmul.f32 %v4144_v6, %v4144_v6 }
 0x382   : > { %vm3761_vm9 = vcmp.ne.s32.totalorder %v3319_v9, 0  ;;  %vm3809_vm4 = vcmp.lt.s32.totalorder %v3319_v9, 0  ;;  %v3905_v41 = vadd.s32 24, %v3319_v9  ;;  %v3576_v54 = vadd.s32 %v3575_v4, %v3565_v60 }
 0x383   : > { %vm3857_vm8 = vmand %vm3809_vm4, %vm3761_vm9  ;;  %v3329_v7 = vmul.u32 43690, %v3325_v38  ;;  %v3330_v22 = vmul.u32 43691, %v3326_v19  ;;  %v3587_v13 = vshrl.u32 %v8662_v49, 16  ;;  %v4330_v5 = vsel %vm9493_vm1, %v4144_v6, 0.0 }
 0x384   : > { %v3953_v40 = vsel %vm3857_vm8, %v3905_v41, %v3319_v9  ;;  %v3577_v2 = vadd.s32 %v3576_v54, %v3567_v27  ;;  %v3328_v29 = vmul.u32 43691, %v3325_v38  ;;  %v8681_v36 = vadd.f32 %v4330_v5, %v4329_v39  ;;  %vm9495_vm4 = vmmov %vm9493_vm1 }
 0x385   : > { %vm4001_vm13 = vcmp.lt.s32.totalorder %v3953_v40, 16  ;;  %v3332_v46 = vshll.u32 %v3329_v7, 16  ;;  %v8683_v56 = vmul.u32 43690, %v3586_v44  ;;  %v3331_v62 = vmul.u32 43690, %v3326_v19 }
 0x386   : > { %v4145_v61 = vsel %vm4001_vm13, %v2249_v55, 0.0  ;;  %vm4553_vm14 = vmpackc.low %vm4001_vm13, %vm4001_vm13  ;;  %v3578_v63 = vshrl.u32 %v3577_v2, 4  ;;  %v3334_v58 = vshll.u32 %v3330_v22, 16  ;;  %v4481_v18 = vsel %vm9494_vm5, %v4402_v24, 0.0 }
 0x387   : > { %v4200_v43 = vpack.c.bf16 %v4145_v61, %v4145_v61  ;;  %v4601_v14 = vsel %vm4553_vm14, %v5017_v34, 0  ;;  %v8687_v25 = vmul.u32 43691, %v3587_v13  ;;  %v8689_v51 = vadd.f32 %v4481_v18, %v4480_v50 }
 0x388   : > { %4649 = vst.msk [vmem:[%s7015_s26 + $0x84] sm:$0xf] %vm4160_vm15, %v4601_v14  ;;  %v3579_v47 = vmul.u32 24, %v3578_v63  ;;  %vm3336_vm11 = vc.u32 %v3328_v29, %v3332_v46  ;;  %v3338_v52 = vadd.s32 %v3332_v46, %v3328_v29  ;;  %v3589_v23 = vmul.u32 43691, %v3586_v44 }
 0x389   : > { %4248 = vst.msk [vmem:[%s6983_s25 + $0x9c] sm:$0xf] %vm4160_vm15, %v4200_v43  ;;  %v3337_v8 = vsel %vm3336_vm11, 1, %v5130_v1  ;;  %v3593_v31 = vshll.u32 %v8683_v56, 16  ;;  %v8698_v28 = vadd.s32 280, %v6802_v37  ;;  %v3333_v6 = vshrl.u32 %v3329_v7, 16 }
 0x38a   : > { %v3580_v26 = vsub.s32 %v8573_v17, %v3579_v47  ;;  %v3339_v39 = vadd.s32 %v3337_v8, %v3331_v62  ;;  %vm3340_vm12 = vc.u32 %v3338_v52, %v3334_v58  ;;  %v3335_v12 = vshrl.u32 %v3330_v22, 16 }
 0x38b   : > { %v3341_v33 = vsel %vm3340_vm12, 1, %v5130_v1  ;;  %v3592_v57 = vmul.u32 43690, %v3587_v13  ;;  %v3595_v50 = vshll.u32 %v8687_v25, 16  ;;  %v3594_v60 = vshrl.u32 %v8683_v56, 16  ;;  %v5018_v13 = vld [vmem:[%s5219_s9 + $0xc0] sm:$0xf] }
 0x38c   : > { %vm3770_vm10 = vcmp.ne.s32.totalorder %v3580_v26, 0  ;;  %vm3818_vm2 = vcmp.lt.s32.totalorder %v3580_v26, 0  ;;  %v3914_v42 = vadd.s32 24, %v3580_v26  ;;  %v3343_v0 = vadd.s32 %v3341_v33, %v3339_v39 }
 0x38d   : > { %vm3866_vm0 = vmand %vm3818_vm2, %vm3770_vm10  ;;  %vm3597_vm6 = vc.u32 %v3589_v23, %v3593_v31  ;;  %v3599_v59 = vadd.s32 %v3593_v31, %v3589_v23  ;;  %v3354_v17 = vand.u32 65535, %v8698_v28  ;;  %v3355_v38 = vshrl.u32 %v8698_v28, 16 }
 0x38e   : > { %v3962_v9 = vsel %vm3866_vm0, %v3914_v42, %v3580_v26  ;;  %v3344_v27 = vadd.s32 %v3343_v0, %v3333_v6  ;;  %v3598_v4 = vsel %vm3597_vm6, 1, %v5130_v1  ;;  %v8708_v44 = vadd.s32 352, %v6802_v37  ;;  %vm9496_vm2 = vmmov %vm9495_vm4 }
 0x38f   : > { %vm4010_vm3 = vcmp.lt.s32.totalorder %v3962_v9, 16  ;;  %v3600_v19 = vadd.s32 %v3598_v4, %v3592_v57  ;;  %vm3601_vm7 = vc.u32 %v3599_v59, %v3595_v50  ;;  %v3358_v55 = vmul.u32 43690, %v3354_v17  ;;  %v2252_v57 = vpop.f32.mrf.mxu2 }
 0x390   : > { %v8710_v41 = vsel %vm4010_vm3, %v2272_v32, 0.0  ;;  %vm4562_vm9 = vmpackc.low %vm4010_vm3, %vm4010_vm3  ;;  %v3345_v54 = vadd.s32 %v3344_v27, %v3335_v12  ;;  %v3602_v24 = vsel %vm3601_vm7, 1, %v5130_v1  ;;  %v4332_v7 = vsel %vm9495_vm4, %v4145_v61, 0.0 }
 0x391   : > { %v4209_v22 = vpack.c.bf16 %v8710_v41, %v8710_v41  ;;  %v4610_v5 = vsel %vm4562_vm9, %v5018_v13, 0  ;;  %v3357_v40 = vmul.u32 43691, %v3354_v17  ;;  %v3596_v29 = vshrl.u32 %v8687_v25, 16  ;;  %vm9497_vm9 = vmmov %vm9496_vm2 }
 0x392   : > { %4658 = vst.msk [vmem:[%s7015_s26 + $0xa8] sm:$0xf] %vm4160_vm15, %v4610_v5  ;;  %v3346_v2 = vshrl.u32 %v3345_v54, 4  ;;  %v3604_v46 = vadd.s32 %v3602_v24, %v3600_v19  ;;  %v3359_v56 = vmul.u32 43691, %v3355_v38  ;;  %v4403_v63 = vmul.f32 %v4145_v61, %v4145_v61 }
 0x393   : > { %4257 = vst.msk [vmem:[%s6983_s25 + $0xc0] sm:$0xf] %vm4160_vm15, %v4209_v22  ;;  %v3360_v62 = vmul.u32 43690, %v3355_v38  ;;  %v3361_v58 = vshll.u32 %v3358_v55, 16  ;;  %v3615_v18 = vand.u32 65535, %v8708_v44  ;;  %v8724_v43 = vadd.f32 %v4332_v7, %v8681_v36 }
 0x394   : > { %v3347_v34 = vmul.u32 24, %v3346_v2  ;;  %v3605_v14 = vadd.s32 %v3604_v46, %v3594_v60  ;;  %v3363_v47 = vshll.u32 %v3359_v56, 16  ;;  %v3362_v52 = vshrl.u32 %v3358_v55, 16  ;;  %v5019_v7 = vld [vmem:[%s5219_s9 + $0xa0] sm:$0xf]  ;;  %v2274_v2 = vpop.f32.mrf.mxu3 }
 0x395   : > { %vm3365_vm8 = vc.u32 %v3357_v40, %v3361_v58  ;;  %v3367_v8 = vadd.s32 %v3361_v58, %v3357_v40  ;;  %v3616_v25 = vshrl.u32 %v8708_v44, 16  ;;  %v8729_v26 = vmul.u32 43690, %v3615_v18 }
 0x396   : > { %v3348_v23 = vsub.s32 %v8659_v3, %v3347_v34  ;;  %v3606_v61 = vadd.s32 %v3605_v14, %v3596_v29  ;;  %v3366_v31 = vsel %vm3365_vm8, 1, %v5130_v1  ;;  %v3618_v39 = vmul.u32 43691, %v3615_v18  ;;  %vm9498_vm8 = vmmov %vm9496_vm2 }
 0x397   : > { %v3368_v6 = vadd.s32 %v3366_v31, %v3360_v62  ;;  %vm3369_vm1 = vc.u32 %v3367_v8, %v3363_v47  ;;  %v8731_v36 = vmul.u32 43691, %v3616_v25  ;;  %v3364_v50 = vshrl.u32 %v3359_v56, 16  ;;  %v5020_v31 = vld [vmem:[%s5219_s9 + $0xc4] sm:$0xf] }
 0x398   : > { %vm3762_vm13 = vcmp.ne.s32.totalorder %v3348_v23, 0  ;;  %vm3810_vm14 = vcmp.lt.s32.totalorder %v3348_v23, 0  ;;  %v3906_v12 = vadd.s32 24, %v3348_v23  ;;  %v3607_v33 = vshrl.u32 %v3606_v61, 4 }
 0x399   : > { %vm3858_vm5 = vmand %vm3810_vm14, %vm3762_vm13  ;;  %v3370_v42 = vsel %vm3369_vm1, 1, %v5130_v1  ;;  %v3621_v3 = vmul.u32 43690, %v3616_v25  ;;  %v3622_v0 = vshll.u32 %v8729_v26, 16  ;;  %v3624_v17 = vshll.u32 %v8731_v36, 16 }
 0x39a   : > { %v3954_v32 = vsel %vm3858_vm5, %v3906_v12, %v3348_v23  ;;  %v3608_v60 = vmul.u32 24, %v3607_v33  ;;  %v3372_v59 = vadd.s32 %v3370_v42, %v3368_v6  ;;  %v8737_v27 = vadd.s32 360, %v6802_v37  ;;  %vm9499_vm13 = vmmov %vm9496_vm2 }
 0x39b   : > { %vm4002_vm11 = vcmp.lt.s32.totalorder %v3954_v32, 16  ;;  %vm3626_vm12 = vc.u32 %v3618_v39, %v3622_v0  ;;  %v3628_v9 = vadd.s32 %v3622_v0, %v3618_v39  ;;  %v4483_v24 = vsel %vm9496_vm2, %v4403_v63, 0.0 }
 0x39c   : > { %v4146_v4 = vsel %vm4002_vm11, %v2252_v57, 0.0  ;;  %vm4554_vm10 = vmpackc.low %vm4002_vm11, %vm4002_vm11  ;;  %v3609_v38 = vsub.s32 %v8662_v49, %v3608_v60  ;;  %v3373_v19 = vadd.s32 %v3372_v59, %v3362_v52  ;;  %v3627_v54 = vsel %vm3626_vm12, 1, %v5130_v1 }
 0x39d   : > { %v4201_v55 = vpack.c.bf16 %v4146_v4, %v4146_v4  ;;  %v4602_v22 = vsel %vm4554_vm10, %v5019_v7, 0  ;;  %v3623_v13 = vshrl.u32 %v8729_v26, 16  ;;  %v4404_v5 = vmul.f32 %v4146_v4, %v4146_v4 }
 0x39e   : > { %4650 = vst.msk [vmem:[%s7015_s26 + $0x88] sm:$0xf] %vm4160_vm15, %v4602_v22  ;;  %vm3771_vm0 = vcmp.ne.s32.totalorder %v3609_v38, 0  ;;  %vm3819_vm6 = vcmp.lt.s32.totalorder %v3609_v38, 0  ;;  %v3915_v40 = vadd.s32 24, %v3609_v38  ;;  %v3374_v49 = vadd.s32 %v3373_v19, %v3364_v50 }
 0x39f   : > { %4249 = vst.msk [vmem:[%s6983_s25 + $0xa0] sm:$0xf] %vm4160_vm15, %v4201_v55  ;;  %vm3867_vm3 = vmand %vm3819_vm6, %vm3771_vm0  ;;  %v3625_v29 = vshrl.u32 %v8731_v36, 16  ;;  %v3629_v46 = vadd.s32 %v3627_v54, %v3621_v3  ;;  %vm3630_vm7 = vc.u32 %v3628_v9, %v3624_v17  ;;  %v4334_v56 = vsel %vm9497_vm9, %v4146_v4, 0.0  ;;  %v2254_v4 = vpop.f32.mrf.mxu2 }
 0x3a0   : > { %v3963_v63 = vsel %vm3867_vm3, %v3915_v40, %v3609_v38  ;;  %v3631_v62 = vsel %vm3630_vm7, 1, %v5130_v1  ;;  %v3644_v58 = vand.u32 65535, %v8737_v27  ;;  %v3375_v18 = vshrl.u32 %v3374_v49, 4  ;;  %vm9500_vm6 = vmmov %vm9498_vm8 }
 0x3a1   : > { %vm4011_vm4 = vcmp.lt.s32.totalorder %v3963_v63, 16  ;;  %v3633_v34 = vadd.s32 %v3631_v62, %v3629_v46  ;;  %v3645_v14 = vshrl.u32 %v8737_v27, 16  ;;  %v4485_v47 = vsel %vm9498_vm8, %v4404_v5, 0.0  ;;  %v5021_v62 = vld [vmem:[%s5219_s9 + $0xa4] sm:$0xf]  ;;  %vm9501_vm9 = vmmov %vm9500_vm6 }
 0x3a2   : > { %v8754_v52 = vsel %vm4011_vm4, %v2274_v2, 0.0  ;;  %vm4563_vm1 = vmpackc.low %vm4011_vm4, %vm4011_vm4  ;;  %v8756_v8 = vmul.u32 43690, %v3644_v58  ;;  %v8759_v25 = vadd.s32 368, %v6802_v37  ;;  %v4484_v23 = vadd.f32 %v4483_v24, %v8689_v51 }
 0x3a3   : > { %v4210_v61 = vpack.c.bf16 %v8754_v52, %v8754_v52  ;;  %v4611_v26 = vsel %vm4563_vm1, %v5020_v31, 0  ;;  %v3647_v6 = vmul.u32 43691, %v3644_v58  ;;  %v8767_v39 = vsel %vm9499_vm13, %v8674_v16, 0.0 }
 0x3a4   : > { %4659 = vst.msk [vmem:[%s7015_s26 + $0xac] sm:$0xf] %vm4160_vm15, %v4611_v26  ;;  %v3376_v36 = vmul.u32 24, %v3375_v18  ;;  %v3634_v12 = vadd.s32 %v3633_v34, %v3623_v13  ;;  %v3649_v33 = vmul.u32 43691, %v3645_v14  ;;  %v4335_v57 = vadd.f32 %v4334_v56, %v8724_v43 }
 0x3a5   : > { %v4486_v50 = vadd.f32 %v4485_v47, %v4484_v23  ;;  %4258 = vst.msk [vmem:[%s6983_s25 + $0xc4] sm:$0xf] %vm4160_vm15, %v4210_v61  ;;  %v3651_v51 = vshll.u32 %v8756_v8, 16  ;;  %v3673_v42 = vand.u32 65535, %v8759_v25  ;;  %v3650_v32 = vmul.u32 43690, %v3645_v14  ;;  %v2277_v47 = vpop.f32.mrf.mxu3 }
 0x3a6   : > { %v3377_v3 = vsub.s32 %v8698_v28, %v3376_v36  ;;  %v3635_v0 = vadd.s32 %v3634_v12, %v3625_v29  ;;  %v3653_v16 = vshll.u32 %v3649_v33, 16  ;;  %v3652_v60 = vshrl.u32 %v8756_v8, 16 }
 0x3a7   : > { %vm3655_vm14 = vc.u32 %v3647_v6, %v3651_v51  ;;  %v3657_v59 = vadd.s32 %v3651_v51, %v3647_v6  ;;  %v3674_v17 = vshrl.u32 %v8759_v25, 16  ;;  %v3654_v38 = vshrl.u32 %v3649_v33, 16 }
 0x3a8   : > { %vm3763_vm5 = vcmp.ne.s32.totalorder %v3377_v3, 0  ;;  %vm3811_vm11 = vcmp.lt.s32.totalorder %v3377_v3, 0  ;;  %v3907_v43 = vadd.s32 24, %v3377_v3  ;;  %v3636_v9 = vshrl.u32 %v3635_v0, 4 }
 0x3a9   : > { %vm3859_vm12 = vmand %vm3811_vm11, %vm3763_vm5  ;;  %v3656_v19 = vsel %vm3655_vm14, 1, %v5130_v1  ;;  %vm3659_vm10 = vc.u32 %v3657_v59, %v3653_v16  ;;  %v8780_v28 = vmul.u32 43690, %v3673_v42  ;;  %v3676_v22 = vmul.u32 43691, %v3673_v42 }
 0x3aa   : > { %v3955_v54 = vsel %vm3859_vm12, %v3907_v43, %v3377_v3  ;;  %v3637_v24 = vmul.u32 24, %v3636_v9  ;;  %v3658_v55 = vadd.s32 %v3656_v19, %v3650_v32  ;;  %v3660_v7 = vsel %vm3659_vm10, 1, %v5130_v1  ;;  %vm9502_vm14 = vmmov %vm9500_vm6  ;;  %v5022_v3 = vld [vmem:[%s5219_s9 + $0xc8] sm:$0xf] }
 0x3ab   : > { %vm4003_vm2 = vcmp.lt.s32.totalorder %v3955_v54, 16  ;;  %v8783_v13 = vmul.u32 43691, %v3674_v17  ;;  %v3680_v5 = vshll.u32 %v8780_v28, 16  ;;  %v3679_v29 = vmul.u32 43690, %v3674_v17  ;;  %vm9503_vm11 = vmmov %vm9500_vm6 }
 0x3ac   : > { %v4147_v40 = vsel %vm4003_vm2, %v2254_v4, 0.0  ;;  %vm4555_vm0 = vmpackc.low %vm4003_vm2, %vm4003_vm2  ;;  %v3638_v2 = vsub.s32 %v8708_v44, %v3637_v24  ;;  %v3662_v49 = vadd.s32 %v3660_v7, %v3658_v55  ;;  %v8802_v42 = vadd.s32 376, %v6802_v37 }
 0x3ad   : > { %v4202_v46 = vpack.c.bf16 %v4147_v40, %v4147_v40  ;;  %v4336_v56 = vsel %vm9500_vm6, %v4147_v40, 0.0  ;;  %v4405_v63 = vmul.f32 %v4147_v40, %v4147_v40  ;;  %v4603_v58 = vsel %vm4555_vm0, %v5021_v62, 0 }
 0x3ae   : > { %v4337_v18 = vadd.f32 %v4336_v56, %v4335_v57  ;;  %4651 = vst.msk [vmem:[%s7015_s26 + $0x8c] sm:$0xf] %vm4160_vm15, %v4603_v58  ;;  %vm3772_vm3 = vcmp.ne.s32.totalorder %v3638_v2, 0  ;;  %vm3820_vm7 = vcmp.lt.s32.totalorder %v3638_v2, 0  ;;  %v3916_v34 = vadd.s32 24, %v3638_v2 }
 0x3af   : > { %4250 = vst.msk [vmem:[%s6983_s25 + $0xa4] sm:$0xf] %vm4160_vm15, %v4202_v46  ;;  %v4487_v14 = vsel %vm9501_vm9, %v4405_v63, 0.0  ;;  %vm3868_vm4 = vmand %vm3820_vm7, %vm3772_vm3  ;;  %v3663_v44 = vadd.s32 %v3662_v49, %v3652_v60  ;;  %v3682_v8 = vshll.u32 %v8783_v13, 16  ;;  %vm3684_vm8 = vc.u32 %v3676_v22, %v3680_v5 }
 0x3b0   : > { %v4339_v23 = vadd.f32 %v8318_v53, %v4337_v18  ;;  %v4488_v61 = vadd.f32 %v4487_v14, %v4486_v50  ;;  %v3964_v31 = vsel %vm3868_vm4, %v3916_v34, %v3638_v2  ;;  %v3685_v26 = vsel %vm3684_vm8, 1, %v5130_v1  ;;  %v2279_v2 = vpop.f32.mrf.mxu3  ;;  %vm9504_vm7 = vmmov %vm9501_vm9 }
 0x3b1   : > { %vm4012_vm1 = vcmp.lt.s32.totalorder %v3964_v31, 16  ;;  %v3664_v6 = vadd.s32 %v3663_v44, %v3654_v38  ;;  %v3686_v36 = vadd.s32 %v3680_v5, %v3676_v22  ;;  %v3687_v12 = vadd.s32 %v3685_v26, %v3679_v29  ;;  %vm9505_vm4 = vmmov %vm9504_vm7 }
 0x3b2   : > { %v4341_v33 = vadd.f32 %v8330_v10, %v4339_v23  ;;  %v4490_v57 = vadd.f32 %v8323_v35, %v4488_v61  ;;  %v8799_v51 = vsel %vm4012_vm1, %v2277_v47, 0.0  ;;  %vm4564_vm13 = vmpackc.low %vm4012_vm1, %vm4012_vm1  ;;  %v4348_v53 = vsel %vm9502_vm14, %v8611_v20, 0.0  ;;  %v5023_v23 = vld [vmem:[%s5219_s9 + $0xcc] sm:$0xf] }
 0x3b3   : > { %v4211_v50 = vpack.c.bf16 %v8799_v51, %v8799_v51  ;;  %v4612_v0 = vsel %vm4564_vm13, %v5022_v3, 0  ;;  %v3681_v32 = vshrl.u32 %v8780_v28, 16  ;;  %v3665_v16 = vshrl.u32 %v3664_v6, 4  ;;  %vm9506_vm8 = vmmov %vm9505_vm4 }
 0x3b4   : > { %v4343_v10 = vadd.f32 %v8498_v15, %v4341_v33  ;;  %v4492_v35 = vadd.f32 %v8367_v11, %v4490_v57  ;;  %4660 = vst.msk [vmem:[%s7015_s26 + $0xb0] sm:$0xf] %vm4160_vm15, %v4612_v0  ;;  %vm3688_vm5 = vc.u32 %v3686_v36, %v3682_v8  ;;  %v4411_v37 = vmul.f32 %v8611_v20, %v8611_v20 }
 0x3b5   : > { %4259 = vst.msk [vmem:[%s6983_s25 + $0xc8] sm:$0xf] %vm4160_vm15, %v4211_v50  ;;  %v3689_v60 = vsel %vm3688_vm5, 1, %v5130_v1  ;;  %v3702_v59 = vand.u32 65535, %v8802_v42  ;;  %v3703_v17 = vshrl.u32 %v8802_v42, 16  ;;  %v3666_v11 = vmul.u32 24, %v3665_v16  ;;  %vm9507_vm5 = vmmov %vm9505_vm4 }
 0x3b6   : > { %v4345_v43 = vadd.f32 %v8647_v48, %v4343_v10  ;;  %v4494_v15 = vadd.f32 %v8643_v45, %v4492_v35  ;;  %v3691_v9 = vadd.s32 %v3689_v60, %v3687_v12  ;;  %v3683_v4 = vshrl.u32 %v8783_v13, 16 }
 0x3b7   : > { %v3705_v38 = vmul.u32 43691, %v3702_v59  ;;  %v3706_v19 = vmul.u32 43690, %v3702_v59  ;;  %v3707_v28 = vmul.u32 43691, %v3703_v17  ;;  %v3667_v24 = vsub.s32 %v8737_v27, %v3666_v11 }
 0x3b8   : > { %v4496_v20 = vadd.f32 %v8653_v30, %v4494_v15  ;;  %v4347_v54 = vadd.f32 %v8666_v21, %v4345_v43  ;;  %v3692_v55 = vadd.s32 %v3691_v9, %v3681_v32  ;;  %v4499_v7 = vsel %vm9503_vm11, %v4411_v37, 0.0  ;;  %v5024_v37 = vld [vmem:[%s5219_s9 + $0xd0] sm:$0xf] }
 0x3b9   : > { %v3708_v22 = vmul.u32 43690, %v3703_v17  ;;  %v3709_v48 = vshll.u32 %v3706_v19, 16  ;;  %v3711_v5 = vshll.u32 %v3707_v28, 16  ;;  %vm3773_vm12 = vcmp.ne.s32.totalorder %v3667_v24, 0 }
 0x3ba   : > { %v4349_v45 = vadd.f32 %v4348_v53, %v4347_v54  ;;  %v4498_v40 = vadd.f32 %v8767_v39, %v4496_v20  ;;  %vm3821_vm10 = vcmp.lt.s32.totalorder %v3667_v24, 0  ;;  %v3917_v13 = vadd.s32 24, %v3667_v24 }
 0x3bb   : > { %vm3869_vm2 = vmand %vm3821_vm10, %vm3773_vm12  ;;  %v3693_v49 = vadd.s32 %v3692_v55, %v3683_v4  ;;  %vm3713_vm0 = vc.u32 %v3705_v38, %v3709_v48  ;;  %v3715_v30 = vadd.s32 %v3709_v48, %v3705_v38  ;;  %v3710_v29 = vshrl.u32 %v3706_v19, 16 }
 0x3bc   : > { %v4500_v21 = vadd.f32 %v4499_v7, %v4498_v40  ;;  %v3714_v27 = vsel %vm3713_vm0, 1, %v5130_v1  ;;  %v3965_v46 = vsel %vm3869_vm2, %v3917_v13, %v3667_v24  ;;  %v4412_v39 = vmul.f32 %v8710_v41, %v8710_v41  ;;  %vm9508_vm12 = vmmov %vm9505_vm4 }
 0x3bd   : > { %v3694_v56 = vshrl.u32 %v3693_v49, 4  ;;  %v3716_v63 = vadd.s32 %v3714_v27, %v3708_v22  ;;  %vm3717_vm6 = vc.u32 %v3715_v30, %v3711_v5  ;;  %vm4013_vm3 = vcmp.lt.s32.totalorder %v3965_v46, 16  ;;  %vm9509_vm2 = vmmov %vm9505_vm4 }
 0x3be   : > { %v3718_v62 = vsel %vm3717_vm6, 1, %v5130_v1  ;;  %v4350_v58 = vsel %vm9504_vm7, %v8710_v41, 0.0  ;;  %v4157_v18 = vsel %vm4013_vm3, %v2279_v2, 0.0  ;;  %vm4565_vm9 = vmpackc.low %vm4013_vm3, %vm4013_vm3  ;;  %v3712_v8 = vshrl.u32 %v3707_v28, 16 }
 0x3bf   : > { %v3695_v34 = vmul.u32 24, %v3694_v56  ;;  %v3720_v14 = vadd.s32 %v3718_v62, %v3716_v63  ;;  %v4351_v47 = vadd.f32 %v4350_v58, %v4349_v45  ;;  %v4212_v44 = vpack.c.bf16 %v4157_v18, %v4157_v18  ;;  %vm9510_vm0 = vmmov %vm9509_vm2  ;;  %v5025_v45 = vld [vmem:[%s5219_s9 + $0xd4] sm:$0xf] }
 0x3c0   : > { %v4613_v61 = vsel %vm4565_vm9, %v5023_v23, 0  ;;  %v4501_v6 = vsel %vm9505_vm4, %v4412_v39, 0.0  ;;  %v4352_v1 = vsel %vm9506_vm8, %v8754_v52, 0.0  ;;  %v4413_v41 = vmul.f32 %v8754_v52, %v8754_v52  ;;  %vm9511_vm7 = vmmov %vm9510_vm0 }
 0x3c1   : > { %v3696_v31 = vsub.s32 %v8759_v25, %v3695_v34  ;;  %v3721_v26 = vadd.s32 %v3720_v14, %v3710_v29  ;;  %4260 = vst.msk [vmem:[%s6983_s25 + $0xcc] sm:$0xf] %vm4160_vm15, %v4212_v44  ;;  %v4502_v36 = vadd.f32 %v4501_v6, %v4500_v21  ;;  %v4353_v33 = vadd.f32 %v4352_v1, %v4351_v47  ;;  %v2282_v25 = vpop.f32.mrf.mxu3  ;;  %vm9512_vm4 = vmmov %vm9510_vm0 }
 0x3c2   : > { %4661 = vst.msk [vmem:[%s7015_s26 + $0xb4] sm:$0xf] %vm4160_vm15, %v4613_v61  ;;  %v4503_v50 = vsel %vm9507_vm5, %v4413_v41, 0.0  ;;  %v4414_v52 = vmul.f32 %v8799_v51, %v8799_v51  ;;  %v4354_v0 = vsel %vm9508_vm12, %v8799_v51, 0.0  ;;  %v4415_v43 = vmul.f32 %v4157_v18, %v4157_v18  ;;  %vm9515_vm5 = vmmov %vm9510_vm0 }
 0x3c3   : > { %vm3774_vm1 = vcmp.ne.s32.totalorder %v3696_v31, 0  ;;  %vm3822_vm13 = vcmp.lt.s32.totalorder %v3696_v31, 0  ;;  %v3918_v12 = vadd.s32 24, %v3696_v31  ;;  %v3722_v57 = vadd.s32 %v3721_v26, %v3712_v8 }
 0x3c4   : > { %vm3870_vm14 = vmand %vm3822_vm13, %vm3774_vm1  ;;  %v4504_v32 = vadd.f32 %v4503_v50, %v4502_v36  ;;  %v4355_v35 = vadd.f32 %v4354_v0, %v4353_v33  ;;  %v4505_v17 = vsel %vm9509_vm2, %v4414_v52, 0.0  ;;  %v4356_v11 = vsel %vm9510_vm0, %v4157_v18, 0.0 }
 0x3c5   : > { %v3966_v53 = vsel %vm3870_vm14, %v3918_v12, %v3696_v31  ;;  %v3723_v3 = vshrl.u32 %v3722_v57, 4  ;;  %v4507_v19 = vsel %vm9511_vm7, %v4415_v43, 0.0  ;;  %vm9513_vm1 = vmmov %vm9510_vm0 }
 0x3c6   : > { %vm4014_vm11 = vcmp.lt.s32.totalorder %v3966_v53, 16  ;;  %v4506_v15 = vadd.f32 %v4505_v17, %v4504_v32  ;;  %v4357_v9 = vadd.f32 %v4356_v11, %v4355_v35  ;;  %vm9514_vm14 = vmmov %vm9510_vm0 }
 0x3c7   : > { %v4158_v10 = vsel %vm4014_vm11, %v2282_v25, 0.0  ;;  %vm4566_vm10 = vmpackc.low %vm4014_vm11, %vm4014_vm11  ;;  %v3724_v59 = vmul.u32 24, %v3723_v3 }
 0x3c8   : > { %v4213_v16 = vpack.c.bf16 %v4158_v10, %v4158_v10  ;;  %v4614_v60 = vsel %vm4566_vm10, %v5024_v37, 0  ;;  %v4416_v4 = vmul.f32 %v4158_v10, %v4158_v10  ;;  %v4508_v20 = vadd.f32 %v4507_v19, %v4506_v15 }
 0x3c9   : > { %4662 = vst.msk [vmem:[%s7015_s26 + $0xb8] sm:$0xf] %vm4160_vm15, %v4614_v60  ;;  %v3725_v51 = vsub.s32 %v8802_v42, %v3724_v59  ;;  %v2284_v28 = vpop.f32.mrf.mxu3  ;;  %v4358_v24 = vsel %vm9512_vm4, %v4158_v10, 0.0 }
 0x3ca   : > { %4261 = vst.msk [vmem:[%s6983_s25 + $0xd0] sm:$0xf] %vm4160_vm15, %v4213_v16  ;;  %v4359_v55 = vadd.f32 %v4358_v24, %v4357_v9  ;;  %v4509_v42 = vsel %vm9513_vm1, %v4416_v4, 0.0 }
 0x3cb   : > { %vm3775_vm6 = vcmp.ne.s32.totalorder %v3725_v51, 0  ;;  %vm3823_vm3 = vcmp.lt.s32.totalorder %v3725_v51, 0  ;;  %v3919_v38 = vadd.s32 24, %v3725_v51  ;;  %v4510_v2 = vadd.f32 %v4509_v42, %v4508_v20 }
 0x3cc   : > { %vm3871_vm9 = vmand %vm3823_vm3, %vm3775_vm6 }
 0x3cd   : > { %v3967_v54 = vsel %vm3871_vm9, %v3919_v38, %v3725_v51 }
 0x3ce   : > { %vm4015_vm8 = vcmp.lt.s32.totalorder %v3967_v54, 16 }
 0x3cf   : > { %v4159_v7 = vsel %vm4015_vm8, %v2284_v28, 0.0  ;;  %vm4567_vm13 = vmpackc.low %vm4015_vm8, %vm4015_vm8 }
 0x3d0   : > { %v4214_v22 = vpack.c.bf16 %v4159_v7, %v4159_v7  ;;  %v4360_v48 = vsel %vm9514_vm14, %v4159_v7, 0.0  ;;  %v4417_v5 = vmul.f32 %v4159_v7, %v4159_v7  ;;  %v4615_v40 = vsel %vm4567_vm13, %v5025_v45, 0 }
 0x3d1   : > { %v4361_v13 = vadd.f32 %v4360_v48, %v4359_v55  ;;  %4663 = vst.msk [vmem:[%s7015_s26 + $0xbc] sm:$0xf] %vm4160_vm15, %v4615_v40 }
 0x3d2   : > { %4262 = vst.msk [vmem:[%s6983_s25 + $0xd4] sm:$0xf] %vm4160_vm15, %v4214_v22  ;;  %v4511_v49 = vsel %vm9515_vm5, %v4417_v5, 0.0  ;;  %vm4368_vm15 = vcmask 24576   ;;  %s8888_s25 = sshll.u32 %s4703_s7, 4  ;;  %s4708_s25 = int_to_ptr.hbm [resolvable:$true] %s8888_s25 }
 0x3d3   : > { %v4362_v30 = vrot.slane %v4361_v13, 4  ;;  %v4512_v21 = vadd.f32 %v4511_v49, %v4510_v2 }
 0x3d5   : > { %v4363_v29 = vadd.f32 %v4362_v30, %v4361_v13  ;;  %v4513_v27 = vrot.slane %v4512_v21, 4 }
 0x3d7   : > { %v4364_v46 = vrot.slane %v4363_v29, 2  ;;  %v4514_v56 = vadd.f32 %v4513_v27, %v4512_v21 }
 0x3d9   : > { %v4365_v63 = vadd.f32 %v4364_v46, %v4363_v29  ;;  %v4515_v39 = vrot.slane %v4514_v56, 2 }
 0x3db   : > { %v4366_v62 = vrot.slane %v4365_v63, 1  ;;  %v4516_v58 = vadd.f32 %v4515_v39, %v4514_v56 }
 0x3dd   : > { %v4367_v18 = vadd.f32 %v4366_v62, %v4365_v63  ;;  %v4517_v34 = vrot.slane %v4516_v58, 1 }
 0x3df   : > { %4369 = vst.msk [vmem:[%s227_s8] sm:$0x1] %vm4368_vm15, %v4367_v18  ;;  %v4518_v14 = vadd.f32 %v4517_v34, %v4516_v58 }
 0x3e0   : > { %5053 = shalt.err (!%p5050_p3)
}
 0x3e1   : > { %4924 = dma.vmem_to_hbm [thread:$0]  (%p5199_p5), %s4693_s10, 16, %s4695_s11, %s4670_s22   ;;  %4519 = vst.msk [vmem:[%s233_s12] sm:$0x1] %vm4368_vm15, %v4518_v14 }
 0x3e2   : > { %s4674_s17 = scalar_lea.sflag [#allocation5], %s8870_s13  ;;  %s5068_s7 = sshra.s32 %s4708_s25, 4  ;;  %s5069_s7 = int_to_ptr.hbm [resolvable:$true] %s5068_s7 }
 0x3e3   : > { %s5070_s8 = scalar_lea.hbm %s5069_s7, 1  ;;  %s5074_s26 = scalar_lea.hbm %s8945_s4, 2 }
 0x3e4   : > { %p5071_p4 = scmp.ne.s32.totalorder %s5069_s7, %s5070_s8  ;;  %p5075_p9 = scmp.lt.s32.totalorder %s5069_s7, %s8945_s4 }
 0x3e5   : > { %p5076_p10 = scmp.lt.s32.totalorder %s5074_s26, %s5070_s8 }
 0x3e6   : > { %p5072_p7 = pnand %p5071_p4, %p5199_p5 }
 0x3e7   : > { %p5077_p11 = por %p5076_p10, %p5075_p9 }
 0x3e8   : > { %p5073_p8 = pneg %p5072_p7 }
 0x3ea   : > { %p5078_p12 = pnand %p5077_p11, %p5073_p8 }
 0x3ec   : > { %5081 = shalt.err (!%p5078_p12)
}
 0x3ed   : > { %4925 = dma.vmem_to_hbm [thread:$0]  (%p5199_p5), %s4706_s23, 16, %s4708_s25, %s4674_s17  }
 0x3ee PF: > { %p4935_p13 = scmp.ge.s32.totalorder %s5120_s21, 2  ;;  %s4730_s13 = sand.u32 1, %s5108_s18  }
 0x3ef   : > { %s4731_s10 = scalar_lea.sflag [#allocation3], %s4730_s13 }
 0x3f0   : > { %p4929_p0 = pnand %p4935_p13, %p5203_p6 }
 0x3f2   : > { %p4930_p1 = pneg %p4929_p0 }
 0x3f4   : > { %5099 = dma.done.wait (%p4930_p1), %s4731_s10, 16  }
 0x3f5   : > { %5101 = vsyncadd (%p4930_p1), %s4731_s10, 4294967280  ;;  %s4740_s11 = scalar_lea.sflag [#allocation5], %s4730_s13 }
 0x3f6   : > { %5103 = dma.done.wait (%p4930_p1), %s4740_s11, 16  }
 0x3f7   : > { %5105 = vsyncadd (%p4930_p1), %s4740_s11, 4294967280  ;;  %p19_p5 = scmp.ge.s32.totalorder %s5186_s24, 4   ;;  %s9516_s18 = smov %s5112_s19 }
 0x3f8   : > { %s9517_s19 = smov %s5116_s20  ;;  %s9518_s20 = smov %s5197_s27 }
 0x3f9   : > { %s9519_s21 = smov %s5186_s24  ;;  %21 = sbr.rel (!%p19_p5) target bundleno = 5 (0x5), region = 104 }
 0x3fe   :  { %4753 = vsyncpa [#allocation3], 1 }
 0x3ff   :  { %4755 = vsyncpa [#allocation3 + $0x1], 1 }
 0x400   :  { %4756 = vsyncpa [#allocation5], 1 }
 0x401   :  { %4758 = vsyncpa [#allocation5 + $0x1], 1 }

</bundles_post_ra>
